<compile_context>
chip_gen: v6e
topology: v6e:2x2x1
jax: 0.10.0
libtpu: 0.0.40
codegen_flags: <defaults>
</compile_context>

<pallas_src>
import functools

import jax
import jax.numpy as jnp
from jax import lax
from jax.experimental import pallas as pl
from jax.experimental.pallas import tpu as pltpu


def _sigmoid(x):
    # Exact sigmoid (review: approx reciprocal drifts over T steps x 2 layers).
    return 1.0 / (1.0 + jnp.exp(-x))


# ----------------------------------------------------------------------------
# Fused kernel: embedding gather + both BiLSTM layers + fc + sigmoid.
# ----------------------------------------------------------------------------
def _bilstm_sentiment_kernel(
        ids_ref,        # (T*B, 1) int32  time-major token ids
        emb_ref,        # (Vp, E)         zero-padded embedding table
        h0_ref,         # (L, B, 2H)      [fwd | bwd] lane-concat initial h
        c0_ref,         # (L, B, 2H)
        fcw_ref,        # (1, H)
        fcb_ref,        # (1, 1)
        wih0_ref,       # (E, 8H)         layer-0 fused input weights
        wih_rest_ref,   # (max(L-1,1), 2H, 8H) fused input weights for layers>=1
        whh_ref,        # (L, 2H, 8H)     block-diagonal fused hidden weights
        b_ref,          # (L, 1, 8H)      fused bias (b_ih + b_hh)
        sig_ref,        # out (B, 1)
        hn_ref,         # out (2L, B, H)
        cn_ref,         # out (2L, B, H)
        xw_ref,         # scratch (T*B, 8H)  [fwd 4H | bwd 4H] input projections
        out_ref,        # scratch (T*B, 2H)  [fwd H | bwd H] layer outputs (time order)
        *, hidden_dim, seq_len, batch, no_layers, vocab_pad):
    H, T, B, L, Vp = hidden_dim, seq_len, batch, no_layers, vocab_pad
    TB = T * B
    f32 = jnp.float32

    # ---- Embedding gather in-kernel: one-hot (TB, Vp) @ table (Vp, E). ----
    ids = ids_ref[...]                                                 # (TB, 1)
    onehot = (ids == lax.broadcasted_iota(jnp.int32, (TB, Vp), 1)).astype(f32)
    x = jnp.dot(onehot, emb_ref[...], preferred_element_type=f32)      # (TB, E)

    unroll = True if T <= 16 else 8   # cap unroll at realistic T

    for layer in range(L):
        # ---- Hoisted input projection: ONE (TB, in) x (in, 8H) matmul over
        # all timesteps & both directions, bias folded in once.
        # Fused gate column order per direction: (i, f, o, g). ----
        if layer == 0:
            proj = jnp.dot(x, wih0_ref[...], preferred_element_type=f32)
        else:
            proj = jnp.dot(out_ref[...], wih_rest_ref[layer - 1],
                           preferred_element_type=f32)
        xw_ref[...] = proj + b_ref[layer]

        w_hh = whh_ref[layer]                       # (2H, 8H), hoisted

        def step(s, carry):
            h_cat, c_f, c_b = carry                 # (B,2H), (B,H), (B,H)
            of = pl.multiple_of(s * B, B)           # fwd: time s
            ob = pl.multiple_of((T - 1 - s) * B, B)  # bwd: time T-1-s
            # ONE fused MXU push on the serial chain (block-diagonal W_hh).
            mm = jnp.dot(h_cat, w_hh, preferred_element_type=f32)       # (B, 8H)
            gf = xw_ref[pl.ds(of, B), 0:4 * H] + mm[:, 0:4 * H]
            gb = xw_ref[pl.ds(ob, B), 4 * H:8 * H] + mm[:, 4 * H:8 * H]
            # Gate order (i, f, o, g): sigmoid on one 3H slab, tanh on one H slab.
            sgf = _sigmoid(gf[:, 0:3 * H])
            ggf = jnp.tanh(gf[:, 3 * H:4 * H])
            sgb = _sigmoid(gb[:, 0:3 * H])
            ggb = jnp.tanh(gb[:, 3 * H:4 * H])
            c_f = sgf[:, H:2 * H] * c_f + sgf[:, 0:H] * ggf
            c_b = sgb[:, H:2 * H] * c_b + sgb[:, 0:H] * ggb
            h_f = sgf[:, 2 * H:3 * H] * jnp.tanh(c_f)
            h_b = sgb[:, 2 * H:3 * H] * jnp.tanh(c_b)
            out_ref[pl.ds(of, B), 0:H] = h_f           # fwd, time order
            out_ref[pl.ds(ob, B), H:2 * H] = h_b       # bwd, already time order
            return jnp.concatenate([h_f, h_b], axis=-1), c_f, c_b

        c0cat = c0_ref[layer]
        init = (h0_ref[layer], c0cat[:, 0:H], c0cat[:, H:2 * H])
        h_cat, c_f, c_b = lax.fori_loop(0, T, step, init, unroll=unroll)

        hn_ref[2 * layer] = h_cat[:, 0:H]
        hn_ref[2 * layer + 1] = h_cat[:, H:2 * H]
        cn_ref[2 * layer] = c_f
        cn_ref[2 * layer + 1] = c_b

    # ---- fc + sigmoid fused in-kernel. PyTorch's view(-1,H) -> fc ->
    # view(B,-1) -> [:, -1] selects the TOP layer's BACKWARD output at time
    # T-1 (the first backward step). Computed as a VPU reduction. ----
    last_b = out_ref[(T - 1) * B:T * B, H:2 * H]                       # (B, H)
    logit = (jnp.sum(last_b * fcw_ref[...], axis=-1, keepdims=True)
             + fcb_ref[...])
    sig_ref[...] = _sigmoid(logit)


# ----------------------------------------------------------------------------
# Wrapper: weight fusion / gate permutation in plain JAX, rest in the kernel.
# ----------------------------------------------------------------------------
def sentiment_rnn_forward(params, x_ids, hidden):
    h0, c0 = hidden                                   # (no_layers*2, B, H) each
    B, T = x_ids.shape
    H = params['hidden_dim']
    L = params['no_layers']
    emb = params['embedding'].astype(jnp.float32)
    V, E = emb.shape
    Vp = ((V + 127) // 128) * 128
    emb_p = jnp.pad(emb, ((0, Vp - V), (0, 0)))

    # time-major ids, (T*B, 1); row index = t*B + b.
    ids_tm = x_ids.T.reshape(T * B, 1).astype(jnp.int32)

    def perm(w):   # PyTorch gate order (i,f,g,o) -> kernel order (i,f,o,g)
        i, f, g, o = jnp.split(w, 4, axis=-1)
        return jnp.concatenate([i, f, o, g], axis=-1)

    def fuse_dirs(wf, wb):   # (in,4H),(in,4H) -> (in,8H) = [fwd | bwd]
        return jnp.concatenate([perm(wf), perm(wb)], axis=-1)

    def blockdiag(whh_f, whh_b):   # -> (2H, 8H)
        z = jnp.zeros((H, 4 * H), jnp.float32)
        top = jnp.concatenate([perm(whh_f), z], axis=-1)
        bot = jnp.concatenate([z, perm(whh_b)], axis=-1)
        return jnp.concatenate([top, bot], axis=0)

    lstm = params['lstm']
    wih0 = fuse_dirs(lstm[0]['w_ih_f'], lstm[0]['w_ih_b'])            # (E, 8H)
    if L > 1:
        wih_rest = jnp.stack([fuse_dirs(lstm[l]['w_ih_f'], lstm[l]['w_ih_b'])
                              for l in range(1, L)])                   # (L-1,2H,8H)
    else:   # unused dummy so the kernel signature stays fixed
        wih_rest = jnp.zeros((1, 2 * H, 8 * H), jnp.float32)
    whh = jnp.stack([blockdiag(lstm[l]['w_hh_f'], lstm[l]['w_hh_b'])
                     for l in range(L)])                               # (L, 2H, 8H)
    bias = jnp.stack([fuse_dirs(lstm[l]['b_f'], lstm[l]['b_b'])
                      for l in range(L)])                              # (L, 1, 8H)

    h0c = jnp.concatenate([h0[0::2], h0[1::2]], axis=-1)               # (L, B, 2H)
    c0c = jnp.concatenate([c0[0::2], c0[1::2]], axis=-1)
    fc_w = params['fc_w'].reshape(1, H)
    fc_b = params['fc_b'].reshape(1, 1)

    kernel = functools.partial(_bilstm_sentiment_kernel, hidden_dim=H,
                               seq_len=T, batch=B, no_layers=L, vocab_pad=Vp)
    vmem = pl.BlockSpec(memory_space=pltpu.MemorySpace.VMEM)
    sig, h_n, c_n = pl.pallas_call(
        kernel,
        out_shape=(jax.ShapeDtypeStruct((B, 1), jnp.float32),
                   jax.ShapeDtypeStruct((2 * L, B, H), jnp.float32),
                   jax.ShapeDtypeStruct((2 * L, B, H), jnp.float32)),
        in_specs=[vmem] * 10,
        out_specs=(vmem, vmem, vmem),
        scratch_shapes=[pltpu.VMEM((T * B, 8 * H), jnp.float32),
                        pltpu.VMEM((T * B, 2 * H), jnp.float32)],
        # Demo sizes are tiny; raise for long T on v6e (128 MiB physical),
        # switch to T-tiling on v7x (64 MiB physical).
        compiler_params=pltpu.CompilerParams(
            vmem_limit_bytes=32 * 1024 * 1024),
    )(ids_tm, emb_p, h0c, c0c, fc_w, fc_b, wih0, wih_rest, whh, bias)

    # nn.Dropout(0.05) is identity in eval mode.
    # TODO(synk): training-mode stochastic dropout not implemented (eval semantics).
    return sig[:, 0], (h_n, c_n)


# ----------------------------------------------------------------------------
# Deterministic parameter initialization (synthetic; no checkpoint load).
# Weights stored pre-transposed as (in_features, 4H) in PyTorch gate order.
# ----------------------------------------------------------------------------
def init_params(key, vocab_size, embedding_dim, hidden_dim, no_layers):
    bound = 1.0 / float(hidden_dim) ** 0.5

    def uni(k, shape):
        return jax.random.uniform(k, shape, jnp.float32, -bound, bound)

    key, ek = jax.random.split(key)
    params = {
        'embedding': jax.random.normal(ek, (vocab_size, embedding_dim),
                                       jnp.float32) * 0.1,
        'hidden_dim': hidden_dim,
        'no_layers': no_layers,
        'lstm': [],
    }
    in_dim = embedding_dim
    for _ in range(no_layers):
        layer_p = {}
        for dirn in ('f', 'b'):
            key, k1, k2, k3, k4 = jax.random.split(key, 5)
            layer_p['w_ih_' + dirn] = uni(k1, (in_dim, 4 * hidden_dim))
            layer_p['w_hh_' + dirn] = uni(k2, (hidden_dim, 4 * hidden_dim))
            layer_p['b_' + dirn] = (uni(k3, (1, 4 * hidden_dim))
                                    + uni(k4, (1, 4 * hidden_dim)))  # b_ih + b_hh
        params['lstm'].append(layer_p)
        in_dim = 2 * hidden_dim
    key, fw, fb = jax.random.split(key, 3)
    params['fc_w'] = uni(fw, (1, hidden_dim))
    params['fc_b'] = uni(fb, (1, 1))
    return params


if __name__ == "__main__":
    vocab_size = 50
    embedding_dim = 32
    hidden_dim = 32
    no_layers = 2
    B, T = 8, 8   # B=8 keeps every per-step row block sublane-aligned

    key = jax.random.PRNGKey(0)
    key, pk, xk = jax.random.split(key, 3)
    params = init_params(pk, vocab_size, embedding_dim, hidden_dim, no_layers)

    x_ids = jax.random.randint(xk, (B, T), 0, vocab_size, dtype=jnp.int32)
    # init_hidden(batch_size): zeros, shape (no_layers*2, B, H)
    h0 = jnp.zeros((no_layers * 2, B, hidden_dim), jnp.float32)
    c0 = jnp.zeros((no_layers * 2, B, hidden_dim), jnp.float32)

    sig_out, (h_n, c_n) = sentiment_rnn_forward(params, x_ids, (h0, c0))
    jax.block_until_ready((sig_out, h_n, c_n))

    assert sig_out.shape == (B,)
    assert h_n.shape == (no_layers * 2, B, hidden_dim)
    assert c_n.shape == (no_layers * 2, B, hidden_dim)
    assert bool(jnp.all(jnp.isfinite(sig_out)))
    assert bool(jnp.all((sig_out >= 0.0) & (sig_out <= 1.0)))
    print("KERNEL_OK")
</pallas_src>

<mosaic_0001>
module attributes {stable_mosaic.version = 11 : i64} {
  func.func @_bilstm_sentiment_kernel(%arg0: memref<64x1xi32, #tpu.memory_space<vmem>>, %arg1: memref<128x32xf32, #tpu.memory_space<vmem>>, %arg2: memref<2x8x64xf32, #tpu.memory_space<vmem>>, %arg3: memref<2x8x64xf32, #tpu.memory_space<vmem>>, %arg4: memref<1x32xf32, #tpu.memory_space<vmem>>, %arg5: memref<1x1xf32, #tpu.memory_space<vmem>>, %arg6: memref<32x256xf32, #tpu.memory_space<vmem>>, %arg7: memref<1x64x256xf32, #tpu.memory_space<vmem>>, %arg8: memref<2x64x256xf32, #tpu.memory_space<vmem>>, %arg9: memref<2x1x256xf32, #tpu.memory_space<vmem>>, %arg10: memref<8x1xf32, #tpu.memory_space<vmem>>, %arg11: memref<4x8x32xf32, #tpu.memory_space<vmem>>, %arg12: memref<4x8x32xf32, #tpu.memory_space<vmem>>, %arg13: memref<64x256xf32, #tpu.memory_space<vmem>>, %arg14: memref<64x64xf32, #tpu.memory_space<vmem>>) attributes {dimension_semantics = [], scalar_prefetch = 0 : i64, scratch_operands = 2 : i64, tpu.core_type = #tpu.core_type<tc>} {
    %c0 = arith.constant 0 : index
    %c0_0 = arith.constant 0 : index
    %0 = vector.load %arg0[%c0, %c0_0] : memref<64x1xi32, #tpu.memory_space<vmem>>, vector<64x1xi32>
    %1 = tpu.iota {dimensions = array<i32: 1>} : vector<64x128xi32>
    %2 = vector.broadcast %0 : vector<64x1xi32> to vector<64x128xi32>
    %3 = arith.cmpi eq, %2, %1 : vector<64x128xi32>
    %4 = arith.extui %3 : vector<64x128xi1> to vector<64x128xi32>
    %5 = arith.sitofp %4 : vector<64x128xi32> to vector<64x128xf32>
    %c0_1 = arith.constant 0 : index
    %c0_2 = arith.constant 0 : index
    %6 = vector.load %arg1[%c0_1, %c0_2] : memref<128x32xf32, #tpu.memory_space<vmem>>, vector<128x32xf32>
    %cst = arith.constant dense<0.000000e+00> : vector<64x32xf32>
    %7 = tpu.matmul %5, %6, %cst {dimension_numbers = #tpu.dot_dimension_numbers<[1], [0], [0], [1], [0, 0, 1, 1], [], []>} : vector<64x128xf32>, vector<128x32xf32>, vector<64x32xf32> -> vector<64x32xf32>
    %c0_3 = arith.constant 0 : index
    %c0_4 = arith.constant 0 : index
    %8 = vector.load %arg6[%c0_3, %c0_4] : memref<32x256xf32, #tpu.memory_space<vmem>>, vector<32x256xf32>
    %cst_5 = arith.constant dense<0.000000e+00> : vector<64x256xf32>
    %9 = tpu.matmul %7, %8, %cst_5 {dimension_numbers = #tpu.dot_dimension_numbers<[1], [0], [0], [1], [0, 0, 1, 1], [], []>} : vector<64x32xf32>, vector<32x256xf32>, vector<64x256xf32> -> vector<64x256xf32>
    %c0_6 = arith.constant 0 : index
    %c0_7 = arith.constant 0 : index
    %c0_8 = arith.constant 0 : index
    %10 = vector.load %arg9[%c0_6, %c0_7, %c0_8] : memref<2x1x256xf32, #tpu.memory_space<vmem>>, vector<1x1x256xf32>
    %11 = vector.shape_cast %10 : vector<1x1x256xf32> to vector<1x256xf32>
    %12 = vector.broadcast %11 : vector<1x256xf32> to vector<64x256xf32>
    %13 = arith.addf %9, %12 : vector<64x256xf32>
    %c0_9 = arith.constant 0 : index
    %c0_10 = arith.constant 0 : index
    %14 = vector.load %arg13[%c0_9, %c0_10] : memref<64x256xf32, #tpu.memory_space<vmem>>, vector<64x256xf32>
    tpu.vector_store %arg13[%c0_9, %c0_10], %13 {strides = array<i32>} : memref<64x256xf32, #tpu.memory_space<vmem>>, vector<64x256xf32>,
    %c0_11 = arith.constant 0 : index
    %c0_12 = arith.constant 0 : index
    %c0_13 = arith.constant 0 : index
    %15 = vector.load %arg8[%c0_11, %c0_12, %c0_13] : memref<2x64x256xf32, #tpu.memory_space<vmem>>, vector<1x64x256xf32>
    %16 = vector.shape_cast %15 : vector<1x64x256xf32> to vector<64x256xf32>
    %c0_14 = arith.constant 0 : index
    %c0_15 = arith.constant 0 : index
    %c0_16 = arith.constant 0 : index
    %17 = vector.load %arg3[%c0_14, %c0_15, %c0_16] : memref<2x8x64xf32, #tpu.memory_space<vmem>>, vector<1x8x64xf32>
    %18 = vector.shape_cast %17 : vector<1x8x64xf32> to vector<8x64xf32>
    %c0_17 = arith.constant 0 : index
    %c0_18 = arith.constant 0 : index
    %c0_19 = arith.constant 0 : index
    %19 = vector.load %arg2[%c0_17, %c0_18, %c0_19] : memref<2x8x64xf32, #tpu.memory_space<vmem>>, vector<1x8x64xf32>
    %20 = vector.shape_cast %19 : vector<1x8x64xf32> to vector<8x64xf32>
    %21 = vector.extract_strided_slice %18 {offsets = [0, 0], sizes = [8, 32], strides = [1, 1]} : vector<8x64xf32> to vector<8x32xf32>
    %22 = vector.extract_strided_slice %18 {offsets = [0, 32], sizes = [8, 32], strides = [1, 1]} : vector<8x64xf32> to vector<8x32xf32>
    %c0_i32 = arith.constant 0 : i32
    %c8_i32 = arith.constant 8 : i32
    %23 = arith.muli %c0_i32, %c8_i32 : i32
    %24 = tpu.assume_multiple %23, 8 : i32
    %c7_i32 = arith.constant 7 : i32
    %25 = arith.subi %c7_i32, %c0_i32 : i32
    %c8_i32_20 = arith.constant 8 : i32
    %26 = arith.muli %25, %c8_i32_20 : i32
    %27 = tpu.assume_multiple %26, 8 : i32
    %cst_21 = arith.constant dense<0.000000e+00> : vector<8x256xf32>
    %28 = tpu.matmul %20, %16, %cst_21 {dimension_numbers = #tpu.dot_dimension_numbers<[1], [0], [0], [1], [0, 0, 1, 1], [], []>} : vector<8x64xf32>, vector<64x256xf32>, vector<8x256xf32> -> vector<8x256xf32>
    %29 = arith.index_cast %24 : i32 to index
    %c0_22 = arith.constant 0 : index
    %30 = vector.load %arg13[%29, %c0_22] : memref<64x256xf32, #tpu.memory_space<vmem>>, vector<8x128xf32>
    %31 = vector.extract_strided_slice %28 {offsets = [0, 0], sizes = [8, 128], strides = [1, 1]} : vector<8x256xf32> to vector<8x128xf32>
    %32 = arith.addf %30, %31 : vector<8x128xf32>
    %33 = arith.index_cast %27 : i32 to index
    %c128 = arith.constant 128 : index
    %34 = vector.load %arg13[%33, %c128] : memref<64x256xf32, #tpu.memory_space<vmem>>, vector<8x128xf32>
    %35 = vector.extract_strided_slice %28 {offsets = [0, 128], sizes = [8, 128], strides = [1, 1]} : vector<8x256xf32> to vector<8x128xf32>
    %36 = arith.addf %34, %35 : vector<8x128xf32>
    %37 = vector.extract_strided_slice %32 {offsets = [0, 0], sizes = [8, 96], strides = [1, 1]} : vector<8x128xf32> to vector<8x96xf32>
    %cst_23 = arith.constant 0.000000e+00 : f32
    %38 = vector.broadcast %cst_23 : f32 to vector<8x96xf32>
    %39 = arith.subf %38, %37 : vector<8x96xf32>
    %40 = math.exp %39 : vector<8x96xf32>
    %cst_24 = arith.constant 1.000000e+00 : f32
    %41 = vector.broadcast %cst_24 : f32 to vector<8x96xf32>
    %42 = arith.addf %41, %40 : vector<8x96xf32>
    %cst_25 = arith.constant 1.000000e+00 : f32
    %43 = vector.broadcast %cst_25 : f32 to vector<8x96xf32>
    %44 = arith.divf %43, %42 : vector<8x96xf32>
    %45 = vector.extract_strided_slice %32 {offsets = [0, 96], sizes = [8, 32], strides = [1, 1]} : vector<8x128xf32> to vector<8x32xf32>
    %46 = math.tanh %45 : vector<8x32xf32>
    %47 = vector.extract_strided_slice %36 {offsets = [0, 0], sizes = [8, 96], strides = [1, 1]} : vector<8x128xf32> to vector<8x96xf32>
    %cst_26 = arith.constant 0.000000e+00 : f32
    %48 = vector.broadcast %cst_26 : f32 to vector<8x96xf32>
    %49 = arith.subf %48, %47 : vector<8x96xf32>
    %50 = math.exp %49 : vector<8x96xf32>
    %cst_27 = arith.constant 1.000000e+00 : f32
    %51 = vector.broadcast %cst_27 : f32 to vector<8x96xf32>
    %52 = arith.addf %51, %50 : vector<8x96xf32>
    %cst_28 = arith.constant 1.000000e+00 : f32
    %53 = vector.broadcast %cst_28 : f32 to vector<8x96xf32>
    %54 = arith.divf %53, %52 : vector<8x96xf32>
    %55 = vector.extract_strided_slice %36 {offsets = [0, 96], sizes = [8, 32], strides = [1, 1]} : vector<8x128xf32> to vector<8x32xf32>
    %56 = math.tanh %55 : vector<8x32xf32>
    %57 = vector.extract_strided_slice %44 {offsets = [0, 32], sizes = [8, 32], strides = [1, 1]} : vector<8x96xf32> to vector<8x32xf32>
    %58 = arith.mulf %57, %21 : vector<8x32xf32>
    %59 = vector.extract_strided_slice %44 {offsets = [0, 0], sizes = [8, 32], strides = [1, 1]} : vector<8x96xf32> to vector<8x32xf32>
    %60 = arith.mulf %59, %46 : vector<8x32xf32>
    %61 = arith.addf %58, %60 : vector<8x32xf32>
    %62 = vector.extract_strided_slice %54 {offsets = [0, 32], sizes = [8, 32], strides = [1, 1]} : vector<8x96xf32> to vector<8x32xf32>
    %63 = arith.mulf %62, %22 : vector<8x32xf32>
    %64 = vector.extract_strided_slice %54 {offsets = [0, 0], sizes = [8, 32], strides = [1, 1]} : vector<8x96xf32> to vector<8x32xf32>
    %65 = arith.mulf %64, %56 : vector<8x32xf32>
    %66 = arith.addf %63, %65 : vector<8x32xf32>
    %67 = vector.extract_strided_slice %44 {offsets = [0, 64], sizes = [8, 32], strides = [1, 1]} : vector<8x96xf32> to vector<8x32xf32>
    %68 = math.tanh %61 : vector<8x32xf32>
    %69 = arith.mulf %67, %68 : vector<8x32xf32>
    %70 = vector.extract_strided_slice %54 {offsets = [0, 64], sizes = [8, 32], strides = [1, 1]} : vector<8x96xf32> to vector<8x32xf32>
    %71 = math.tanh %66 : vector<8x32xf32>
    %72 = arith.mulf %70, %71 : vector<8x32xf32>
    %73 = arith.index_cast %24 : i32 to index
    %c0_29 = arith.constant 0 : index
    %74 = vector.load %arg14[%73, %c0_29] : memref<64x64xf32, #tpu.memory_space<vmem>>, vector<8x32xf32>
    tpu.vector_store %arg14[%73, %c0_29], %69 {strides = array<i32>} : memref<64x64xf32, #tpu.memory_space<vmem>>, vector<8x32xf32>,
    %75 = arith.index_cast %27 : i32 to index
    %c32 = arith.constant 32 : index
    %76 = vector.load %arg14[%75, %c32] : memref<64x64xf32, #tpu.memory_space<vmem>>, vector<8x32xf32>
    tpu.vector_store %arg14[%75, %c32], %72 {strides = array<i32>} : memref<64x64xf32, #tpu.memory_space<vmem>>, vector<8x32xf32>,
    %77 = tpu.concatenate %69, %72 in 1 : vector<8x32xf32>, vector<8x32xf32> -> vector<8x64xf32>
    %c1_i32 = arith.constant 1 : i32
    %c8_i32_30 = arith.constant 8 : i32
    %78 = arith.muli %c1_i32, %c8_i32_30 : i32
    %79 = tpu.assume_multiple %78, 8 : i32
    %c7_i32_31 = arith.constant 7 : i32
    %80 = arith.subi %c7_i32_31, %c1_i32 : i32
    %c8_i32_32 = arith.constant 8 : i32
    %81 = arith.muli %80, %c8_i32_32 : i32
    %82 = tpu.assume_multiple %81, 8 : i32
    %cst_33 = arith.constant dense<0.000000e+00> : vector<8x256xf32>
    %83 = tpu.matmul %77, %16, %cst_33 {dimension_numbers = #tpu.dot_dimension_numbers<[1], [0], [0], [1], [0, 0, 1, 1], [], []>} : vector<8x64xf32>, vector<64x256xf32>, vector<8x256xf32> -> vector<8x256xf32>
    %84 = arith.index_cast %79 : i32 to index
    %c0_34 = arith.constant 0 : index
    %85 = vector.load %arg13[%84, %c0_34] : memref<64x256xf32, #tpu.memory_space<vmem>>, vector<8x128xf32>
    %86 = vector.extract_strided_slice %83 {offsets = [0, 0], sizes = [8, 128], strides = [1, 1]} : vector<8x256xf32> to vector<8x128xf32>
    %87 = arith.addf %85, %86 : vector<8x128xf32>
    %88 = arith.index_cast %82 : i32 to index
    %c128_35 = arith.constant 128 : index
    %89 = vector.load %arg13[%88, %c128_35] : memref<64x256xf32, #tpu.memory_space<vmem>>, vector<8x128xf32>
    %90 = vector.extract_strided_slice %83 {offsets = [0, 128], sizes = [8, 128], strides = [1, 1]} : vector<8x256xf32> to vector<8x128xf32>
    %91 = arith.addf %89, %90 : vector<8x128xf32>
    %92 = vector.extract_strided_slice %87 {offsets = [0, 0], sizes = [8, 96], strides = [1, 1]} : vector<8x128xf32> to vector<8x96xf32>
    %cst_36 = arith.constant 0.000000e+00 : f32
    %93 = vector.broadcast %cst_36 : f32 to vector<8x96xf32>
    %94 = arith.subf %93, %92 : vector<8x96xf32>
    %95 = math.exp %94 : vector<8x96xf32>
    %cst_37 = arith.constant 1.000000e+00 : f32
    %96 = vector.broadcast %cst_37 : f32 to vector<8x96xf32>
    %97 = arith.addf %96, %95 : vector<8x96xf32>
    %cst_38 = arith.constant 1.000000e+00 : f32
    %98 = vector.broadcast %cst_38 : f32 to vector<8x96xf32>
    %99 = arith.divf %98, %97 : vector<8x96xf32>
    %100 = vector.extract_strided_slice %87 {offsets = [0, 96], sizes = [8, 32], strides = [1, 1]} : vector<8x128xf32> to vector<8x32xf32>
    %101 = math.tanh %100 : vector<8x32xf32>
    %102 = vector.extract_strided_slice %91 {offsets = [0, 0], sizes = [8, 96], strides = [1, 1]} : vector<8x128xf32> to vector<8x96xf32>
    %cst_39 = arith.constant 0.000000e+00 : f32
    %103 = vector.broadcast %cst_39 : f32 to vector<8x96xf32>
    %104 = arith.subf %103, %102 : vector<8x96xf32>
    %105 = math.exp %104 : vector<8x96xf32>
    %cst_40 = arith.constant 1.000000e+00 : f32
    %106 = vector.broadcast %cst_40 : f32 to vector<8x96xf32>
    %107 = arith.addf %106, %105 : vector<8x96xf32>
    %cst_41 = arith.constant 1.000000e+00 : f32
    %108 = vector.broadcast %cst_41 : f32 to vector<8x96xf32>
    %109 = arith.divf %108, %107 : vector<8x96xf32>
    %110 = vector.extract_strided_slice %91 {offsets = [0, 96], sizes = [8, 32], strides = [1, 1]} : vector<8x128xf32> to vector<8x32xf32>
    %111 = math.tanh %110 : vector<8x32xf32>
    %112 = vector.extract_strided_slice %99 {offsets = [0, 32], sizes = [8, 32], strides = [1, 1]} : vector<8x96xf32> to vector<8x32xf32>
    %113 = arith.mulf %112, %61 : vector<8x32xf32>
    %114 = vector.extract_strided_slice %99 {offsets = [0, 0], sizes = [8, 32], strides = [1, 1]} : vector<8x96xf32> to vector<8x32xf32>
    %115 = arith.mulf %114, %101 : vector<8x32xf32>
    %116 = arith.addf %113, %115 : vector<8x32xf32>
    %117 = vector.extract_strided_slice %109 {offsets = [0, 32], sizes = [8, 32], strides = [1, 1]} : vector<8x96xf32> to vector<8x32xf32>
    %118 = arith.mulf %117, %66 : vector<8x32xf32>
    %119 = vector.extract_strided_slice %109 {offsets = [0, 0], sizes = [8, 32], strides = [1, 1]} : vector<8x96xf32> to vector<8x32xf32>
    %120 = arith.mulf %119, %111 : vector<8x32xf32>
    %121 = arith.addf %118, %120 : vector<8x32xf32>
    %122 = vector.extract_strided_slice %99 {offsets = [0, 64], sizes = [8, 32], strides = [1, 1]} : vector<8x96xf32> to vector<8x32xf32>
    %123 = math.tanh %116 : vector<8x32xf32>
    %124 = arith.mulf %122, %123 : vector<8x32xf32>
    %125 = vector.extract_strided_slice %109 {offsets = [0, 64], sizes = [8, 32], strides = [1, 1]} : vector<8x96xf32> to vector<8x32xf32>
    %126 = math.tanh %121 : vector<8x32xf32>
    %127 = arith.mulf %125, %126 : vector<8x32xf32>
    %128 = arith.index_cast %79 : i32 to index
    %c0_42 = arith.constant 0 : index
    %129 = vector.load %arg14[%128, %c0_42] : memref<64x64xf32, #tpu.memory_space<vmem>>, vector<8x32xf32>
    tpu.vector_store %arg14[%128, %c0_42], %124 {strides = array<i32>} : memref<64x64xf32, #tpu.memory_space<vmem>>, vector<8x32xf32>,
    %130 = arith.index_cast %82 : i32 to index
    %c32_43 = arith.constant 32 : index
    %131 = vector.load %arg14[%130, %c32_43] : memref<64x64xf32, #tpu.memory_space<vmem>>, vector<8x32xf32>
    tpu.vector_store %arg14[%130, %c32_43], %127 {strides = array<i32>} : memref<64x64xf32, #tpu.memory_space<vmem>>, vector<8x32xf32>,
    %132 = tpu.concatenate %124, %127 in 1 : vector<8x32xf32>, vector<8x32xf32> -> vector<8x64xf32>
    %c2_i32 = arith.constant 2 : i32
    %c8_i32_44 = arith.constant 8 : i32
    %133 = arith.muli %c2_i32, %c8_i32_44 : i32
    %134 = tpu.assume_multiple %133, 8 : i32
    %c7_i32_45 = arith.constant 7 : i32
    %135 = arith.subi %c7_i32_45, %c2_i32 : i32
    %c8_i32_46 = arith.constant 8 : i32
    %136 = arith.muli %135, %c8_i32_46 : i32
    %137 = tpu.assume_multiple %136, 8 : i32
    %cst_47 = arith.constant dense<0.000000e+00> : vector<8x256xf32>
    %138 = tpu.matmul %132, %16, %cst_47 {dimension_numbers = #tpu.dot_dimension_numbers<[1], [0], [0], [1], [0, 0, 1, 1], [], []>} : vector<8x64xf32>, vector<64x256xf32>, vector<8x256xf32> -> vector<8x256xf32>
    %139 = arith.index_cast %134 : i32 to index
    %c0_48 = arith.constant 0 : index
    %140 = vector.load %arg13[%139, %c0_48] : memref<64x256xf32, #tpu.memory_space<vmem>>, vector<8x128xf32>
    %141 = vector.extract_strided_slice %138 {offsets = [0, 0], sizes = [8, 128], strides = [1, 1]} : vector<8x256xf32> to vector<8x128xf32>
    %142 = arith.addf %140, %141 : vector<8x128xf32>
    %143 = arith.index_cast %137 : i32 to index
    %c128_49 = arith.constant 128 : index
    %144 = vector.load %arg13[%143, %c128_49] : memref<64x256xf32, #tpu.memory_space<vmem>>, vector<8x128xf32>
    %145 = vector.extract_strided_slice %138 {offsets = [0, 128], sizes = [8, 128], strides = [1, 1]} : vector<8x256xf32> to vector<8x128xf32>
    %146 = arith.addf %144, %145 : vector<8x128xf32>
    %147 = vector.extract_strided_slice %142 {offsets = [0, 0], sizes = [8, 96], strides = [1, 1]} : vector<8x128xf32> to vector<8x96xf32>
    %cst_50 = arith.constant 0.000000e+00 : f32
    %148 = vector.broadcast %cst_50 : f32 to vector<8x96xf32>
    %149 = arith.subf %148, %147 : vector<8x96xf32>
    %150 = math.exp %149 : vector<8x96xf32>
    %cst_51 = arith.constant 1.000000e+00 : f32
    %151 = vector.broadcast %cst_51 : f32 to vector<8x96xf32>
    %152 = arith.addf %151, %150 : vector<8x96xf32>
    %cst_52 = arith.constant 1.000000e+00 : f32
    %153 = vector.broadcast %cst_52 : f32 to vector<8x96xf32>
    %154 = arith.divf %153, %152 : vector<8x96xf32>
    %155 = vector.extract_strided_slice %142 {offsets = [0, 96], sizes = [8, 32], strides = [1, 1]} : vector<8x128xf32> to vector<8x32xf32>
    %156 = math.tanh %155 : vector<8x32xf32>
    %157 = vector.extract_strided_slice %146 {offsets = [0, 0], sizes = [8, 96], strides = [1, 1]} : vector<8x128xf32> to vector<8x96xf32>
    %cst_53 = arith.constant 0.000000e+00 : f32
    %158 = vector.broadcast %cst_53 : f32 to vector<8x96xf32>
    %159 = arith.subf %158, %157 : vector<8x96xf32>
    %160 = math.exp %159 : vector<8x96xf32>
    %cst_54 = arith.constant 1.000000e+00 : f32
    %161 = vector.broadcast %cst_54 : f32 to vector<8x96xf32>
    %162 = arith.addf %161, %160 : vector<8x96xf32>
    %cst_55 = arith.constant 1.000000e+00 : f32
    %163 = vector.broadcast %cst_55 : f32 to vector<8x96xf32>
    %164 = arith.divf %163, %162 : vector<8x96xf32>
    %165 = vector.extract_strided_slice %146 {offsets = [0, 96], sizes = [8, 32], strides = [1, 1]} : vector<8x128xf32> to vector<8x32xf32>
    %166 = math.tanh %165 : vector<8x32xf32>
    %167 = vector.extract_strided_slice %154 {offsets = [0, 32], sizes = [8, 32], strides = [1, 1]} : vector<8x96xf32> to vector<8x32xf32>
    %168 = arith.mulf %167, %116 : vector<8x32xf32>
    %169 = vector.extract_strided_slice %154 {offsets = [0, 0], sizes = [8, 32], strides = [1, 1]} : vector<8x96xf32> to vector<8x32xf32>
    %170 = arith.mulf %169, %156 : vector<8x32xf32>
    %171 = arith.addf %168, %170 : vector<8x32xf32>
    %172 = vector.extract_strided_slice %164 {offsets = [0, 32], sizes = [8, 32], strides = [1, 1]} : vector<8x96xf32> to vector<8x32xf32>
    %173 = arith.mulf %172, %121 : vector<8x32xf32>
    %174 = vector.extract_strided_slice %164 {offsets = [0, 0], sizes = [8, 32], strides = [1, 1]} : vector<8x96xf32> to vector<8x32xf32>
    %175 = arith.mulf %174, %166 : vector<8x32xf32>
    %176 = arith.addf %173, %175 : vector<8x32xf32>
    %177 = vector.extract_strided_slice %154 {offsets = [0, 64], sizes = [8, 32], strides = [1, 1]} : vector<8x96xf32> to vector<8x32xf32>
    %178 = math.tanh %171 : vector<8x32xf32>
    %179 = arith.mulf %177, %178 : vector<8x32xf32>
    %180 = vector.extract_strided_slice %164 {offsets = [0, 64], sizes = [8, 32], strides = [1, 1]} : vector<8x96xf32> to vector<8x32xf32>
    %181 = math.tanh %176 : vector<8x32xf32>
    %182 = arith.mulf %180, %181 : vector<8x32xf32>
    %183 = arith.index_cast %134 : i32 to index
    %c0_56 = arith.constant 0 : index
    %184 = vector.load %arg14[%183, %c0_56] : memref<64x64xf32, #tpu.memory_space<vmem>>, vector<8x32xf32>
    tpu.vector_store %arg14[%183, %c0_56], %179 {strides = array<i32>} : memref<64x64xf32, #tpu.memory_space<vmem>>, vector<8x32xf32>,
    %185 = arith.index_cast %137 : i32 to index
    %c32_57 = arith.constant 32 : index
    %186 = vector.load %arg14[%185, %c32_57] : memref<64x64xf32, #tpu.memory_space<vmem>>, vector<8x32xf32>
    tpu.vector_store %arg14[%185, %c32_57], %182 {strides = array<i32>} : memref<64x64xf32, #tpu.memory_space<vmem>>, vector<8x32xf32>,
    %187 = tpu.concatenate %179, %182 in 1 : vector<8x32xf32>, vector<8x32xf32> -> vector<8x64xf32>
    %c3_i32 = arith.constant 3 : i32
    %c8_i32_58 = arith.constant 8 : i32
    %188 = arith.muli %c3_i32, %c8_i32_58 : i32
    %189 = tpu.assume_multiple %188, 8 : i32
    %c7_i32_59 = arith.constant 7 : i32
    %190 = arith.subi %c7_i32_59, %c3_i32 : i32
    %c8_i32_60 = arith.constant 8 : i32
    %191 = arith.muli %190, %c8_i32_60 : i32
    %192 = tpu.assume_multiple %191, 8 : i32
    %cst_61 = arith.constant dense<0.000000e+00> : vector<8x256xf32>
    %193 = tpu.matmul %187, %16, %cst_61 {dimension_numbers = #tpu.dot_dimension_numbers<[1], [0], [0], [1], [0, 0, 1, 1], [], []>} : vector<8x64xf32>, vector<64x256xf32>, vector<8x256xf32> -> vector<8x256xf32>
    %194 = arith.index_cast %189 : i32 to index
    %c0_62 = arith.constant 0 : index
    %195 = vector.load %arg13[%194, %c0_62] : memref<64x256xf32, #tpu.memory_space<vmem>>, vector<8x128xf32>
    %196 = vector.extract_strided_slice %193 {offsets = [0, 0], sizes = [8, 128], strides = [1, 1]} : vector<8x256xf32> to vector<8x128xf32>
    %197 = arith.addf %195, %196 : vector<8x128xf32>
    %198 = arith.index_cast %192 : i32 to index
    %c128_63 = arith.constant 128 : index
    %199 = vector.load %arg13[%198, %c128_63] : memref<64x256xf32, #tpu.memory_space<vmem>>, vector<8x128xf32>
    %200 = vector.extract_strided_slice %193 {offsets = [0, 128], sizes = [8, 128], strides = [1, 1]} : vector<8x256xf32> to vector<8x128xf32>
    %201 = arith.addf %199, %200 : vector<8x128xf32>
    %202 = vector.extract_strided_slice %197 {offsets = [0, 0], sizes = [8, 96], strides = [1, 1]} : vector<8x128xf32> to vector<8x96xf32>
    %cst_64 = arith.constant 0.000000e+00 : f32
    %203 = vector.broadcast %cst_64 : f32 to vector<8x96xf32>
    %204 = arith.subf %203, %202 : vector<8x96xf32>
    %205 = math.exp %204 : vector<8x96xf32>
    %cst_65 = arith.constant 1.000000e+00 : f32
    %206 = vector.broadcast %cst_65 : f32 to vector<8x96xf32>
    %207 = arith.addf %206, %205 : vector<8x96xf32>
    %cst_66 = arith.constant 1.000000e+00 : f32
    %208 = vector.broadcast %cst_66 : f32 to vector<8x96xf32>
    %209 = arith.divf %208, %207 : vector<8x96xf32>
    %210 = vector.extract_strided_slice %197 {offsets = [0, 96], sizes = [8, 32], strides = [1, 1]} : vector<8x128xf32> to vector<8x32xf32>
    %211 = math.tanh %210 : vector<8x32xf32>
    %212 = vector.extract_strided_slice %201 {offsets = [0, 0], sizes = [8, 96], strides = [1, 1]} : vector<8x128xf32> to vector<8x96xf32>
    %cst_67 = arith.constant 0.000000e+00 : f32
    %213 = vector.broadcast %cst_67 : f32 to vector<8x96xf32>
    %214 = arith.subf %213, %212 : vector<8x96xf32>
    %215 = math.exp %214 : vector<8x96xf32>
    %cst_68 = arith.constant 1.000000e+00 : f32
    %216 = vector.broadcast %cst_68 : f32 to vector<8x96xf32>
    %217 = arith.addf %216, %215 : vector<8x96xf32>
    %cst_69 = arith.constant 1.000000e+00 : f32
    %218 = vector.broadcast %cst_69 : f32 to vector<8x96xf32>
    %219 = arith.divf %218, %217 : vector<8x96xf32>
    %220 = vector.extract_strided_slice %201 {offsets = [0, 96], sizes = [8, 32], strides = [1, 1]} : vector<8x128xf32> to vector<8x32xf32>
    %221 = math.tanh %220 : vector<8x32xf32>
    %222 = vector.extract_strided_slice %209 {offsets = [0, 32], sizes = [8, 32], strides = [1, 1]} : vector<8x96xf32> to vector<8x32xf32>
    %223 = arith.mulf %222, %171 : vector<8x32xf32>
    %224 = vector.extract_strided_slice %209 {offsets = [0, 0], sizes = [8, 32], strides = [1, 1]} : vector<8x96xf32> to vector<8x32xf32>
    %225 = arith.mulf %224, %211 : vector<8x32xf32>
    %226 = arith.addf %223, %225 : vector<8x32xf32>
    %227 = vector.extract_strided_slice %219 {offsets = [0, 32], sizes = [8, 32], strides = [1, 1]} : vector<8x96xf32> to vector<8x32xf32>
    %228 = arith.mulf %227, %176 : vector<8x32xf32>
    %229 = vector.extract_strided_slice %219 {offsets = [0, 0], sizes = [8, 32], strides = [1, 1]} : vector<8x96xf32> to vector<8x32xf32>
    %230 = arith.mulf %229, %221 : vector<8x32xf32>
    %231 = arith.addf %228, %230 : vector<8x32xf32>
    %232 = vector.extract_strided_slice %209 {offsets = [0, 64], sizes = [8, 32], strides = [1, 1]} : vector<8x96xf32> to vector<8x32xf32>
    %233 = math.tanh %226 : vector<8x32xf32>
    %234 = arith.mulf %232, %233 : vector<8x32xf32>
    %235 = vector.extract_strided_slice %219 {offsets = [0, 64], sizes = [8, 32], strides = [1, 1]} : vector<8x96xf32> to vector<8x32xf32>
    %236 = math.tanh %231 : vector<8x32xf32>
    %237 = arith.mulf %235, %236 : vector<8x32xf32>
    %238 = arith.index_cast %189 : i32 to index
    %c0_70 = arith.constant 0 : index
    %239 = vector.load %arg14[%238, %c0_70] : memref<64x64xf32, #tpu.memory_space<vmem>>, vector<8x32xf32>
    tpu.vector_store %arg14[%238, %c0_70], %234 {strides = array<i32>} : memref<64x64xf32, #tpu.memory_space<vmem>>, vector<8x32xf32>,
    %240 = arith.index_cast %192 : i32 to index
    %c32_71 = arith.constant 32 : index
    %241 = vector.load %arg14[%240, %c32_71] : memref<64x64xf32, #tpu.memory_space<vmem>>, vector<8x32xf32>
    tpu.vector_store %arg14[%240, %c32_71], %237 {strides = array<i32>} : memref<64x64xf32, #tpu.memory_space<vmem>>, vector<8x32xf32>,
    %242 = tpu.concatenate %234, %237 in 1 : vector<8x32xf32>, vector<8x32xf32> -> vector<8x64xf32>
    %c4_i32 = arith.constant 4 : i32
    %c8_i32_72 = arith.constant 8 : i32
    %243 = arith.muli %c4_i32, %c8_i32_72 : i32
    %244 = tpu.assume_multiple %243, 8 : i32
    %c7_i32_73 = arith.constant 7 : i32
    %245 = arith.subi %c7_i32_73, %c4_i32 : i32
    %c8_i32_74 = arith.constant 8 : i32
    %246 = arith.muli %245, %c8_i32_74 : i32
    %247 = tpu.assume_multiple %246, 8 : i32
    %cst_75 = arith.constant dense<0.000000e+00> : vector<8x256xf32>
    %248 = tpu.matmul %242, %16, %cst_75 {dimension_numbers = #tpu.dot_dimension_numbers<[1], [0], [0], [1], [0, 0, 1, 1], [], []>} : vector<8x64xf32>, vector<64x256xf32>, vector<8x256xf32> -> vector<8x256xf32>
    %249 = arith.index_cast %244 : i32 to index
    %c0_76 = arith.constant 0 : index
    %250 = vector.load %arg13[%249, %c0_76] : memref<64x256xf32, #tpu.memory_space<vmem>>, vector<8x128xf32>
    %251 = vector.extract_strided_slice %248 {offsets = [0, 0], sizes = [8, 128], strides = [1, 1]} : vector<8x256xf32> to vector<8x128xf32>
    %252 = arith.addf %250, %251 : vector<8x128xf32>
    %253 = arith.index_cast %247 : i32 to index
    %c128_77 = arith.constant 128 : index
    %254 = vector.load %arg13[%253, %c128_77] : memref<64x256xf32, #tpu.memory_space<vmem>>, vector<8x128xf32>
    %255 = vector.extract_strided_slice %248 {offsets = [0, 128], sizes = [8, 128], strides = [1, 1]} : vector<8x256xf32> to vector<8x128xf32>
    %256 = arith.addf %254, %255 : vector<8x128xf32>
    %257 = vector.extract_strided_slice %252 {offsets = [0, 0], sizes = [8, 96], strides = [1, 1]} : vector<8x128xf32> to vector<8x96xf32>
    %cst_78 = arith.constant 0.000000e+00 : f32
    %258 = vector.broadcast %cst_78 : f32 to vector<8x96xf32>
    %259 = arith.subf %258, %257 : vector<8x96xf32>
    %260 = math.exp %259 : vector<8x96xf32>
    %cst_79 = arith.constant 1.000000e+00 : f32
    %261 = vector.broadcast %cst_79 : f32 to vector<8x96xf32>
    %262 = arith.addf %261, %260 : vector<8x96xf32>
    %cst_80 = arith.constant 1.000000e+00 : f32
    %263 = vector.broadcast %cst_80 : f32 to vector<8x96xf32>
    %264 = arith.divf %263, %262 : vector<8x96xf32>
    %265 = vector.extract_strided_slice %252 {offsets = [0, 96], sizes = [8, 32], strides = [1, 1]} : vector<8x128xf32> to vector<8x32xf32>
    %266 = math.tanh %265 : vector<8x32xf32>
    %267 = vector.extract_strided_slice %256 {offsets = [0, 0], sizes = [8, 96], strides = [1, 1]} : vector<8x128xf32> to vector<8x96xf32>
    %cst_81 = arith.constant 0.000000e+00 : f32
    %268 = vector.broadcast %cst_81 : f32 to vector<8x96xf32>
    %269 = arith.subf %268, %267 : vector<8x96xf32>
    %270 = math.exp %269 : vector<8x96xf32>
    %cst_82 = arith.constant 1.000000e+00 : f32
    %271 = vector.broadcast %cst_82 : f32 to vector<8x96xf32>
    %272 = arith.addf %271, %270 : vector<8x96xf32>
    %cst_83 = arith.constant 1.000000e+00 : f32
    %273 = vector.broadcast %cst_83 : f32 to vector<8x96xf32>
    %274 = arith.divf %273, %272 : vector<8x96xf32>
    %275 = vector.extract_strided_slice %256 {offsets = [0, 96], sizes = [8, 32], strides = [1, 1]} : vector<8x128xf32> to vector<8x32xf32>
    %276 = math.tanh %275 : vector<8x32xf32>
    %277 = vector.extract_strided_slice %264 {offsets = [0, 32], sizes = [8, 32], strides = [1, 1]} : vector<8x96xf32> to vector<8x32xf32>
    %278 = arith.mulf %277, %226 : vector<8x32xf32>
    %279 = vector.extract_strided_slice %264 {offsets = [0, 0], sizes = [8, 32], strides = [1, 1]} : vector<8x96xf32> to vector<8x32xf32>
    %280 = arith.mulf %279, %266 : vector<8x32xf32>
    %281 = arith.addf %278, %280 : vector<8x32xf32>
    %282 = vector.extract_strided_slice %274 {offsets = [0, 32], sizes = [8, 32], strides = [1, 1]} : vector<8x96xf32> to vector<8x32xf32>
    %283 = arith.mulf %282, %231 : vector<8x32xf32>
    %284 = vector.extract_strided_slice %274 {offsets = [0, 0], sizes = [8, 32], strides = [1, 1]} : vector<8x96xf32> to vector<8x32xf32>
    %285 = arith.mulf %284, %276 : vector<8x32xf32>
    %286 = arith.addf %283, %285 : vector<8x32xf32>
    %287 = vector.extract_strided_slice %264 {offsets = [0, 64], sizes = [8, 32], strides = [1, 1]} : vector<8x96xf32> to vector<8x32xf32>
    %288 = math.tanh %281 : vector<8x32xf32>
    %289 = arith.mulf %287, %288 : vector<8x32xf32>
    %290 = vector.extract_strided_slice %274 {offsets = [0, 64], sizes = [8, 32], strides = [1, 1]} : vector<8x96xf32> to vector<8x32xf32>
    %291 = math.tanh %286 : vector<8x32xf32>
    %292 = arith.mulf %290, %291 : vector<8x32xf32>
    %293 = arith.index_cast %244 : i32 to index
    %c0_84 = arith.constant 0 : index
    %294 = vector.load %arg14[%293, %c0_84] : memref<64x64xf32, #tpu.memory_space<vmem>>, vector<8x32xf32>
    tpu.vector_store %arg14[%293, %c0_84], %289 {strides = array<i32>} : memref<64x64xf32, #tpu.memory_space<vmem>>, vector<8x32xf32>,
    %295 = arith.index_cast %247 : i32 to index
    %c32_85 = arith.constant 32 : index
    %296 = vector.load %arg14[%295, %c32_85] : memref<64x64xf32, #tpu.memory_space<vmem>>, vector<8x32xf32>
    tpu.vector_store %arg14[%295, %c32_85], %292 {strides = array<i32>} : memref<64x64xf32, #tpu.memory_space<vmem>>, vector<8x32xf32>,
    %297 = tpu.concatenate %289, %292 in 1 : vector<8x32xf32>, vector<8x32xf32> -> vector<8x64xf32>
    %c5_i32 = arith.constant 5 : i32
    %c8_i32_86 = arith.constant 8 : i32
    %298 = arith.muli %c5_i32, %c8_i32_86 : i32
    %299 = tpu.assume_multiple %298, 8 : i32
    %c7_i32_87 = arith.constant 7 : i32
    %300 = arith.subi %c7_i32_87, %c5_i32 : i32
    %c8_i32_88 = arith.constant 8 : i32
    %301 = arith.muli %300, %c8_i32_88 : i32
    %302 = tpu.assume_multiple %301, 8 : i32
    %cst_89 = arith.constant dense<0.000000e+00> : vector<8x256xf32>
    %303 = tpu.matmul %297, %16, %cst_89 {dimension_numbers = #tpu.dot_dimension_numbers<[1], [0], [0], [1], [0, 0, 1, 1], [], []>} : vector<8x64xf32>, vector<64x256xf32>, vector<8x256xf32> -> vector<8x256xf32>
    %304 = arith.index_cast %299 : i32 to index
    %c0_90 = arith.constant 0 : index
    %305 = vector.load %arg13[%304, %c0_90] : memref<64x256xf32, #tpu.memory_space<vmem>>, vector<8x128xf32>
    %306 = vector.extract_strided_slice %303 {offsets = [0, 0], sizes = [8, 128], strides = [1, 1]} : vector<8x256xf32> to vector<8x128xf32>
    %307 = arith.addf %305, %306 : vector<8x128xf32>
    %308 = arith.index_cast %302 : i32 to index
    %c128_91 = arith.constant 128 : index
    %309 = vector.load %arg13[%308, %c128_91] : memref<64x256xf32, #tpu.memory_space<vmem>>, vector<8x128xf32>
    %310 = vector.extract_strided_slice %303 {offsets = [0, 128], sizes = [8, 128], strides = [1, 1]} : vector<8x256xf32> to vector<8x128xf32>
    %311 = arith.addf %309, %310 : vector<8x128xf32>
    %312 = vector.extract_strided_slice %307 {offsets = [0, 0], sizes = [8, 96], strides = [1, 1]} : vector<8x128xf32> to vector<8x96xf32>
    %cst_92 = arith.constant 0.000000e+00 : f32
    %313 = vector.broadcast %cst_92 : f32 to vector<8x96xf32>
    %314 = arith.subf %313, %312 : vector<8x96xf32>
    %315 = math.exp %314 : vector<8x96xf32>
    %cst_93 = arith.constant 1.000000e+00 : f32
    %316 = vector.broadcast %cst_93 : f32 to vector<8x96xf32>
    %317 = arith.addf %316, %315 : vector<8x96xf32>
    %cst_94 = arith.constant 1.000000e+00 : f32
    %318 = vector.broadcast %cst_94 : f32 to vector<8x96xf32>
    %319 = arith.divf %318, %317 : vector<8x96xf32>
    %320 = vector.extract_strided_slice %307 {offsets = [0, 96], sizes = [8, 32], strides = [1, 1]} : vector<8x128xf32> to vector<8x32xf32>
    %321 = math.tanh %320 : vector<8x32xf32>
    %322 = vector.extract_strided_slice %311 {offsets = [0, 0], sizes = [8, 96], strides = [1, 1]} : vector<8x128xf32> to vector<8x96xf32>
    %cst_95 = arith.constant 0.000000e+00 : f32
    %323 = vector.broadcast %cst_95 : f32 to vector<8x96xf32>
    %324 = arith.subf %323, %322 : vector<8x96xf32>
    %325 = math.exp %324 : vector<8x96xf32>
    %cst_96 = arith.constant 1.000000e+00 : f32
    %326 = vector.broadcast %cst_96 : f32 to vector<8x96xf32>
    %327 = arith.addf %326, %325 : vector<8x96xf32>
    %cst_97 = arith.constant 1.000000e+00 : f32
    %328 = vector.broadcast %cst_97 : f32 to vector<8x96xf32>
    %329 = arith.divf %328, %327 : vector<8x96xf32>
    %330 = vector.extract_strided_slice %311 {offsets = [0, 96], sizes = [8, 32], strides = [1, 1]} : vector<8x128xf32> to vector<8x32xf32>
    %331 = math.tanh %330 : vector<8x32xf32>
    %332 = vector.extract_strided_slice %319 {offsets = [0, 32], sizes = [8, 32], strides = [1, 1]} : vector<8x96xf32> to vector<8x32xf32>
    %333 = arith.mulf %332, %281 : vector<8x32xf32>
    %334 = vector.extract_strided_slice %319 {offsets = [0, 0], sizes = [8, 32], strides = [1, 1]} : vector<8x96xf32> to vector<8x32xf32>
    %335 = arith.mulf %334, %321 : vector<8x32xf32>
    %336 = arith.addf %333, %335 : vector<8x32xf32>
    %337 = vector.extract_strided_slice %329 {offsets = [0, 32], sizes = [8, 32], strides = [1, 1]} : vector<8x96xf32> to vector<8x32xf32>
    %338 = arith.mulf %337, %286 : vector<8x32xf32>
    %339 = vector.extract_strided_slice %329 {offsets = [0, 0], sizes = [8, 32], strides = [1, 1]} : vector<8x96xf32> to vector<8x32xf32>
    %340 = arith.mulf %339, %331 : vector<8x32xf32>
    %341 = arith.addf %338, %340 : vector<8x32xf32>
    %342 = vector.extract_strided_slice %319 {offsets = [0, 64], sizes = [8, 32], strides = [1, 1]} : vector<8x96xf32> to vector<8x32xf32>
    %343 = math.tanh %336 : vector<8x32xf32>
    %344 = arith.mulf %342, %343 : vector<8x32xf32>
    %345 = vector.extract_strided_slice %329 {offsets = [0, 64], sizes = [8, 32], strides = [1, 1]} : vector<8x96xf32> to vector<8x32xf32>
    %346 = math.tanh %341 : vector<8x32xf32>
    %347 = arith.mulf %345, %346 : vector<8x32xf32>
    %348 = arith.index_cast %299 : i32 to index
    %c0_98 = arith.constant 0 : index
    %349 = vector.load %arg14[%348, %c0_98] : memref<64x64xf32, #tpu.memory_space<vmem>>, vector<8x32xf32>
    tpu.vector_store %arg14[%348, %c0_98], %344 {strides = array<i32>} : memref<64x64xf32, #tpu.memory_space<vmem>>, vector<8x32xf32>,
    %350 = arith.index_cast %302 : i32 to index
    %c32_99 = arith.constant 32 : index
    %351 = vector.load %arg14[%350, %c32_99] : memref<64x64xf32, #tpu.memory_space<vmem>>, vector<8x32xf32>
    tpu.vector_store %arg14[%350, %c32_99], %347 {strides = array<i32>} : memref<64x64xf32, #tpu.memory_space<vmem>>, vector<8x32xf32>,
    %352 = tpu.concatenate %344, %347 in 1 : vector<8x32xf32>, vector<8x32xf32> -> vector<8x64xf32>
    %c6_i32 = arith.constant 6 : i32
    %c8_i32_100 = arith.constant 8 : i32
    %353 = arith.muli %c6_i32, %c8_i32_100 : i32
    %354 = tpu.assume_multiple %353, 8 : i32
    %c7_i32_101 = arith.constant 7 : i32
    %355 = arith.subi %c7_i32_101, %c6_i32 : i32
    %c8_i32_102 = arith.constant 8 : i32
    %356 = arith.muli %355, %c8_i32_102 : i32
    %357 = tpu.assume_multiple %356, 8 : i32
    %cst_103 = arith.constant dense<0.000000e+00> : vector<8x256xf32>
    %358 = tpu.matmul %352, %16, %cst_103 {dimension_numbers = #tpu.dot_dimension_numbers<[1], [0], [0], [1], [0, 0, 1, 1], [], []>} : vector<8x64xf32>, vector<64x256xf32>, vector<8x256xf32> -> vector<8x256xf32>
    %359 = arith.index_cast %354 : i32 to index
    %c0_104 = arith.constant 0 : index
    %360 = vector.load %arg13[%359, %c0_104] : memref<64x256xf32, #tpu.memory_space<vmem>>, vector<8x128xf32>
    %361 = vector.extract_strided_slice %358 {offsets = [0, 0], sizes = [8, 128], strides = [1, 1]} : vector<8x256xf32> to vector<8x128xf32>
    %362 = arith.addf %360, %361 : vector<8x128xf32>
    %363 = arith.index_cast %357 : i32 to index
    %c128_105 = arith.constant 128 : index
    %364 = vector.load %arg13[%363, %c128_105] : memref<64x256xf32, #tpu.memory_space<vmem>>, vector<8x128xf32>
    %365 = vector.extract_strided_slice %358 {offsets = [0, 128], sizes = [8, 128], strides = [1, 1]} : vector<8x256xf32> to vector<8x128xf32>
    %366 = arith.addf %364, %365 : vector<8x128xf32>
    %367 = vector.extract_strided_slice %362 {offsets = [0, 0], sizes = [8, 96], strides = [1, 1]} : vector<8x128xf32> to vector<8x96xf32>
    %cst_106 = arith.constant 0.000000e+00 : f32
    %368 = vector.broadcast %cst_106 : f32 to vector<8x96xf32>
    %369 = arith.subf %368, %367 : vector<8x96xf32>
    %370 = math.exp %369 : vector<8x96xf32>
    %cst_107 = arith.constant 1.000000e+00 : f32
    %371 = vector.broadcast %cst_107 : f32 to vector<8x96xf32>
    %372 = arith.addf %371, %370 : vector<8x96xf32>
    %cst_108 = arith.constant 1.000000e+00 : f32
    %373 = vector.broadcast %cst_108 : f32 to vector<8x96xf32>
    %374 = arith.divf %373, %372 : vector<8x96xf32>
    %375 = vector.extract_strided_slice %362 {offsets = [0, 96], sizes = [8, 32], strides = [1, 1]} : vector<8x128xf32> to vector<8x32xf32>
    %376 = math.tanh %375 : vector<8x32xf32>
    %377 = vector.extract_strided_slice %366 {offsets = [0, 0], sizes = [8, 96], strides = [1, 1]} : vector<8x128xf32> to vector<8x96xf32>
    %cst_109 = arith.constant 0.000000e+00 : f32
    %378 = vector.broadcast %cst_109 : f32 to vector<8x96xf32>
    %379 = arith.subf %378, %377 : vector<8x96xf32>
    %380 = math.exp %379 : vector<8x96xf32>
    %cst_110 = arith.constant 1.000000e+00 : f32
    %381 = vector.broadcast %cst_110 : f32 to vector<8x96xf32>
    %382 = arith.addf %381, %380 : vector<8x96xf32>
    %cst_111 = arith.constant 1.000000e+00 : f32
    %383 = vector.broadcast %cst_111 : f32 to vector<8x96xf32>
    %384 = arith.divf %383, %382 : vector<8x96xf32>
    %385 = vector.extract_strided_slice %366 {offsets = [0, 96], sizes = [8, 32], strides = [1, 1]} : vector<8x128xf32> to vector<8x32xf32>
    %386 = math.tanh %385 : vector<8x32xf32>
    %387 = vector.extract_strided_slice %374 {offsets = [0, 32], sizes = [8, 32], strides = [1, 1]} : vector<8x96xf32> to vector<8x32xf32>
    %388 = arith.mulf %387, %336 : vector<8x32xf32>
    %389 = vector.extract_strided_slice %374 {offsets = [0, 0], sizes = [8, 32], strides = [1, 1]} : vector<8x96xf32> to vector<8x32xf32>
    %390 = arith.mulf %389, %376 : vector<8x32xf32>
    %391 = arith.addf %388, %390 : vector<8x32xf32>
    %392 = vector.extract_strided_slice %384 {offsets = [0, 32], sizes = [8, 32], strides = [1, 1]} : vector<8x96xf32> to vector<8x32xf32>
    %393 = arith.mulf %392, %341 : vector<8x32xf32>
    %394 = vector.extract_strided_slice %384 {offsets = [0, 0], sizes = [8, 32], strides = [1, 1]} : vector<8x96xf32> to vector<8x32xf32>
    %395 = arith.mulf %394, %386 : vector<8x32xf32>
    %396 = arith.addf %393, %395 : vector<8x32xf32>
    %397 = vector.extract_strided_slice %374 {offsets = [0, 64], sizes = [8, 32], strides = [1, 1]} : vector<8x96xf32> to vector<8x32xf32>
    %398 = math.tanh %391 : vector<8x32xf32>
    %399 = arith.mulf %397, %398 : vector<8x32xf32>
    %400 = vector.extract_strided_slice %384 {offsets = [0, 64], sizes = [8, 32], strides = [1, 1]} : vector<8x96xf32> to vector<8x32xf32>
    %401 = math.tanh %396 : vector<8x32xf32>
    %402 = arith.mulf %400, %401 : vector<8x32xf32>
    %403 = arith.index_cast %354 : i32 to index
    %c0_112 = arith.constant 0 : index
    %404 = vector.load %arg14[%403, %c0_112] : memref<64x64xf32, #tpu.memory_space<vmem>>, vector<8x32xf32>
    tpu.vector_store %arg14[%403, %c0_112], %399 {strides = array<i32>} : memref<64x64xf32, #tpu.memory_space<vmem>>, vector<8x32xf32>,
    %405 = arith.index_cast %357 : i32 to index
    %c32_113 = arith.constant 32 : index
    %406 = vector.load %arg14[%405, %c32_113] : memref<64x64xf32, #tpu.memory_space<vmem>>, vector<8x32xf32>
    tpu.vector_store %arg14[%405, %c32_113], %402 {strides = array<i32>} : memref<64x64xf32, #tpu.memory_space<vmem>>, vector<8x32xf32>,
    %407 = tpu.concatenate %399, %402 in 1 : vector<8x32xf32>, vector<8x32xf32> -> vector<8x64xf32>
    %c7_i32_114 = arith.constant 7 : i32
    %c8_i32_115 = arith.constant 8 : i32
    %408 = arith.muli %c7_i32_114, %c8_i32_115 : i32
    %409 = tpu.assume_multiple %408, 8 : i32
    %c7_i32_116 = arith.constant 7 : i32
    %410 = arith.subi %c7_i32_116, %c7_i32_114 : i32
    %c8_i32_117 = arith.constant 8 : i32
    %411 = arith.muli %410, %c8_i32_117 : i32
    %412 = tpu.assume_multiple %411, 8 : i32
    %cst_118 = arith.constant dense<0.000000e+00> : vector<8x256xf32>
    %413 = tpu.matmul %407, %16, %cst_118 {dimension_numbers = #tpu.dot_dimension_numbers<[1], [0], [0], [1], [0, 0, 1, 1], [], []>} : vector<8x64xf32>, vector<64x256xf32>, vector<8x256xf32> -> vector<8x256xf32>
    %414 = arith.index_cast %409 : i32 to index
    %c0_119 = arith.constant 0 : index
    %415 = vector.load %arg13[%414, %c0_119] : memref<64x256xf32, #tpu.memory_space<vmem>>, vector<8x128xf32>
    %416 = vector.extract_strided_slice %413 {offsets = [0, 0], sizes = [8, 128], strides = [1, 1]} : vector<8x256xf32> to vector<8x128xf32>
    %417 = arith.addf %415, %416 : vector<8x128xf32>
    %418 = arith.index_cast %412 : i32 to index
    %c128_120 = arith.constant 128 : index
    %419 = vector.load %arg13[%418, %c128_120] : memref<64x256xf32, #tpu.memory_space<vmem>>, vector<8x128xf32>
    %420 = vector.extract_strided_slice %413 {offsets = [0, 128], sizes = [8, 128], strides = [1, 1]} : vector<8x256xf32> to vector<8x128xf32>
    %421 = arith.addf %419, %420 : vector<8x128xf32>
    %422 = vector.extract_strided_slice %417 {offsets = [0, 0], sizes = [8, 96], strides = [1, 1]} : vector<8x128xf32> to vector<8x96xf32>
    %cst_121 = arith.constant 0.000000e+00 : f32
    %423 = vector.broadcast %cst_121 : f32 to vector<8x96xf32>
    %424 = arith.subf %423, %422 : vector<8x96xf32>
    %425 = math.exp %424 : vector<8x96xf32>
    %cst_122 = arith.constant 1.000000e+00 : f32
    %426 = vector.broadcast %cst_122 : f32 to vector<8x96xf32>
    %427 = arith.addf %426, %425 : vector<8x96xf32>
    %cst_123 = arith.constant 1.000000e+00 : f32
    %428 = vector.broadcast %cst_123 : f32 to vector<8x96xf32>
    %429 = arith.divf %428, %427 : vector<8x96xf32>
    %430 = vector.extract_strided_slice %417 {offsets = [0, 96], sizes = [8, 32], strides = [1, 1]} : vector<8x128xf32> to vector<8x32xf32>
    %431 = math.tanh %430 : vector<8x32xf32>
    %432 = vector.extract_strided_slice %421 {offsets = [0, 0], sizes = [8, 96], strides = [1, 1]} : vector<8x128xf32> to vector<8x96xf32>
    %cst_124 = arith.constant 0.000000e+00 : f32
    %433 = vector.broadcast %cst_124 : f32 to vector<8x96xf32>
    %434 = arith.subf %433, %432 : vector<8x96xf32>
    %435 = math.exp %434 : vector<8x96xf32>
    %cst_125 = arith.constant 1.000000e+00 : f32
    %436 = vector.broadcast %cst_125 : f32 to vector<8x96xf32>
    %437 = arith.addf %436, %435 : vector<8x96xf32>
    %cst_126 = arith.constant 1.000000e+00 : f32
    %438 = vector.broadcast %cst_126 : f32 to vector<8x96xf32>
    %439 = arith.divf %438, %437 : vector<8x96xf32>
    %440 = vector.extract_strided_slice %421 {offsets = [0, 96], sizes = [8, 32], strides = [1, 1]} : vector<8x128xf32> to vector<8x32xf32>
    %441 = math.tanh %440 : vector<8x32xf32>
    %442 = vector.extract_strided_slice %429 {offsets = [0, 32], sizes = [8, 32], strides = [1, 1]} : vector<8x96xf32> to vector<8x32xf32>
    %443 = arith.mulf %442, %391 : vector<8x32xf32>
    %444 = vector.extract_strided_slice %429 {offsets = [0, 0], sizes = [8, 32], strides = [1, 1]} : vector<8x96xf32> to vector<8x32xf32>
    %445 = arith.mulf %444, %431 : vector<8x32xf32>
    %446 = arith.addf %443, %445 : vector<8x32xf32>
    %447 = vector.extract_strided_slice %439 {offsets = [0, 32], sizes = [8, 32], strides = [1, 1]} : vector<8x96xf32> to vector<8x32xf32>
    %448 = arith.mulf %447, %396 : vector<8x32xf32>
    %449 = vector.extract_strided_slice %439 {offsets = [0, 0], sizes = [8, 32], strides = [1, 1]} : vector<8x96xf32> to vector<8x32xf32>
    %450 = arith.mulf %449, %441 : vector<8x32xf32>
    %451 = arith.addf %448, %450 : vector<8x32xf32>
    %452 = vector.extract_strided_slice %429 {offsets = [0, 64], sizes = [8, 32], strides = [1, 1]} : vector<8x96xf32> to vector<8x32xf32>
    %453 = math.tanh %446 : vector<8x32xf32>
    %454 = arith.mulf %452, %453 : vector<8x32xf32>
    %455 = vector.extract_strided_slice %439 {offsets = [0, 64], sizes = [8, 32], strides = [1, 1]} : vector<8x96xf32> to vector<8x32xf32>
    %456 = math.tanh %451 : vector<8x32xf32>
    %457 = arith.mulf %455, %456 : vector<8x32xf32>
    %458 = arith.index_cast %409 : i32 to index
    %c0_127 = arith.constant 0 : index
    %459 = vector.load %arg14[%458, %c0_127] : memref<64x64xf32, #tpu.memory_space<vmem>>, vector<8x32xf32>
    tpu.vector_store %arg14[%458, %c0_127], %454 {strides = array<i32>} : memref<64x64xf32, #tpu.memory_space<vmem>>, vector<8x32xf32>,
    %460 = arith.index_cast %412 : i32 to index
    %c32_128 = arith.constant 32 : index
    %461 = vector.load %arg14[%460, %c32_128] : memref<64x64xf32, #tpu.memory_space<vmem>>, vector<8x32xf32>
    tpu.vector_store %arg14[%460, %c32_128], %457 {strides = array<i32>} : memref<64x64xf32, #tpu.memory_space<vmem>>, vector<8x32xf32>,
    %462 = tpu.concatenate %454, %457 in 1 : vector<8x32xf32>, vector<8x32xf32> -> vector<8x64xf32>
    %c8_i32_129 = arith.constant 8 : i32
    %463 = vector.extract_strided_slice %462 {offsets = [0, 0], sizes = [8, 32], strides = [1, 1]} : vector<8x64xf32> to vector<8x32xf32>
    %c0_130 = arith.constant 0 : index
    %c0_131 = arith.constant 0 : index
    %c0_132 = arith.constant 0 : index
    %464 = vector.load %arg11[%c0_130, %c0_131, %c0_132] : memref<4x8x32xf32, #tpu.memory_space<vmem>>, vector<1x8x32xf32>
    %465 = vector.shape_cast %464 : vector<1x8x32xf32> to vector<8x32xf32>
    %466 = vector.shape_cast %463 : vector<8x32xf32> to vector<1x8x32xf32>
    tpu.vector_store %arg11[%c0_130, %c0_131, %c0_132], %466 {strides = array<i32>} : memref<4x8x32xf32, #tpu.memory_space<vmem>>, vector<1x8x32xf32>,
    %467 = vector.extract_strided_slice %462 {offsets = [0, 32], sizes = [8, 32], strides = [1, 1]} : vector<8x64xf32> to vector<8x32xf32>
    %c1 = arith.constant 1 : index
    %c0_133 = arith.constant 0 : index
    %c0_134 = arith.constant 0 : index
    %468 = vector.load %arg11[%c1, %c0_133, %c0_134] : memref<4x8x32xf32, #tpu.memory_space<vmem>>, vector<1x8x32xf32>
    %469 = vector.shape_cast %468 : vector<1x8x32xf32> to vector<8x32xf32>
    %470 = vector.shape_cast %467 : vector<8x32xf32> to vector<1x8x32xf32>
    tpu.vector_store %arg11[%c1, %c0_133, %c0_134], %470 {strides = array<i32>} : memref<4x8x32xf32, #tpu.memory_space<vmem>>, vector<1x8x32xf32>,
    %c0_135 = arith.constant 0 : index
    %c0_136 = arith.constant 0 : index
    %c0_137 = arith.constant 0 : index
    %471 = vector.load %arg12[%c0_135, %c0_136, %c0_137] : memref<4x8x32xf32, #tpu.memory_space<vmem>>, vector<1x8x32xf32>
    %472 = vector.shape_cast %471 : vector<1x8x32xf32> to vector<8x32xf32>
    %473 = vector.shape_cast %446 : vector<8x32xf32> to vector<1x8x32xf32>
    tpu.vector_store %arg12[%c0_135, %c0_136, %c0_137], %473 {strides = array<i32>} : memref<4x8x32xf32, #tpu.memory_space<vmem>>, vector<1x8x32xf32>,
    %c1_138 = arith.constant 1 : index
    %c0_139 = arith.constant 0 : index
    %c0_140 = arith.constant 0 : index
    %474 = vector.load %arg12[%c1_138, %c0_139, %c0_140] : memref<4x8x32xf32, #tpu.memory_space<vmem>>, vector<1x8x32xf32>
    %475 = vector.shape_cast %474 : vector<1x8x32xf32> to vector<8x32xf32>
    %476 = vector.shape_cast %451 : vector<8x32xf32> to vector<1x8x32xf32>
    tpu.vector_store %arg12[%c1_138, %c0_139, %c0_140], %476 {strides = array<i32>} : memref<4x8x32xf32, #tpu.memory_space<vmem>>, vector<1x8x32xf32>,
    %c0_141 = arith.constant 0 : index
    %c0_142 = arith.constant 0 : index
    %477 = vector.load %arg14[%c0_141, %c0_142] : memref<64x64xf32, #tpu.memory_space<vmem>>, vector<64x64xf32>
    %c0_143 = arith.constant 0 : index
    %c0_144 = arith.constant 0 : index
    %c0_145 = arith.constant 0 : index
    %478 = vector.load %arg7[%c0_143, %c0_144, %c0_145] : memref<1x64x256xf32, #tpu.memory_space<vmem>>, vector<1x64x256xf32>
    %479 = vector.shape_cast %478 : vector<1x64x256xf32> to vector<64x256xf32>
    %cst_146 = arith.constant dense<0.000000e+00> : vector<64x256xf32>
    %480 = tpu.matmul %477, %479, %cst_146 {dimension_numbers = #tpu.dot_dimension_numbers<[1], [0], [0], [1], [0, 0, 1, 1], [], []>} : vector<64x64xf32>, vector<64x256xf32>, vector<64x256xf32> -> vector<64x256xf32>
    %c1_147 = arith.constant 1 : index
    %c0_148 = arith.constant 0 : index
    %c0_149 = arith.constant 0 : index
    %481 = vector.load %arg9[%c1_147, %c0_148, %c0_149] : memref<2x1x256xf32, #tpu.memory_space<vmem>>, vector<1x1x256xf32>
    %482 = vector.shape_cast %481 : vector<1x1x256xf32> to vector<1x256xf32>
    %483 = vector.broadcast %482 : vector<1x256xf32> to vector<64x256xf32>
    %484 = arith.addf %480, %483 : vector<64x256xf32>
    %c0_150 = arith.constant 0 : index
    %c0_151 = arith.constant 0 : index
    %485 = vector.load %arg13[%c0_150, %c0_151] : memref<64x256xf32, #tpu.memory_space<vmem>>, vector<64x256xf32>
    tpu.vector_store %arg13[%c0_150, %c0_151], %484 {strides = array<i32>} : memref<64x256xf32, #tpu.memory_space<vmem>>, vector<64x256xf32>,
    %c1_152 = arith.constant 1 : index
    %c0_153 = arith.constant 0 : index
    %c0_154 = arith.constant 0 : index
    %486 = vector.load %arg8[%c1_152, %c0_153, %c0_154] : memref<2x64x256xf32, #tpu.memory_space<vmem>>, vector<1x64x256xf32>
    %487 = vector.shape_cast %486 : vector<1x64x256xf32> to vector<64x256xf32>
    %c1_155 = arith.constant 1 : index
    %c0_156 = arith.constant 0 : index
    %c0_157 = arith.constant 0 : index
    %488 = vector.load %arg3[%c1_155, %c0_156, %c0_157] : memref<2x8x64xf32, #tpu.memory_space<vmem>>, vector<1x8x64xf32>
    %489 = vector.shape_cast %488 : vector<1x8x64xf32> to vector<8x64xf32>
    %c1_158 = arith.constant 1 : index
    %c0_159 = arith.constant 0 : index
    %c0_160 = arith.constant 0 : index
    %490 = vector.load %arg2[%c1_158, %c0_159, %c0_160] : memref<2x8x64xf32, #tpu.memory_space<vmem>>, vector<1x8x64xf32>
    %491 = vector.shape_cast %490 : vector<1x8x64xf32> to vector<8x64xf32>
    %492 = vector.extract_strided_slice %489 {offsets = [0, 0], sizes = [8, 32], strides = [1, 1]} : vector<8x64xf32> to vector<8x32xf32>
    %493 = vector.extract_strided_slice %489 {offsets = [0, 32], sizes = [8, 32], strides = [1, 1]} : vector<8x64xf32> to vector<8x32xf32>
    %c0_i32_161 = arith.constant 0 : i32
    %c8_i32_162 = arith.constant 8 : i32
    %494 = arith.muli %c0_i32_161, %c8_i32_162 : i32
    %495 = tpu.assume_multiple %494, 8 : i32
    %c7_i32_163 = arith.constant 7 : i32
    %496 = arith.subi %c7_i32_163, %c0_i32_161 : i32
    %c8_i32_164 = arith.constant 8 : i32
    %497 = arith.muli %496, %c8_i32_164 : i32
    %498 = tpu.assume_multiple %497, 8 : i32
    %cst_165 = arith.constant dense<0.000000e+00> : vector<8x256xf32>
    %499 = tpu.matmul %491, %487, %cst_165 {dimension_numbers = #tpu.dot_dimension_numbers<[1], [0], [0], [1], [0, 0, 1, 1], [], []>} : vector<8x64xf32>, vector<64x256xf32>, vector<8x256xf32> -> vector<8x256xf32>
    %500 = arith.index_cast %495 : i32 to index
    %c0_166 = arith.constant 0 : index
    %501 = vector.load %arg13[%500, %c0_166] : memref<64x256xf32, #tpu.memory_space<vmem>>, vector<8x128xf32>
    %502 = vector.extract_strided_slice %499 {offsets = [0, 0], sizes = [8, 128], strides = [1, 1]} : vector<8x256xf32> to vector<8x128xf32>
    %503 = arith.addf %501, %502 : vector<8x128xf32>
    %504 = arith.index_cast %498 : i32 to index
    %c128_167 = arith.constant 128 : index
    %505 = vector.load %arg13[%504, %c128_167] : memref<64x256xf32, #tpu.memory_space<vmem>>, vector<8x128xf32>
    %506 = vector.extract_strided_slice %499 {offsets = [0, 128], sizes = [8, 128], strides = [1, 1]} : vector<8x256xf32> to vector<8x128xf32>
    %507 = arith.addf %505, %506 : vector<8x128xf32>
    %508 = vector.extract_strided_slice %503 {offsets = [0, 0], sizes = [8, 96], strides = [1, 1]} : vector<8x128xf32> to vector<8x96xf32>
    %cst_168 = arith.constant 0.000000e+00 : f32
    %509 = vector.broadcast %cst_168 : f32 to vector<8x96xf32>
    %510 = arith.subf %509, %508 : vector<8x96xf32>
    %511 = math.exp %510 : vector<8x96xf32>
    %cst_169 = arith.constant 1.000000e+00 : f32
    %512 = vector.broadcast %cst_169 : f32 to vector<8x96xf32>
    %513 = arith.addf %512, %511 : vector<8x96xf32>
    %cst_170 = arith.constant 1.000000e+00 : f32
    %514 = vector.broadcast %cst_170 : f32 to vector<8x96xf32>
    %515 = arith.divf %514, %513 : vector<8x96xf32>
    %516 = vector.extract_strided_slice %503 {offsets = [0, 96], sizes = [8, 32], strides = [1, 1]} : vector<8x128xf32> to vector<8x32xf32>
    %517 = math.tanh %516 : vector<8x32xf32>
    %518 = vector.extract_strided_slice %507 {offsets = [0, 0], sizes = [8, 96], strides = [1, 1]} : vector<8x128xf32> to vector<8x96xf32>
    %cst_171 = arith.constant 0.000000e+00 : f32
    %519 = vector.broadcast %cst_171 : f32 to vector<8x96xf32>
    %520 = arith.subf %519, %518 : vector<8x96xf32>
    %521 = math.exp %520 : vector<8x96xf32>
    %cst_172 = arith.constant 1.000000e+00 : f32
    %522 = vector.broadcast %cst_172 : f32 to vector<8x96xf32>
    %523 = arith.addf %522, %521 : vector<8x96xf32>
    %cst_173 = arith.constant 1.000000e+00 : f32
    %524 = vector.broadcast %cst_173 : f32 to vector<8x96xf32>
    %525 = arith.divf %524, %523 : vector<8x96xf32>
    %526 = vector.extract_strided_slice %507 {offsets = [0, 96], sizes = [8, 32], strides = [1, 1]} : vector<8x128xf32> to vector<8x32xf32>
    %527 = math.tanh %526 : vector<8x32xf32>
    %528 = vector.extract_strided_slice %515 {offsets = [0, 32], sizes = [8, 32], strides = [1, 1]} : vector<8x96xf32> to vector<8x32xf32>
    %529 = arith.mulf %528, %492 : vector<8x32xf32>
    %530 = vector.extract_strided_slice %515 {offsets = [0, 0], sizes = [8, 32], strides = [1, 1]} : vector<8x96xf32> to vector<8x32xf32>
    %531 = arith.mulf %530, %517 : vector<8x32xf32>
    %532 = arith.addf %529, %531 : vector<8x32xf32>
    %533 = vector.extract_strided_slice %525 {offsets = [0, 32], sizes = [8, 32], strides = [1, 1]} : vector<8x96xf32> to vector<8x32xf32>
    %534 = arith.mulf %533, %493 : vector<8x32xf32>
    %535 = vector.extract_strided_slice %525 {offsets = [0, 0], sizes = [8, 32], strides = [1, 1]} : vector<8x96xf32> to vector<8x32xf32>
    %536 = arith.mulf %535, %527 : vector<8x32xf32>
    %537 = arith.addf %534, %536 : vector<8x32xf32>
    %538 = vector.extract_strided_slice %515 {offsets = [0, 64], sizes = [8, 32], strides = [1, 1]} : vector<8x96xf32> to vector<8x32xf32>
    %539 = math.tanh %532 : vector<8x32xf32>
    %540 = arith.mulf %538, %539 : vector<8x32xf32>
    %541 = vector.extract_strided_slice %525 {offsets = [0, 64], sizes = [8, 32], strides = [1, 1]} : vector<8x96xf32> to vector<8x32xf32>
    %542 = math.tanh %537 : vector<8x32xf32>
    %543 = arith.mulf %541, %542 : vector<8x32xf32>
    %544 = arith.index_cast %495 : i32 to index
    %c0_174 = arith.constant 0 : index
    %545 = vector.load %arg14[%544, %c0_174] : memref<64x64xf32, #tpu.memory_space<vmem>>, vector<8x32xf32>
    tpu.vector_store %arg14[%544, %c0_174], %540 {strides = array<i32>} : memref<64x64xf32, #tpu.memory_space<vmem>>, vector<8x32xf32>,
    %546 = arith.index_cast %498 : i32 to index
    %c32_175 = arith.constant 32 : index
    %547 = vector.load %arg14[%546, %c32_175] : memref<64x64xf32, #tpu.memory_space<vmem>>, vector<8x32xf32>
    tpu.vector_store %arg14[%546, %c32_175], %543 {strides = array<i32>} : memref<64x64xf32, #tpu.memory_space<vmem>>, vector<8x32xf32>,
    %548 = tpu.concatenate %540, %543 in 1 : vector<8x32xf32>, vector<8x32xf32> -> vector<8x64xf32>
    %c1_i32_176 = arith.constant 1 : i32
    %c8_i32_177 = arith.constant 8 : i32
    %549 = arith.muli %c1_i32_176, %c8_i32_177 : i32
    %550 = tpu.assume_multiple %549, 8 : i32
    %c7_i32_178 = arith.constant 7 : i32
    %551 = arith.subi %c7_i32_178, %c1_i32_176 : i32
    %c8_i32_179 = arith.constant 8 : i32
    %552 = arith.muli %551, %c8_i32_179 : i32
    %553 = tpu.assume_multiple %552, 8 : i32
    %cst_180 = arith.constant dense<0.000000e+00> : vector<8x256xf32>
    %554 = tpu.matmul %548, %487, %cst_180 {dimension_numbers = #tpu.dot_dimension_numbers<[1], [0], [0], [1], [0, 0, 1, 1], [], []>} : vector<8x64xf32>, vector<64x256xf32>, vector<8x256xf32> -> vector<8x256xf32>
    %555 = arith.index_cast %550 : i32 to index
    %c0_181 = arith.constant 0 : index
    %556 = vector.load %arg13[%555, %c0_181] : memref<64x256xf32, #tpu.memory_space<vmem>>, vector<8x128xf32>
    %557 = vector.extract_strided_slice %554 {offsets = [0, 0], sizes = [8, 128], strides = [1, 1]} : vector<8x256xf32> to vector<8x128xf32>
    %558 = arith.addf %556, %557 : vector<8x128xf32>
    %559 = arith.index_cast %553 : i32 to index
    %c128_182 = arith.constant 128 : index
    %560 = vector.load %arg13[%559, %c128_182] : memref<64x256xf32, #tpu.memory_space<vmem>>, vector<8x128xf32>
    %561 = vector.extract_strided_slice %554 {offsets = [0, 128], sizes = [8, 128], strides = [1, 1]} : vector<8x256xf32> to vector<8x128xf32>
    %562 = arith.addf %560, %561 : vector<8x128xf32>
    %563 = vector.extract_strided_slice %558 {offsets = [0, 0], sizes = [8, 96], strides = [1, 1]} : vector<8x128xf32> to vector<8x96xf32>
    %cst_183 = arith.constant 0.000000e+00 : f32
    %564 = vector.broadcast %cst_183 : f32 to vector<8x96xf32>
    %565 = arith.subf %564, %563 : vector<8x96xf32>
    %566 = math.exp %565 : vector<8x96xf32>
    %cst_184 = arith.constant 1.000000e+00 : f32
    %567 = vector.broadcast %cst_184 : f32 to vector<8x96xf32>
    %568 = arith.addf %567, %566 : vector<8x96xf32>
    %cst_185 = arith.constant 1.000000e+00 : f32
    %569 = vector.broadcast %cst_185 : f32 to vector<8x96xf32>
    %570 = arith.divf %569, %568 : vector<8x96xf32>
    %571 = vector.extract_strided_slice %558 {offsets = [0, 96], sizes = [8, 32], strides = [1, 1]} : vector<8x128xf32> to vector<8x32xf32>
    %572 = math.tanh %571 : vector<8x32xf32>
    %573 = vector.extract_strided_slice %562 {offsets = [0, 0], sizes = [8, 96], strides = [1, 1]} : vector<8x128xf32> to vector<8x96xf32>
    %cst_186 = arith.constant 0.000000e+00 : f32
    %574 = vector.broadcast %cst_186 : f32 to vector<8x96xf32>
    %575 = arith.subf %574, %573 : vector<8x96xf32>
    %576 = math.exp %575 : vector<8x96xf32>
    %cst_187 = arith.constant 1.000000e+00 : f32
    %577 = vector.broadcast %cst_187 : f32 to vector<8x96xf32>
    %578 = arith.addf %577, %576 : vector<8x96xf32>
    %cst_188 = arith.constant 1.000000e+00 : f32
    %579 = vector.broadcast %cst_188 : f32 to vector<8x96xf32>
    %580 = arith.divf %579, %578 : vector<8x96xf32>
    %581 = vector.extract_strided_slice %562 {offsets = [0, 96], sizes = [8, 32], strides = [1, 1]} : vector<8x128xf32> to vector<8x32xf32>
    %582 = math.tanh %581 : vector<8x32xf32>
    %583 = vector.extract_strided_slice %570 {offsets = [0, 32], sizes = [8, 32], strides = [1, 1]} : vector<8x96xf32> to vector<8x32xf32>
    %584 = arith.mulf %583, %532 : vector<8x32xf32>
    %585 = vector.extract_strided_slice %570 {offsets = [0, 0], sizes = [8, 32], strides = [1, 1]} : vector<8x96xf32> to vector<8x32xf32>
    %586 = arith.mulf %585, %572 : vector<8x32xf32>
    %587 = arith.addf %584, %586 : vector<8x32xf32>
    %588 = vector.extract_strided_slice %580 {offsets = [0, 32], sizes = [8, 32], strides = [1, 1]} : vector<8x96xf32> to vector<8x32xf32>
    %589 = arith.mulf %588, %537 : vector<8x32xf32>
    %590 = vector.extract_strided_slice %580 {offsets = [0, 0], sizes = [8, 32], strides = [1, 1]} : vector<8x96xf32> to vector<8x32xf32>
    %591 = arith.mulf %590, %582 : vector<8x32xf32>
    %592 = arith.addf %589, %591 : vector<8x32xf32>
    %593 = vector.extract_strided_slice %570 {offsets = [0, 64], sizes = [8, 32], strides = [1, 1]} : vector<8x96xf32> to vector<8x32xf32>
    %594 = math.tanh %587 : vector<8x32xf32>
    %595 = arith.mulf %593, %594 : vector<8x32xf32>
    %596 = vector.extract_strided_slice %580 {offsets = [0, 64], sizes = [8, 32], strides = [1, 1]} : vector<8x96xf32> to vector<8x32xf32>
    %597 = math.tanh %592 : vector<8x32xf32>
    %598 = arith.mulf %596, %597 : vector<8x32xf32>
    %599 = arith.index_cast %550 : i32 to index
    %c0_189 = arith.constant 0 : index
    %600 = vector.load %arg14[%599, %c0_189] : memref<64x64xf32, #tpu.memory_space<vmem>>, vector<8x32xf32>
    tpu.vector_store %arg14[%599, %c0_189], %595 {strides = array<i32>} : memref<64x64xf32, #tpu.memory_space<vmem>>, vector<8x32xf32>,
    %601 = arith.index_cast %553 : i32 to index
    %c32_190 = arith.constant 32 : index
    %602 = vector.load %arg14[%601, %c32_190] : memref<64x64xf32, #tpu.memory_space<vmem>>, vector<8x32xf32>
    tpu.vector_store %arg14[%601, %c32_190], %598 {strides = array<i32>} : memref<64x64xf32, #tpu.memory_space<vmem>>, vector<8x32xf32>,
    %603 = tpu.concatenate %595, %598 in 1 : vector<8x32xf32>, vector<8x32xf32> -> vector<8x64xf32>
    %c2_i32_191 = arith.constant 2 : i32
    %c8_i32_192 = arith.constant 8 : i32
    %604 = arith.muli %c2_i32_191, %c8_i32_192 : i32
    %605 = tpu.assume_multiple %604, 8 : i32
    %c7_i32_193 = arith.constant 7 : i32
    %606 = arith.subi %c7_i32_193, %c2_i32_191 : i32
    %c8_i32_194 = arith.constant 8 : i32
    %607 = arith.muli %606, %c8_i32_194 : i32
    %608 = tpu.assume_multiple %607, 8 : i32
    %cst_195 = arith.constant dense<0.000000e+00> : vector<8x256xf32>
    %609 = tpu.matmul %603, %487, %cst_195 {dimension_numbers = #tpu.dot_dimension_numbers<[1], [0], [0], [1], [0, 0, 1, 1], [], []>} : vector<8x64xf32>, vector<64x256xf32>, vector<8x256xf32> -> vector<8x256xf32>
    %610 = arith.index_cast %605 : i32 to index
    %c0_196 = arith.constant 0 : index
    %611 = vector.load %arg13[%610, %c0_196] : memref<64x256xf32, #tpu.memory_space<vmem>>, vector<8x128xf32>
    %612 = vector.extract_strided_slice %609 {offsets = [0, 0], sizes = [8, 128], strides = [1, 1]} : vector<8x256xf32> to vector<8x128xf32>
    %613 = arith.addf %611, %612 : vector<8x128xf32>
    %614 = arith.index_cast %608 : i32 to index
    %c128_197 = arith.constant 128 : index
    %615 = vector.load %arg13[%614, %c128_197] : memref<64x256xf32, #tpu.memory_space<vmem>>, vector<8x128xf32>
    %616 = vector.extract_strided_slice %609 {offsets = [0, 128], sizes = [8, 128], strides = [1, 1]} : vector<8x256xf32> to vector<8x128xf32>
    %617 = arith.addf %615, %616 : vector<8x128xf32>
    %618 = vector.extract_strided_slice %613 {offsets = [0, 0], sizes = [8, 96], strides = [1, 1]} : vector<8x128xf32> to vector<8x96xf32>
    %cst_198 = arith.constant 0.000000e+00 : f32
    %619 = vector.broadcast %cst_198 : f32 to vector<8x96xf32>
    %620 = arith.subf %619, %618 : vector<8x96xf32>
    %621 = math.exp %620 : vector<8x96xf32>
    %cst_199 = arith.constant 1.000000e+00 : f32
    %622 = vector.broadcast %cst_199 : f32 to vector<8x96xf32>
    %623 = arith.addf %622, %621 : vector<8x96xf32>
    %cst_200 = arith.constant 1.000000e+00 : f32
    %624 = vector.broadcast %cst_200 : f32 to vector<8x96xf32>
    %625 = arith.divf %624, %623 : vector<8x96xf32>
    %626 = vector.extract_strided_slice %613 {offsets = [0, 96], sizes = [8, 32], strides = [1, 1]} : vector<8x128xf32> to vector<8x32xf32>
    %627 = math.tanh %626 : vector<8x32xf32>
    %628 = vector.extract_strided_slice %617 {offsets = [0, 0], sizes = [8, 96], strides = [1, 1]} : vector<8x128xf32> to vector<8x96xf32>
    %cst_201 = arith.constant 0.000000e+00 : f32
    %629 = vector.broadcast %cst_201 : f32 to vector<8x96xf32>
    %630 = arith.subf %629, %628 : vector<8x96xf32>
    %631 = math.exp %630 : vector<8x96xf32>
    %cst_202 = arith.constant 1.000000e+00 : f32
    %632 = vector.broadcast %cst_202 : f32 to vector<8x96xf32>
    %633 = arith.addf %632, %631 : vector<8x96xf32>
    %cst_203 = arith.constant 1.000000e+00 : f32
    %634 = vector.broadcast %cst_203 : f32 to vector<8x96xf32>
    %635 = arith.divf %634, %633 : vector<8x96xf32>
    %636 = vector.extract_strided_slice %617 {offsets = [0, 96], sizes = [8, 32], strides = [1, 1]} : vector<8x128xf32> to vector<8x32xf32>
    %637 = math.tanh %636 : vector<8x32xf32>
    %638 = vector.extract_strided_slice %625 {offsets = [0, 32], sizes = [8, 32], strides = [1, 1]} : vector<8x96xf32> to vector<8x32xf32>
    %639 = arith.mulf %638, %587 : vector<8x32xf32>
    %640 = vector.extract_strided_slice %625 {offsets = [0, 0], sizes = [8, 32], strides = [1, 1]} : vector<8x96xf32> to vector<8x32xf32>
    %641 = arith.mulf %640, %627 : vector<8x32xf32>
    %642 = arith.addf %639, %641 : vector<8x32xf32>
    %643 = vector.extract_strided_slice %635 {offsets = [0, 32], sizes = [8, 32], strides = [1, 1]} : vector<8x96xf32> to vector<8x32xf32>
    %644 = arith.mulf %643, %592 : vector<8x32xf32>
    %645 = vector.extract_strided_slice %635 {offsets = [0, 0], sizes = [8, 32], strides = [1, 1]} : vector<8x96xf32> to vector<8x32xf32>
    %646 = arith.mulf %645, %637 : vector<8x32xf32>
    %647 = arith.addf %644, %646 : vector<8x32xf32>
    %648 = vector.extract_strided_slice %625 {offsets = [0, 64], sizes = [8, 32], strides = [1, 1]} : vector<8x96xf32> to vector<8x32xf32>
    %649 = math.tanh %642 : vector<8x32xf32>
    %650 = arith.mulf %648, %649 : vector<8x32xf32>
    %651 = vector.extract_strided_slice %635 {offsets = [0, 64], sizes = [8, 32], strides = [1, 1]} : vector<8x96xf32> to vector<8x32xf32>
    %652 = math.tanh %647 : vector<8x32xf32>
    %653 = arith.mulf %651, %652 : vector<8x32xf32>
    %654 = arith.index_cast %605 : i32 to index
    %c0_204 = arith.constant 0 : index
    %655 = vector.load %arg14[%654, %c0_204] : memref<64x64xf32, #tpu.memory_space<vmem>>, vector<8x32xf32>
    tpu.vector_store %arg14[%654, %c0_204], %650 {strides = array<i32>} : memref<64x64xf32, #tpu.memory_space<vmem>>, vector<8x32xf32>,
    %656 = arith.index_cast %608 : i32 to index
    %c32_205 = arith.constant 32 : index
    %657 = vector.load %arg14[%656, %c32_205] : memref<64x64xf32, #tpu.memory_space<vmem>>, vector<8x32xf32>
    tpu.vector_store %arg14[%656, %c32_205], %653 {strides = array<i32>} : memref<64x64xf32, #tpu.memory_space<vmem>>, vector<8x32xf32>,
    %658 = tpu.concatenate %650, %653 in 1 : vector<8x32xf32>, vector<8x32xf32> -> vector<8x64xf32>
    %c3_i32_206 = arith.constant 3 : i32
    %c8_i32_207 = arith.constant 8 : i32
    %659 = arith.muli %c3_i32_206, %c8_i32_207 : i32
    %660 = tpu.assume_multiple %659, 8 : i32
    %c7_i32_208 = arith.constant 7 : i32
    %661 = arith.subi %c7_i32_208, %c3_i32_206 : i32
    %c8_i32_209 = arith.constant 8 : i32
    %662 = arith.muli %661, %c8_i32_209 : i32
    %663 = tpu.assume_multiple %662, 8 : i32
    %cst_210 = arith.constant dense<0.000000e+00> : vector<8x256xf32>
    %664 = tpu.matmul %658, %487, %cst_210 {dimension_numbers = #tpu.dot_dimension_numbers<[1], [0], [0], [1], [0, 0, 1, 1], [], []>} : vector<8x64xf32>, vector<64x256xf32>, vector<8x256xf32> -> vector<8x256xf32>
    %665 = arith.index_cast %660 : i32 to index
    %c0_211 = arith.constant 0 : index
    %666 = vector.load %arg13[%665, %c0_211] : memref<64x256xf32, #tpu.memory_space<vmem>>, vector<8x128xf32>
    %667 = vector.extract_strided_slice %664 {offsets = [0, 0], sizes = [8, 128], strides = [1, 1]} : vector<8x256xf32> to vector<8x128xf32>
    %668 = arith.addf %666, %667 : vector<8x128xf32>
    %669 = arith.index_cast %663 : i32 to index
    %c128_212 = arith.constant 128 : index
    %670 = vector.load %arg13[%669, %c128_212] : memref<64x256xf32, #tpu.memory_space<vmem>>, vector<8x128xf32>
    %671 = vector.extract_strided_slice %664 {offsets = [0, 128], sizes = [8, 128], strides = [1, 1]} : vector<8x256xf32> to vector<8x128xf32>
    %672 = arith.addf %670, %671 : vector<8x128xf32>
    %673 = vector.extract_strided_slice %668 {offsets = [0, 0], sizes = [8, 96], strides = [1, 1]} : vector<8x128xf32> to vector<8x96xf32>
    %cst_213 = arith.constant 0.000000e+00 : f32
    %674 = vector.broadcast %cst_213 : f32 to vector<8x96xf32>
    %675 = arith.subf %674, %673 : vector<8x96xf32>
    %676 = math.exp %675 : vector<8x96xf32>
    %cst_214 = arith.constant 1.000000e+00 : f32
    %677 = vector.broadcast %cst_214 : f32 to vector<8x96xf32>
    %678 = arith.addf %677, %676 : vector<8x96xf32>
    %cst_215 = arith.constant 1.000000e+00 : f32
    %679 = vector.broadcast %cst_215 : f32 to vector<8x96xf32>
    %680 = arith.divf %679, %678 : vector<8x96xf32>
    %681 = vector.extract_strided_slice %668 {offsets = [0, 96], sizes = [8, 32], strides = [1, 1]} : vector<8x128xf32> to vector<8x32xf32>
    %682 = math.tanh %681 : vector<8x32xf32>
    %683 = vector.extract_strided_slice %672 {offsets = [0, 0], sizes = [8, 96], strides = [1, 1]} : vector<8x128xf32> to vector<8x96xf32>
    %cst_216 = arith.constant 0.000000e+00 : f32
    %684 = vector.broadcast %cst_216 : f32 to vector<8x96xf32>
    %685 = arith.subf %684, %683 : vector<8x96xf32>
    %686 = math.exp %685 : vector<8x96xf32>
    %cst_217 = arith.constant 1.000000e+00 : f32
    %687 = vector.broadcast %cst_217 : f32 to vector<8x96xf32>
    %688 = arith.addf %687, %686 : vector<8x96xf32>
    %cst_218 = arith.constant 1.000000e+00 : f32
    %689 = vector.broadcast %cst_218 : f32 to vector<8x96xf32>
    %690 = arith.divf %689, %688 : vector<8x96xf32>
    %691 = vector.extract_strided_slice %672 {offsets = [0, 96], sizes = [8, 32], strides = [1, 1]} : vector<8x128xf32> to vector<8x32xf32>
    %692 = math.tanh %691 : vector<8x32xf32>
    %693 = vector.extract_strided_slice %680 {offsets = [0, 32], sizes = [8, 32], strides = [1, 1]} : vector<8x96xf32> to vector<8x32xf32>
    %694 = arith.mulf %693, %642 : vector<8x32xf32>
    %695 = vector.extract_strided_slice %680 {offsets = [0, 0], sizes = [8, 32], strides = [1, 1]} : vector<8x96xf32> to vector<8x32xf32>
    %696 = arith.mulf %695, %682 : vector<8x32xf32>
    %697 = arith.addf %694, %696 : vector<8x32xf32>
    %698 = vector.extract_strided_slice %690 {offsets = [0, 32], sizes = [8, 32], strides = [1, 1]} : vector<8x96xf32> to vector<8x32xf32>
    %699 = arith.mulf %698, %647 : vector<8x32xf32>
    %700 = vector.extract_strided_slice %690 {offsets = [0, 0], sizes = [8, 32], strides = [1, 1]} : vector<8x96xf32> to vector<8x32xf32>
    %701 = arith.mulf %700, %692 : vector<8x32xf32>
    %702 = arith.addf %699, %701 : vector<8x32xf32>
    %703 = vector.extract_strided_slice %680 {offsets = [0, 64], sizes = [8, 32], strides = [1, 1]} : vector<8x96xf32> to vector<8x32xf32>
    %704 = math.tanh %697 : vector<8x32xf32>
    %705 = arith.mulf %703, %704 : vector<8x32xf32>
    %706 = vector.extract_strided_slice %690 {offsets = [0, 64], sizes = [8, 32], strides = [1, 1]} : vector<8x96xf32> to vector<8x32xf32>
    %707 = math.tanh %702 : vector<8x32xf32>
    %708 = arith.mulf %706, %707 : vector<8x32xf32>
    %709 = arith.index_cast %660 : i32 to index
    %c0_219 = arith.constant 0 : index
    %710 = vector.load %arg14[%709, %c0_219] : memref<64x64xf32, #tpu.memory_space<vmem>>, vector<8x32xf32>
    tpu.vector_store %arg14[%709, %c0_219], %705 {strides = array<i32>} : memref<64x64xf32, #tpu.memory_space<vmem>>, vector<8x32xf32>,
    %711 = arith.index_cast %663 : i32 to index
    %c32_220 = arith.constant 32 : index
    %712 = vector.load %arg14[%711, %c32_220] : memref<64x64xf32, #tpu.memory_space<vmem>>, vector<8x32xf32>
    tpu.vector_store %arg14[%711, %c32_220], %708 {strides = array<i32>} : memref<64x64xf32, #tpu.memory_space<vmem>>, vector<8x32xf32>,
    %713 = tpu.concatenate %705, %708 in 1 : vector<8x32xf32>, vector<8x32xf32> -> vector<8x64xf32>
    %c4_i32_221 = arith.constant 4 : i32
    %c8_i32_222 = arith.constant 8 : i32
    %714 = arith.muli %c4_i32_221, %c8_i32_222 : i32
    %715 = tpu.assume_multiple %714, 8 : i32
    %c7_i32_223 = arith.constant 7 : i32
    %716 = arith.subi %c7_i32_223, %c4_i32_221 : i32
    %c8_i32_224 = arith.constant 8 : i32
    %717 = arith.muli %716, %c8_i32_224 : i32
    %718 = tpu.assume_multiple %717, 8 : i32
    %cst_225 = arith.constant dense<0.000000e+00> : vector<8x256xf32>
    %719 = tpu.matmul %713, %487, %cst_225 {dimension_numbers = #tpu.dot_dimension_numbers<[1], [0], [0], [1], [0, 0, 1, 1], [], []>} : vector<8x64xf32>, vector<64x256xf32>, vector<8x256xf32> -> vector<8x256xf32>
    %720 = arith.index_cast %715 : i32 to index
    %c0_226 = arith.constant 0 : index
    %721 = vector.load %arg13[%720, %c0_226] : memref<64x256xf32, #tpu.memory_space<vmem>>, vector<8x128xf32>
    %722 = vector.extract_strided_slice %719 {offsets = [0, 0], sizes = [8, 128], strides = [1, 1]} : vector<8x256xf32> to vector<8x128xf32>
    %723 = arith.addf %721, %722 : vector<8x128xf32>
    %724 = arith.index_cast %718 : i32 to index
    %c128_227 = arith.constant 128 : index
    %725 = vector.load %arg13[%724, %c128_227] : memref<64x256xf32, #tpu.memory_space<vmem>>, vector<8x128xf32>
    %726 = vector.extract_strided_slice %719 {offsets = [0, 128], sizes = [8, 128], strides = [1, 1]} : vector<8x256xf32> to vector<8x128xf32>
    %727 = arith.addf %725, %726 : vector<8x128xf32>
    %728 = vector.extract_strided_slice %723 {offsets = [0, 0], sizes = [8, 96], strides = [1, 1]} : vector<8x128xf32> to vector<8x96xf32>
    %cst_228 = arith.constant 0.000000e+00 : f32
    %729 = vector.broadcast %cst_228 : f32 to vector<8x96xf32>
    %730 = arith.subf %729, %728 : vector<8x96xf32>
    %731 = math.exp %730 : vector<8x96xf32>
    %cst_229 = arith.constant 1.000000e+00 : f32
    %732 = vector.broadcast %cst_229 : f32 to vector<8x96xf32>
    %733 = arith.addf %732, %731 : vector<8x96xf32>
    %cst_230 = arith.constant 1.000000e+00 : f32
    %734 = vector.broadcast %cst_230 : f32 to vector<8x96xf32>
    %735 = arith.divf %734, %733 : vector<8x96xf32>
    %736 = vector.extract_strided_slice %723 {offsets = [0, 96], sizes = [8, 32], strides = [1, 1]} : vector<8x128xf32> to vector<8x32xf32>
    %737 = math.tanh %736 : vector<8x32xf32>
    %738 = vector.extract_strided_slice %727 {offsets = [0, 0], sizes = [8, 96], strides = [1, 1]} : vector<8x128xf32> to vector<8x96xf32>
    %cst_231 = arith.constant 0.000000e+00 : f32
    %739 = vector.broadcast %cst_231 : f32 to vector<8x96xf32>
    %740 = arith.subf %739, %738 : vector<8x96xf32>
    %741 = math.exp %740 : vector<8x96xf32>
    %cst_232 = arith.constant 1.000000e+00 : f32
    %742 = vector.broadcast %cst_232 : f32 to vector<8x96xf32>
    %743 = arith.addf %742, %741 : vector<8x96xf32>
    %cst_233 = arith.constant 1.000000e+00 : f32
    %744 = vector.broadcast %cst_233 : f32 to vector<8x96xf32>
    %745 = arith.divf %744, %743 : vector<8x96xf32>
    %746 = vector.extract_strided_slice %727 {offsets = [0, 96], sizes = [8, 32], strides = [1, 1]} : vector<8x128xf32> to vector<8x32xf32>
    %747 = math.tanh %746 : vector<8x32xf32>
    %748 = vector.extract_strided_slice %735 {offsets = [0, 32], sizes = [8, 32], strides = [1, 1]} : vector<8x96xf32> to vector<8x32xf32>
    %749 = arith.mulf %748, %697 : vector<8x32xf32>
    %750 = vector.extract_strided_slice %735 {offsets = [0, 0], sizes = [8, 32], strides = [1, 1]} : vector<8x96xf32> to vector<8x32xf32>
    %751 = arith.mulf %750, %737 : vector<8x32xf32>
    %752 = arith.addf %749, %751 : vector<8x32xf32>
    %753 = vector.extract_strided_slice %745 {offsets = [0, 32], sizes = [8, 32], strides = [1, 1]} : vector<8x96xf32> to vector<8x32xf32>
    %754 = arith.mulf %753, %702 : vector<8x32xf32>
    %755 = vector.extract_strided_slice %745 {offsets = [0, 0], sizes = [8, 32], strides = [1, 1]} : vector<8x96xf32> to vector<8x32xf32>
    %756 = arith.mulf %755, %747 : vector<8x32xf32>
    %757 = arith.addf %754, %756 : vector<8x32xf32>
    %758 = vector.extract_strided_slice %735 {offsets = [0, 64], sizes = [8, 32], strides = [1, 1]} : vector<8x96xf32> to vector<8x32xf32>
    %759 = math.tanh %752 : vector<8x32xf32>
    %760 = arith.mulf %758, %759 : vector<8x32xf32>
    %761 = vector.extract_strided_slice %745 {offsets = [0, 64], sizes = [8, 32], strides = [1, 1]} : vector<8x96xf32> to vector<8x32xf32>
    %762 = math.tanh %757 : vector<8x32xf32>
    %763 = arith.mulf %761, %762 : vector<8x32xf32>
    %764 = arith.index_cast %715 : i32 to index
    %c0_234 = arith.constant 0 : index
    %765 = vector.load %arg14[%764, %c0_234] : memref<64x64xf32, #tpu.memory_space<vmem>>, vector<8x32xf32>
    tpu.vector_store %arg14[%764, %c0_234], %760 {strides = array<i32>} : memref<64x64xf32, #tpu.memory_space<vmem>>, vector<8x32xf32>,
    %766 = arith.index_cast %718 : i32 to index
    %c32_235 = arith.constant 32 : index
    %767 = vector.load %arg14[%766, %c32_235] : memref<64x64xf32, #tpu.memory_space<vmem>>, vector<8x32xf32>
    tpu.vector_store %arg14[%766, %c32_235], %763 {strides = array<i32>} : memref<64x64xf32, #tpu.memory_space<vmem>>, vector<8x32xf32>,
    %768 = tpu.concatenate %760, %763 in 1 : vector<8x32xf32>, vector<8x32xf32> -> vector<8x64xf32>
    %c5_i32_236 = arith.constant 5 : i32
    %c8_i32_237 = arith.constant 8 : i32
    %769 = arith.muli %c5_i32_236, %c8_i32_237 : i32
    %770 = tpu.assume_multiple %769, 8 : i32
    %c7_i32_238 = arith.constant 7 : i32
    %771 = arith.subi %c7_i32_238, %c5_i32_236 : i32
    %c8_i32_239 = arith.constant 8 : i32
    %772 = arith.muli %771, %c8_i32_239 : i32
    %773 = tpu.assume_multiple %772, 8 : i32
    %cst_240 = arith.constant dense<0.000000e+00> : vector<8x256xf32>
    %774 = tpu.matmul %768, %487, %cst_240 {dimension_numbers = #tpu.dot_dimension_numbers<[1], [0], [0], [1], [0, 0, 1, 1], [], []>} : vector<8x64xf32>, vector<64x256xf32>, vector<8x256xf32> -> vector<8x256xf32>
    %775 = arith.index_cast %770 : i32 to index
    %c0_241 = arith.constant 0 : index
    %776 = vector.load %arg13[%775, %c0_241] : memref<64x256xf32, #tpu.memory_space<vmem>>, vector<8x128xf32>
    %777 = vector.extract_strided_slice %774 {offsets = [0, 0], sizes = [8, 128], strides = [1, 1]} : vector<8x256xf32> to vector<8x128xf32>
    %778 = arith.addf %776, %777 : vector<8x128xf32>
    %779 = arith.index_cast %773 : i32 to index
    %c128_242 = arith.constant 128 : index
    %780 = vector.load %arg13[%779, %c128_242] : memref<64x256xf32, #tpu.memory_space<vmem>>, vector<8x128xf32>
    %781 = vector.extract_strided_slice %774 {offsets = [0, 128], sizes = [8, 128], strides = [1, 1]} : vector<8x256xf32> to vector<8x128xf32>
    %782 = arith.addf %780, %781 : vector<8x128xf32>
    %783 = vector.extract_strided_slice %778 {offsets = [0, 0], sizes = [8, 96], strides = [1, 1]} : vector<8x128xf32> to vector<8x96xf32>
    %cst_243 = arith.constant 0.000000e+00 : f32
    %784 = vector.broadcast %cst_243 : f32 to vector<8x96xf32>
    %785 = arith.subf %784, %783 : vector<8x96xf32>
    %786 = math.exp %785 : vector<8x96xf32>
    %cst_244 = arith.constant 1.000000e+00 : f32
    %787 = vector.broadcast %cst_244 : f32 to vector<8x96xf32>
    %788 = arith.addf %787, %786 : vector<8x96xf32>
    %cst_245 = arith.constant 1.000000e+00 : f32
    %789 = vector.broadcast %cst_245 : f32 to vector<8x96xf32>
    %790 = arith.divf %789, %788 : vector<8x96xf32>
    %791 = vector.extract_strided_slice %778 {offsets = [0, 96], sizes = [8, 32], strides = [1, 1]} : vector<8x128xf32> to vector<8x32xf32>
    %792 = math.tanh %791 : vector<8x32xf32>
    %793 = vector.extract_strided_slice %782 {offsets = [0, 0], sizes = [8, 96], strides = [1, 1]} : vector<8x128xf32> to vector<8x96xf32>
    %cst_246 = arith.constant 0.000000e+00 : f32
    %794 = vector.broadcast %cst_246 : f32 to vector<8x96xf32>
    %795 = arith.subf %794, %793 : vector<8x96xf32>
    %796 = math.exp %795 : vector<8x96xf32>
    %cst_247 = arith.constant 1.000000e+00 : f32
    %797 = vector.broadcast %cst_247 : f32 to vector<8x96xf32>
    %798 = arith.addf %797, %796 : vector<8x96xf32>
    %cst_248 = arith.constant 1.000000e+00 : f32
    %799 = vector.broadcast %cst_248 : f32 to vector<8x96xf32>
    %800 = arith.divf %799, %798 : vector<8x96xf32>
    %801 = vector.extract_strided_slice %782 {offsets = [0, 96], sizes = [8, 32], strides = [1, 1]} : vector<8x128xf32> to vector<8x32xf32>
    %802 = math.tanh %801 : vector<8x32xf32>
    %803 = vector.extract_strided_slice %790 {offsets = [0, 32], sizes = [8, 32], strides = [1, 1]} : vector<8x96xf32> to vector<8x32xf32>
    %804 = arith.mulf %803, %752 : vector<8x32xf32>
    %805 = vector.extract_strided_slice %790 {offsets = [0, 0], sizes = [8, 32], strides = [1, 1]} : vector<8x96xf32> to vector<8x32xf32>
    %806 = arith.mulf %805, %792 : vector<8x32xf32>
    %807 = arith.addf %804, %806 : vector<8x32xf32>
    %808 = vector.extract_strided_slice %800 {offsets = [0, 32], sizes = [8, 32], strides = [1, 1]} : vector<8x96xf32> to vector<8x32xf32>
    %809 = arith.mulf %808, %757 : vector<8x32xf32>
    %810 = vector.extract_strided_slice %800 {offsets = [0, 0], sizes = [8, 32], strides = [1, 1]} : vector<8x96xf32> to vector<8x32xf32>
    %811 = arith.mulf %810, %802 : vector<8x32xf32>
    %812 = arith.addf %809, %811 : vector<8x32xf32>
    %813 = vector.extract_strided_slice %790 {offsets = [0, 64], sizes = [8, 32], strides = [1, 1]} : vector<8x96xf32> to vector<8x32xf32>
    %814 = math.tanh %807 : vector<8x32xf32>
    %815 = arith.mulf %813, %814 : vector<8x32xf32>
    %816 = vector.extract_strided_slice %800 {offsets = [0, 64], sizes = [8, 32], strides = [1, 1]} : vector<8x96xf32> to vector<8x32xf32>
    %817 = math.tanh %812 : vector<8x32xf32>
    %818 = arith.mulf %816, %817 : vector<8x32xf32>
    %819 = arith.index_cast %770 : i32 to index
    %c0_249 = arith.constant 0 : index
    %820 = vector.load %arg14[%819, %c0_249] : memref<64x64xf32, #tpu.memory_space<vmem>>, vector<8x32xf32>
    tpu.vector_store %arg14[%819, %c0_249], %815 {strides = array<i32>} : memref<64x64xf32, #tpu.memory_space<vmem>>, vector<8x32xf32>,
    %821 = arith.index_cast %773 : i32 to index
    %c32_250 = arith.constant 32 : index
    %822 = vector.load %arg14[%821, %c32_250] : memref<64x64xf32, #tpu.memory_space<vmem>>, vector<8x32xf32>
    tpu.vector_store %arg14[%821, %c32_250], %818 {strides = array<i32>} : memref<64x64xf32, #tpu.memory_space<vmem>>, vector<8x32xf32>,
    %823 = tpu.concatenate %815, %818 in 1 : vector<8x32xf32>, vector<8x32xf32> -> vector<8x64xf32>
    %c6_i32_251 = arith.constant 6 : i32
    %c8_i32_252 = arith.constant 8 : i32
    %824 = arith.muli %c6_i32_251, %c8_i32_252 : i32
    %825 = tpu.assume_multiple %824, 8 : i32
    %c7_i32_253 = arith.constant 7 : i32
    %826 = arith.subi %c7_i32_253, %c6_i32_251 : i32
    %c8_i32_254 = arith.constant 8 : i32
    %827 = arith.muli %826, %c8_i32_254 : i32
    %828 = tpu.assume_multiple %827, 8 : i32
    %cst_255 = arith.constant dense<0.000000e+00> : vector<8x256xf32>
    %829 = tpu.matmul %823, %487, %cst_255 {dimension_numbers = #tpu.dot_dimension_numbers<[1], [0], [0], [1], [0, 0, 1, 1], [], []>} : vector<8x64xf32>, vector<64x256xf32>, vector<8x256xf32> -> vector<8x256xf32>
    %830 = arith.index_cast %825 : i32 to index
    %c0_256 = arith.constant 0 : index
    %831 = vector.load %arg13[%830, %c0_256] : memref<64x256xf32, #tpu.memory_space<vmem>>, vector<8x128xf32>
    %832 = vector.extract_strided_slice %829 {offsets = [0, 0], sizes = [8, 128], strides = [1, 1]} : vector<8x256xf32> to vector<8x128xf32>
    %833 = arith.addf %831, %832 : vector<8x128xf32>
    %834 = arith.index_cast %828 : i32 to index
    %c128_257 = arith.constant 128 : index
    %835 = vector.load %arg13[%834, %c128_257] : memref<64x256xf32, #tpu.memory_space<vmem>>, vector<8x128xf32>
    %836 = vector.extract_strided_slice %829 {offsets = [0, 128], sizes = [8, 128], strides = [1, 1]} : vector<8x256xf32> to vector<8x128xf32>
    %837 = arith.addf %835, %836 : vector<8x128xf32>
    %838 = vector.extract_strided_slice %833 {offsets = [0, 0], sizes = [8, 96], strides = [1, 1]} : vector<8x128xf32> to vector<8x96xf32>
    %cst_258 = arith.constant 0.000000e+00 : f32
    %839 = vector.broadcast %cst_258 : f32 to vector<8x96xf32>
    %840 = arith.subf %839, %838 : vector<8x96xf32>
    %841 = math.exp %840 : vector<8x96xf32>
    %cst_259 = arith.constant 1.000000e+00 : f32
    %842 = vector.broadcast %cst_259 : f32 to vector<8x96xf32>
    %843 = arith.addf %842, %841 : vector<8x96xf32>
    %cst_260 = arith.constant 1.000000e+00 : f32
    %844 = vector.broadcast %cst_260 : f32 to vector<8x96xf32>
    %845 = arith.divf %844, %843 : vector<8x96xf32>
    %846 = vector.extract_strided_slice %833 {offsets = [0, 96], sizes = [8, 32], strides = [1, 1]} : vector<8x128xf32> to vector<8x32xf32>
    %847 = math.tanh %846 : vector<8x32xf32>
    %848 = vector.extract_strided_slice %837 {offsets = [0, 0], sizes = [8, 96], strides = [1, 1]} : vector<8x128xf32> to vector<8x96xf32>
    %cst_261 = arith.constant 0.000000e+00 : f32
    %849 = vector.broadcast %cst_261 : f32 to vector<8x96xf32>
    %850 = arith.subf %849, %848 : vector<8x96xf32>
    %851 = math.exp %850 : vector<8x96xf32>
    %cst_262 = arith.constant 1.000000e+00 : f32
    %852 = vector.broadcast %cst_262 : f32 to vector<8x96xf32>
    %853 = arith.addf %852, %851 : vector<8x96xf32>
    %cst_263 = arith.constant 1.000000e+00 : f32
    %854 = vector.broadcast %cst_263 : f32 to vector<8x96xf32>
    %855 = arith.divf %854, %853 : vector<8x96xf32>
    %856 = vector.extract_strided_slice %837 {offsets = [0, 96], sizes = [8, 32], strides = [1, 1]} : vector<8x128xf32> to vector<8x32xf32>
    %857 = math.tanh %856 : vector<8x32xf32>
    %858 = vector.extract_strided_slice %845 {offsets = [0, 32], sizes = [8, 32], strides = [1, 1]} : vector<8x96xf32> to vector<8x32xf32>
    %859 = arith.mulf %858, %807 : vector<8x32xf32>
    %860 = vector.extract_strided_slice %845 {offsets = [0, 0], sizes = [8, 32], strides = [1, 1]} : vector<8x96xf32> to vector<8x32xf32>
    %861 = arith.mulf %860, %847 : vector<8x32xf32>
    %862 = arith.addf %859, %861 : vector<8x32xf32>
    %863 = vector.extract_strided_slice %855 {offsets = [0, 32], sizes = [8, 32], strides = [1, 1]} : vector<8x96xf32> to vector<8x32xf32>
    %864 = arith.mulf %863, %812 : vector<8x32xf32>
    %865 = vector.extract_strided_slice %855 {offsets = [0, 0], sizes = [8, 32], strides = [1, 1]} : vector<8x96xf32> to vector<8x32xf32>
    %866 = arith.mulf %865, %857 : vector<8x32xf32>
    %867 = arith.addf %864, %866 : vector<8x32xf32>
    %868 = vector.extract_strided_slice %845 {offsets = [0, 64], sizes = [8, 32], strides = [1, 1]} : vector<8x96xf32> to vector<8x32xf32>
    %869 = math.tanh %862 : vector<8x32xf32>
    %870 = arith.mulf %868, %869 : vector<8x32xf32>
    %871 = vector.extract_strided_slice %855 {offsets = [0, 64], sizes = [8, 32], strides = [1, 1]} : vector<8x96xf32> to vector<8x32xf32>
    %872 = math.tanh %867 : vector<8x32xf32>
    %873 = arith.mulf %871, %872 : vector<8x32xf32>
    %874 = arith.index_cast %825 : i32 to index
    %c0_264 = arith.constant 0 : index
    %875 = vector.load %arg14[%874, %c0_264] : memref<64x64xf32, #tpu.memory_space<vmem>>, vector<8x32xf32>
    tpu.vector_store %arg14[%874, %c0_264], %870 {strides = array<i32>} : memref<64x64xf32, #tpu.memory_space<vmem>>, vector<8x32xf32>,
    %876 = arith.index_cast %828 : i32 to index
    %c32_265 = arith.constant 32 : index
    %877 = vector.load %arg14[%876, %c32_265] : memref<64x64xf32, #tpu.memory_space<vmem>>, vector<8x32xf32>
    tpu.vector_store %arg14[%876, %c32_265], %873 {strides = array<i32>} : memref<64x64xf32, #tpu.memory_space<vmem>>, vector<8x32xf32>,
    %878 = tpu.concatenate %870, %873 in 1 : vector<8x32xf32>, vector<8x32xf32> -> vector<8x64xf32>
    %c7_i32_266 = arith.constant 7 : i32
    %c8_i32_267 = arith.constant 8 : i32
    %879 = arith.muli %c7_i32_266, %c8_i32_267 : i32
    %880 = tpu.assume_multiple %879, 8 : i32
    %c7_i32_268 = arith.constant 7 : i32
    %881 = arith.subi %c7_i32_268, %c7_i32_266 : i32
    %c8_i32_269 = arith.constant 8 : i32
    %882 = arith.muli %881, %c8_i32_269 : i32
    %883 = tpu.assume_multiple %882, 8 : i32
    %cst_270 = arith.constant dense<0.000000e+00> : vector<8x256xf32>
    %884 = tpu.matmul %878, %487, %cst_270 {dimension_numbers = #tpu.dot_dimension_numbers<[1], [0], [0], [1], [0, 0, 1, 1], [], []>} : vector<8x64xf32>, vector<64x256xf32>, vector<8x256xf32> -> vector<8x256xf32>
    %885 = arith.index_cast %880 : i32 to index
    %c0_271 = arith.constant 0 : index
    %886 = vector.load %arg13[%885, %c0_271] : memref<64x256xf32, #tpu.memory_space<vmem>>, vector<8x128xf32>
    %887 = vector.extract_strided_slice %884 {offsets = [0, 0], sizes = [8, 128], strides = [1, 1]} : vector<8x256xf32> to vector<8x128xf32>
    %888 = arith.addf %886, %887 : vector<8x128xf32>
    %889 = arith.index_cast %883 : i32 to index
    %c128_272 = arith.constant 128 : index
    %890 = vector.load %arg13[%889, %c128_272] : memref<64x256xf32, #tpu.memory_space<vmem>>, vector<8x128xf32>
    %891 = vector.extract_strided_slice %884 {offsets = [0, 128], sizes = [8, 128], strides = [1, 1]} : vector<8x256xf32> to vector<8x128xf32>
    %892 = arith.addf %890, %891 : vector<8x128xf32>
    %893 = vector.extract_strided_slice %888 {offsets = [0, 0], sizes = [8, 96], strides = [1, 1]} : vector<8x128xf32> to vector<8x96xf32>
    %cst_273 = arith.constant 0.000000e+00 : f32
    %894 = vector.broadcast %cst_273 : f32 to vector<8x96xf32>
    %895 = arith.subf %894, %893 : vector<8x96xf32>
    %896 = math.exp %895 : vector<8x96xf32>
    %cst_274 = arith.constant 1.000000e+00 : f32
    %897 = vector.broadcast %cst_274 : f32 to vector<8x96xf32>
    %898 = arith.addf %897, %896 : vector<8x96xf32>
    %cst_275 = arith.constant 1.000000e+00 : f32
    %899 = vector.broadcast %cst_275 : f32 to vector<8x96xf32>
    %900 = arith.divf %899, %898 : vector<8x96xf32>
    %901 = vector.extract_strided_slice %888 {offsets = [0, 96], sizes = [8, 32], strides = [1, 1]} : vector<8x128xf32> to vector<8x32xf32>
    %902 = math.tanh %901 : vector<8x32xf32>
    %903 = vector.extract_strided_slice %892 {offsets = [0, 0], sizes = [8, 96], strides = [1, 1]} : vector<8x128xf32> to vector<8x96xf32>
    %cst_276 = arith.constant 0.000000e+00 : f32
    %904 = vector.broadcast %cst_276 : f32 to vector<8x96xf32>
    %905 = arith.subf %904, %903 : vector<8x96xf32>
    %906 = math.exp %905 : vector<8x96xf32>
    %cst_277 = arith.constant 1.000000e+00 : f32
    %907 = vector.broadcast %cst_277 : f32 to vector<8x96xf32>
    %908 = arith.addf %907, %906 : vector<8x96xf32>
    %cst_278 = arith.constant 1.000000e+00 : f32
    %909 = vector.broadcast %cst_278 : f32 to vector<8x96xf32>
    %910 = arith.divf %909, %908 : vector<8x96xf32>
    %911 = vector.extract_strided_slice %892 {offsets = [0, 96], sizes = [8, 32], strides = [1, 1]} : vector<8x128xf32> to vector<8x32xf32>
    %912 = math.tanh %911 : vector<8x32xf32>
    %913 = vector.extract_strided_slice %900 {offsets = [0, 32], sizes = [8, 32], strides = [1, 1]} : vector<8x96xf32> to vector<8x32xf32>
    %914 = arith.mulf %913, %862 : vector<8x32xf32>
    %915 = vector.extract_strided_slice %900 {offsets = [0, 0], sizes = [8, 32], strides = [1, 1]} : vector<8x96xf32> to vector<8x32xf32>
    %916 = arith.mulf %915, %902 : vector<8x32xf32>
    %917 = arith.addf %914, %916 : vector<8x32xf32>
    %918 = vector.extract_strided_slice %910 {offsets = [0, 32], sizes = [8, 32], strides = [1, 1]} : vector<8x96xf32> to vector<8x32xf32>
    %919 = arith.mulf %918, %867 : vector<8x32xf32>
    %920 = vector.extract_strided_slice %910 {offsets = [0, 0], sizes = [8, 32], strides = [1, 1]} : vector<8x96xf32> to vector<8x32xf32>
    %921 = arith.mulf %920, %912 : vector<8x32xf32>
    %922 = arith.addf %919, %921 : vector<8x32xf32>
    %923 = vector.extract_strided_slice %900 {offsets = [0, 64], sizes = [8, 32], strides = [1, 1]} : vector<8x96xf32> to vector<8x32xf32>
    %924 = math.tanh %917 : vector<8x32xf32>
    %925 = arith.mulf %923, %924 : vector<8x32xf32>
    %926 = vector.extract_strided_slice %910 {offsets = [0, 64], sizes = [8, 32], strides = [1, 1]} : vector<8x96xf32> to vector<8x32xf32>
    %927 = math.tanh %922 : vector<8x32xf32>
    %928 = arith.mulf %926, %927 : vector<8x32xf32>
    %929 = arith.index_cast %880 : i32 to index
    %c0_279 = arith.constant 0 : index
    %930 = vector.load %arg14[%929, %c0_279] : memref<64x64xf32, #tpu.memory_space<vmem>>, vector<8x32xf32>
    tpu.vector_store %arg14[%929, %c0_279], %925 {strides = array<i32>} : memref<64x64xf32, #tpu.memory_space<vmem>>, vector<8x32xf32>,
    %931 = arith.index_cast %883 : i32 to index
    %c32_280 = arith.constant 32 : index
    %932 = vector.load %arg14[%931, %c32_280] : memref<64x64xf32, #tpu.memory_space<vmem>>, vector<8x32xf32>
    tpu.vector_store %arg14[%931, %c32_280], %928 {strides = array<i32>} : memref<64x64xf32, #tpu.memory_space<vmem>>, vector<8x32xf32>,
    %933 = tpu.concatenate %925, %928 in 1 : vector<8x32xf32>, vector<8x32xf32> -> vector<8x64xf32>
    %c8_i32_281 = arith.constant 8 : i32
    %934 = vector.extract_strided_slice %933 {offsets = [0, 0], sizes = [8, 32], strides = [1, 1]} : vector<8x64xf32> to vector<8x32xf32>
    %c2 = arith.constant 2 : index
    %c0_282 = arith.constant 0 : index
    %c0_283 = arith.constant 0 : index
    %935 = vector.load %arg11[%c2, %c0_282, %c0_283] : memref<4x8x32xf32, #tpu.memory_space<vmem>>, vector<1x8x32xf32>
    %936 = vector.shape_cast %935 : vector<1x8x32xf32> to vector<8x32xf32>
    %937 = vector.shape_cast %934 : vector<8x32xf32> to vector<1x8x32xf32>
    tpu.vector_store %arg11[%c2, %c0_282, %c0_283], %937 {strides = array<i32>} : memref<4x8x32xf32, #tpu.memory_space<vmem>>, vector<1x8x32xf32>,
    %938 = vector.extract_strided_slice %933 {offsets = [0, 32], sizes = [8, 32], strides = [1, 1]} : vector<8x64xf32> to vector<8x32xf32>
    %c3 = arith.constant 3 : index
    %c0_284 = arith.constant 0 : index
    %c0_285 = arith.constant 0 : index
    %939 = vector.load %arg11[%c3, %c0_284, %c0_285] : memref<4x8x32xf32, #tpu.memory_space<vmem>>, vector<1x8x32xf32>
    %940 = vector.shape_cast %939 : vector<1x8x32xf32> to vector<8x32xf32>
    %941 = vector.shape_cast %938 : vector<8x32xf32> to vector<1x8x32xf32>
    tpu.vector_store %arg11[%c3, %c0_284, %c0_285], %941 {strides = array<i32>} : memref<4x8x32xf32, #tpu.memory_space<vmem>>, vector<1x8x32xf32>,
    %c2_286 = arith.constant 2 : index
    %c0_287 = arith.constant 0 : index
    %c0_288 = arith.constant 0 : index
    %942 = vector.load %arg12[%c2_286, %c0_287, %c0_288] : memref<4x8x32xf32, #tpu.memory_space<vmem>>, vector<1x8x32xf32>
    %943 = vector.shape_cast %942 : vector<1x8x32xf32> to vector<8x32xf32>
    %944 = vector.shape_cast %917 : vector<8x32xf32> to vector<1x8x32xf32>
    tpu.vector_store %arg12[%c2_286, %c0_287, %c0_288], %944 {strides = array<i32>} : memref<4x8x32xf32, #tpu.memory_space<vmem>>, vector<1x8x32xf32>,
    %c3_289 = arith.constant 3 : index
    %c0_290 = arith.constant 0 : index
    %c0_291 = arith.constant 0 : index
    %945 = vector.load %arg12[%c3_289, %c0_290, %c0_291] : memref<4x8x32xf32, #tpu.memory_space<vmem>>, vector<1x8x32xf32>
    %946 = vector.shape_cast %945 : vector<1x8x32xf32> to vector<8x32xf32>
    %947 = vector.shape_cast %922 : vector<8x32xf32> to vector<1x8x32xf32>
    tpu.vector_store %arg12[%c3_289, %c0_290, %c0_291], %947 {strides = array<i32>} : memref<4x8x32xf32, #tpu.memory_space<vmem>>, vector<1x8x32xf32>,
    %c56 = arith.constant 56 : index
    %c32_292 = arith.constant 32 : index
    %948 = vector.load %arg14[%c56, %c32_292] : memref<64x64xf32, #tpu.memory_space<vmem>>, vector<8x32xf32>
    %c0_293 = arith.constant 0 : index
    %c0_294 = arith.constant 0 : index
    %949 = vector.load %arg4[%c0_293, %c0_294] : memref<1x32xf32, #tpu.memory_space<vmem>>, vector<1x32xf32>
    %950 = vector.broadcast %949 : vector<1x32xf32> to vector<8x32xf32>
    %951 = arith.mulf %948, %950 : vector<8x32xf32>
    %cst_295 = arith.constant dense<0.000000e+00> : vector<8xf32>
    %952 = vector.multi_reduction <add>, %951, %cst_295 [1] : vector<8x32xf32> to vector<8xf32>
    %953 = vector.shape_cast %952 : vector<8xf32> to vector<8x1xf32>
    %c0_296 = arith.constant 0 : index
    %c0_297 = arith.constant 0 : index
    %954 = vector.load %arg5[%c0_296, %c0_297] : memref<1x1xf32, #tpu.memory_space<vmem>>, vector<1x1xf32>
    %955 = vector.broadcast %954 : vector<1x1xf32> to vector<8x1xf32>
    %956 = arith.addf %953, %955 : vector<8x1xf32>
    %cst_298 = arith.constant 0.000000e+00 : f32
    %957 = vector.broadcast %cst_298 : f32 to vector<8x1xf32>
    %958 = arith.subf %957, %956 : vector<8x1xf32>
    %959 = math.exp %958 : vector<8x1xf32>
    %cst_299 = arith.constant 1.000000e+00 : f32
    %960 = vector.broadcast %cst_299 : f32 to vector<8x1xf32>
    %961 = arith.addf %960, %959 : vector<8x1xf32>
    %cst_300 = arith.constant 1.000000e+00 : f32
    %962 = vector.broadcast %cst_300 : f32 to vector<8x1xf32>
    %963 = arith.divf %962, %961 : vector<8x1xf32>
    %c0_301 = arith.constant 0 : index
    %c0_302 = arith.constant 0 : index
    %964 = vector.load %arg10[%c0_301, %c0_302] : memref<8x1xf32, #tpu.memory_space<vmem>>, vector<8x1xf32>
    tpu.vector_store %arg10[%c0_301, %c0_302], %963 {strides = array<i32>} : memref<8x1xf32, #tpu.memory_space<vmem>>, vector<8x1xf32>,
    return
  }
}

</mosaic_0001>

<bundles_post_ra>
// kernel: tpu_custom_call.1
= control target key start
LH: loop header
LB: loop body
LE: loop exit
PB: predicated region body
PF: predicated region fallthrough
CT: control target
= control target key end

     0   :  { %s4486_s0 = inlined_call_operand.vmem [shape: s32[64,1], index: 0, kind: input, shape index: {}]   ;;  %s4487_s1 = inlined_call_operand.vmem [shape: f32[128,32], index: 1, kind: input, shape index: {}]   ;;  %s4488_s2 = inlined_call_operand.vmem [shape: f32[2,8,64], index: 2, kind: input, shape index: {}]   ;;  %s4489_s3 = inlined_call_operand.vmem [shape: f32[2,8,64], index: 3, kind: input, shape index: {}]   ;;  %s4490_s4 = inlined_call_operand.vmem [shape: f32[1,32], index: 4, kind: input, shape index: {}]   ;;  %s4491_s5 = inlined_call_operand.<no memory space> [shape: f32[1,1], index: 5, kind: input, shape index: {}]   ;;  %s4492_s6 = inlined_call_operand.vmem [shape: f32[32,256], index: 6, kind: input, shape index: {}]   ;;  %s4493_s7 = inlined_call_operand.vmem [shape: f32[1,64,256], index: 7, kind: input, shape index: {}]   ;;  %s4494_s8 = inlined_call_operand.hbm [shape: f32[2,64,256], index: 8, kind: input, shape index: {}]   ;;  %s4495_s9 = inlined_call_operand.vmem [shape: f32[2,1,256], index: 9, kind: input, shape index: {}]   ;;  %s4496_s10 = inlined_call_operand.vmem [shape: f32[8,1], index: 10, kind: output, shape index: {0}]   ;;  %s4497_s11 = inlined_call_operand.hbm [shape: f32[4,8,32], index: 11, kind: output, shape index: {1}]   ;;  %s4498_s12 = inlined_call_operand.hbm [shape: f32[4,8,32], index: 12, kind: output, shape index: {2}]  }
   0x1   :  { %v18_v0 = vstv %s4491_s5 }
   0x2   :  { %19 = vst [vmem:[#allocation4] sm:$0x1] %v18_v0 }
   0x3   :  { %20 = vsyncpa [#allocation6], 0 }
   0x4   :  { %21 = vsyncpa [#allocation7], 0 }
   0x5   :  { %22 = vsyncpa [#allocation10], 0  ;;  %s3449_s23 = smov [#allocation5]  }
   0x6   :  { %s44_s24 = sshll.u32 %s3449_s23, 4  ;;  %s45_s24 = int_to_ptr.vmem [resolvable:$true] %s44_s24 }
   0x7   :  { %s3391_s25 = scalar_lea.vmem %s45_s24, 4096  ;;  %p3396_p1 = scmp.lt.s32.totalorder %s45_s24, %s45_s24 }
   0x8   :  { %p3392_p0 = scmp.ne.s32.totalorder %s45_s24, %s3391_s25  ;;  %p3397_p2 = scmp.lt.s32.totalorder %s3391_s25, %s3391_s25 }
   0xa   :  { %p3398_p3 = por %p3397_p2, %p3396_p1 }
   0xc   :  { %p3399_p4 = pnand %p3398_p3, %p3392_p0 }
   0xe   :  { %3402 = shalt.err (!%p3399_p4)
}
   0xf   :  { %s3450_s26 = smov 256   ;;  %s3451_s27 = smov 16  }
  0x10   :  { %50 = dma.hbm_to_vmem [thread:$0]  %s4494_s8, 4096, %s45_s24, [#allocation6], %s3450_s26, %s3450_s26, %s3451_s27  }
  0x11   :  { %3443 = dma.done.wait [#allocation6], 4096  }
  0x12   :  { %3444 = vsyncadd [#allocation6], 4294963200  ;;  %v3452_v1 = vmov 0   ;;  %v58_v2 = vld [vmem:[%s4486_s0 + $0x10] sm:$0xff]  ;;  %v56_v3 = vld [vmem:[%s4486_s0] sm:$0xff]  ;;  %v64_v32 = vlaneseq  ;;  %v3453_v36 = vmov 1.0  }
  0x13   :  { %3122 = vset.pattern.permute.xlu1 %v3452_v1  ;;  %3121 = vset.pattern.permute.xlu0 %v3452_v1  ;;  %v59_v4 = vld [vmem:[%s4486_s0 + $0x18] sm:$0xff]  ;;  %v57_v5 = vld [vmem:[%s4486_s0 + $0x8] sm:$0xff]  ;;  %v128_v7 = vld [vmem:[%s4487_s1 + $0x70] sm:$0xff]  ;;  %v3454_v45 = vmov 0.0   ;;  %vm255_vm8 = vcmask 261120   ;;  %vm427_vm9 = vcmask 523264  }
  0x14   :  { %73 = vperm.xlu1 %3122, %v58_v2   ;;  %67 = vperm.xlu0 %3121, %v56_v3   ;;  %v129_v6 = vld [vmem:[%s4487_s1 + $0x78] sm:$0xff]  ;;  %v127_v8 = vld [vmem:[%s4487_s1 + $0x68] sm:$0xff]  ;;  %v60_v10 = vld [vmem:[%s4486_s0 + $0x20] sm:$0xff]  ;;  %v65_v33 = vand.u32 127, %v64_v32  ;;  %s3455_s15 = smov 32   ;;  %s3456_s17 = smov 64  }
  0x15   :  { %3064 = vmatprep.subr.mxu0 %v129_v6  ;;  %v61_v9 = vld [vmem:[%s4486_s0 + $0x28] sm:$0xff]  ;;  %v126_v11 = vld [vmem:[%s4487_s1 + $0x60] sm:$0xff]  ;;  %v63_v12 = vld [vmem:[%s4486_s0 + $0x38] sm:$0xff]  ;;  %344 = vmatprep.mubr.f32.mxu1 %v3454_v45  ;;  %s3457_s18 = smov 96   ;;  %vm574_vm10 = vcmask 523520  }
  0x16   :  { %3065 = vmatpush3.msra.mxu0 %v129_v6  ;;  %v62_v13 = vld [vmem:[%s4486_s0 + $0x30] sm:$0xff]  ;;  %v125_v14 = vld [vmem:[%s4487_s1 + $0x58] sm:$0xff]  ;;  %v240_v18 = vld [vmem:[%s4492_s6 + $0x28] sm:$0xff] }
  0x17   :  { %3066 = vmatprep.subr.mxu0 %v128_v7  ;;  %v124_v15 = vld [vmem:[%s4487_s1 + $0x50] sm:$0xff]  ;;  %v242_v16 = vld [vmem:[%s4492_s6 + $0x38] sm:$0xff]  ;;  %v123_v19 = vld [vmem:[%s4487_s1 + $0x48] sm:$0xff] }
  0x18   :  { %76 = vperm.xlu1 %3122, %v59_v4   ;;  %70 = vperm.xlu0 %3121, %v57_v5   ;;  %v241_v17 = vld [vmem:[%s4492_s6 + $0x30] sm:$0xff]  ;;  %v239_v20 = vld [vmem:[%s4492_s6 + $0x20] sm:$0xff]  ;;  %v238_v21 = vld [vmem:[%s4492_s6 + $0x18] sm:$0xff] }
  0x19   :  { %3067 = vmatpush3.msra.mxu0 %v128_v7  ;;  %304 = vmatprep.subr.mxu1 %v242_v16  ;;  %v122_v22 = vld [vmem:[%s4487_s1 + $0x40] sm:$0xff]  ;;  %v237_v23 = vld [vmem:[%s4492_s6 + $0x10] sm:$0xff]  ;;  %v121_v24 = vld [vmem:[%s4487_s1 + $0x38] sm:$0xff]  ;;  %v3736_v7 = vshrl.u32 %v64_v32, 7 }
  0x1a   :  { %3068 = vmatprep.subr.mxu0 %v127_v8  ;;  %305 = vmatpush1.msra.mxu1 %v241_v17  ;;  %v120_v25 = vld [vmem:[%s4487_s1 + $0x30] sm:$0xff]  ;;  %v119_v26 = vld [vmem:[%s4487_s1 + $0x28] sm:$0xff]  ;;  %v118_v27 = vld [vmem:[%s4487_s1 + $0x20] sm:$0xff] }
  0x1b   :  { %3069 = vmatpush3.msra.mxu0 %v127_v8  ;;  %306 = vmatprep.subr.mxu1 %v240_v18  ;;  %v117_v28 = vld [vmem:[%s4487_s1 + $0x18] sm:$0xff]  ;;  %v116_v29 = vld [vmem:[%s4487_s1 + $0x10] sm:$0xff]  ;;  %v115_v30 = vld [vmem:[%s4487_s1 + $0x8] sm:$0xff]  ;;  %v251_v8 = vsub.s32 1, %v3736_v7 }
  0x1c   :  { %82 = vperm.xlu1 %3122, %v61_v9   ;;  %79 = vperm.xlu0 %3121, %v60_v10   ;;  %v114_v31 = vld [vmem:[%s4487_s1] sm:$0xff]  ;;  %v236_v43 = vld [vmem:[%s4492_s6 + $0x8] sm:$0xff]  ;;  %v3634_v47 = vld [vmem:[#allocation5 + $0x70] sm:$0xff]  ;;  %v247_v10 = vsub.s32 0, %v3736_v7 }
  0x1d   :  { %3070 = vmatprep.subr.mxu0 %v126_v11  ;;  %307 = vmatpush1.msra.mxu1 %v239_v20  ;;  %v235_v44 = vld [vmem:[%s4492_s6] sm:$0xff]  ;;  %v3639_v48 = vld [vmem:[#allocation5 + $0x68] sm:$0xff]  ;;  %v3647_v51 = vld [vmem:[#allocation5 + $0x50] sm:$0xff] }
  0x1e   :  { %3071 = vmatpush3.msra.mxu0 %v126_v11  ;;  %308 = vmatprep.subr.mxu1 %v238_v21  ;;  %v3631_v46 = vld [vmem:[#allocation5 + $0x78] sm:$0xff]  ;;  %v3641_v49 = vld [vmem:[#allocation5 + $0x60] sm:$0xff]  ;;  %v3651_v52 = vld [vmem:[#allocation5 + $0x48] sm:$0xff] }
  0x1f   :  { %3072 = vmatprep.subr.mxu0 %v125_v14  ;;  %309 = vmatpush1.msra.mxu1 %v237_v23  ;;  %v3645_v50 = vld [vmem:[#allocation5 + $0x58] sm:$0xff]  ;;  %v3653_v53 = vld [vmem:[#allocation5 + $0x40] sm:$0xff]  ;;  %v3660_v55 = vld [vmem:[#allocation5 + $0x30] sm:$0xff] }
  0x20   :  { %88 = vperm.xlu1 %3122, %v63_v12   ;;  %85 = vperm.xlu0 %3121, %v62_v13   ;;  %v3656_v54 = vld [vmem:[#allocation5 + $0x38] sm:$0xff]  ;;  %v3662_v56 = vld [vmem:[#allocation5 + $0x28] sm:$0xff]  ;;  %v3666_v57 = vld [vmem:[#allocation5 + $0x20] sm:$0xff] }
  0x21   :  { %3073 = vmatpush3.msra.mxu0 %v125_v14  ;;  %310 = vmatprep.subr.mxu1 %v236_v43  ;;  %v3668_v58 = vld [vmem:[#allocation5 + $0x18] sm:$0xff]  ;;  %v3672_v59 = vld [vmem:[#allocation5 + $0x10] sm:$0xff]  ;;  %v3674_v60 = vld [vmem:[#allocation5 + $0x8] sm:$0xff] }
  0x22   :  { %3074 = vmatprep.subr.mxu0 %v124_v15  ;;  %311 = vmatpush1.msra.mxu1 %v235_v44  ;;  %v3678_v61 = vld [vmem:[#allocation5] sm:$0xff] }
  0x23   :  { %3075 = vmatpush3.msra.mxu0 %v124_v15  ;;  %447 = vmatprep.subr.mxu1 %v3631_v46  ;;  %v426_v6 = vld [vmem:[%s4488_s2] sm:$0xff] }
  0x24   :  { %3076 = vmatprep.subr.mxu0 %v123_v19  ;;  %v243_v9 = vld [vmem:[%s4495_s9] sm:$0x3] }
  0x25   :  { %3077 = vmatpush3.msra.mxu0 %v123_v19  ;;  %v252_v11 = vrot.slane %v243_v9, %v251_v8  ;;  %v248_v14 = vrot.slane %v243_v9, %v247_v10 }
  0x26   :  { %3078 = vmatprep.subr.mxu0 %v122_v22 }
  0x27   :  { %3079 = vmatpush3.msra.mxu0 %v122_v22 }
  0x28   :  { %3080 = vmatprep.subr.mxu0 %v121_v24 }
  0x29   :  { %3081 = vmatpush3.msra.mxu0 %v121_v24 }
  0x2a   :  { %3082 = vmatprep.subr.mxu0 %v120_v25 }
  0x2b   :  { %3083 = vmatpush3.msra.mxu0 %v120_v25 }
  0x2c   :  { %3084 = vmatprep.subr.mxu0 %v119_v26 }
  0x2d   :  { %3085 = vmatpush3.msra.mxu0 %v119_v26 }
  0x2e   :  { %3086 = vmatprep.subr.mxu0 %v118_v27 }
  0x2f   :  { %3087 = vmatpush3.msra.mxu0 %v118_v27 }
  0x30   :  { %3088 = vmatprep.subr.mxu0 %v117_v28 }
  0x31   :  { %3089 = vmatpush3.msra.mxu0 %v117_v28 }
  0x32   :  { %3090 = vmatprep.subr.mxu0 %v116_v29 }
  0x33   :  { %3091 = vmatpush3.msra.mxu0 %v116_v29 }
  0x34   :  { %3092 = vmatprep.subr.mxu0 %v115_v30 }
  0x35   :  { %3093 = vmatpush3.msra.mxu0 %v115_v30 }
  0x36   :  { %3094 = vmatprep.subr.mxu0 %v114_v31 }
  0x37   :  { %3095 = vmatpush3.msra.mxu0 %v114_v31 }
  0x38   :  { %596 = vmatprep.subr.mxu0 %v3631_v46 }
  0x8f   :  { %v74_v34 = vpop.permute.xlu1 %73  ;;  %v68_v35 = vpop.permute.xlu0 %67 }
  0x90   :  { %vm90_vm0 = vcmp.eq.s32.totalorder %v68_v35, %v65_v33  ;;  %vm92_vm1 = vcmp.eq.s32.totalorder %v74_v34, %v65_v33 }
  0x91   :  { %3096 = vmatprep.mubr.msk.f32.mxu0 %vm90_vm0, %v3453_v36 }
  0x93   :  { %v77_v37 = vpop.permute.xlu1 %76  ;;  %v71_v38 = vpop.permute.xlu0 %70 }
  0x94   :  { %vm91_vm2 = vcmp.eq.s32.totalorder %v71_v38, %v65_v33  ;;  %vm93_vm3 = vcmp.eq.s32.totalorder %v77_v37, %v65_v33 }
  0x95   :  { %3097 = vmatmul.mubr.msk.f32.vlgmr.msra.gmra.mxu0 %vm91_vm2, %v3453_v36 }
  0x96   :  { %3099 = vmatprep.mubr.msk.f32.mxu0 %vm92_vm1, %v3453_v36  ;;  %597 = vmatpush1.msra.mxu0 %v3634_v47 }
  0x97   :  { %v83_v39 = vpop.permute.xlu1 %82  ;;  %v80_v40 = vpop.permute.xlu0 %79  ;;  %598 = vmatprep.subr.mxu0 %v3639_v48 }
  0x98   :  { %vm94_vm4 = vcmp.eq.s32.totalorder %v80_v40, %v65_v33  ;;  %vm95_vm5 = vcmp.eq.s32.totalorder %v83_v39, %v65_v33  ;;  %599 = vmatpush1.msra.mxu0 %v3641_v49 }
  0x99   :  { %3100 = vmatmul.mubr.msk.f32.gmra.mxu0 %vm93_vm3, %v3453_v36  ;;  %600 = vmatprep.subr.mxu0 %v3645_v50 }
  0x9a   :  { %3102 = vmatprep.mubr.msk.f32.mxu0 %vm94_vm4, %v3453_v36  ;;  %601 = vmatpush1.msra.mxu0 %v3647_v51 }
  0x9b   :  { %v86_v41 = vpop.permute.xlu0 %85  ;;  %v89_v42 = vpop.permute.xlu1 %88  ;;  %602 = vmatprep.subr.mxu0 %v3651_v52 }
  0x9c   :  { %vm96_vm6 = vcmp.eq.s32.totalorder %v86_v41, %v65_v33  ;;  %vm97_vm7 = vcmp.eq.s32.totalorder %v89_v42, %v65_v33  ;;  %603 = vmatpush1.msra.mxu0 %v3653_v53 }
  0x9d   :  { %3103 = vmatmul.mubr.msk.f32.gmra.mxu0 %vm95_vm5, %v3453_v36  ;;  %604 = vmatprep.subr.mxu0 %v3656_v54 }
  0x9e   :  { %3105 = vmatprep.mubr.msk.f32.mxu0 %vm96_vm6, %v3453_v36  ;;  %605 = vmatpush1.msra.mxu0 %v3660_v55 }
  0x9f   :  { %606 = vmatprep.subr.mxu0 %v3662_v56 }
  0xa0   :  { %607 = vmatpush1.msra.mxu0 %v3666_v57 }
  0xa1   :  { %3106 = vmatmul.mubr.msk.f32.gmra.mxu0 %vm97_vm7, %v3453_v36  ;;  %608 = vmatprep.subr.mxu0 %v3668_v58 }
  0xa2   :  { %644 = vmatprep.mubr.f32.mxu0 %v3454_v45  ;;  %609 = vmatpush1.msra.mxu0 %v3672_v59 }
  0xa3   :  { %610 = vmatprep.subr.mxu0 %v3674_v60 }
  0xa4   :  { %611 = vmatpush1.msra.mxu0 %v3678_v61 }
  0xa5   :  { %886 = vmatprep.subr.mxu0 %v3631_v46 }
 0x155   :  { %v3098_v62 = vpop.f32.mrf.mxu0 }
 0x157   :  { %v196_v63 = vpop.f32.mrf.mxu0 }
 0x158   :  { %3003 = vmatmul.mubr.msk.f32.vlgmr.msra.gmra.mxu1 %vm255_vm8, %v196_v63 }
 0x159   :  { %448 = vmatpush1.msra.mxu1 %v3634_v47  ;;  %350 = vmatprep.mubr.f32.mxu1 %v3454_v45  ;;  %v3101_v0 = vpop.f32.mrf.mxu0 }
 0x15a   :  { %449 = vmatprep.subr.mxu1 %v3639_v48 }
 0x15b   :  { %450 = vmatpush1.msra.mxu1 %v3641_v49  ;;  %v206_v1 = vpop.f32.mrf.mxu0 }
 0x15c   :  { %3004 = vmatmul.mubr.msk.f32.gmra.mxu1 %vm255_vm8, %v3098_v62  ;;  %451 = vmatprep.subr.mxu1 %v3645_v50 }
 0x15d   :  { %356 = vmatprep.mubr.f32.mxu1 %v3454_v45  ;;  %452 = vmatpush1.msra.mxu1 %v3647_v51  ;;  %v3104_v2 = vpop.f32.mrf.mxu0 }
 0x15e   :  { %453 = vmatprep.subr.mxu1 %v3651_v52 }
 0x15f   :  { %454 = vmatpush1.msra.mxu1 %v3653_v53  ;;  %v216_v3 = vpop.f32.mrf.mxu0 }
 0x160   :  { %3005 = vmatmul.mubr.msk.f32.gmra.mxu1 %vm255_vm8, %v206_v1  ;;  %455 = vmatprep.subr.mxu1 %v3656_v54 }
 0x161   :  { %362 = vmatprep.mubr.f32.mxu1 %v3454_v45  ;;  %456 = vmatpush1.msra.mxu1 %v3660_v55  ;;  %v3107_v4 = vpop.f32.mrf.mxu0 }
 0x162   :  { %457 = vmatprep.subr.mxu1 %v3662_v56 }
 0x163   :  { %458 = vmatpush1.msra.mxu1 %v3666_v57  ;;  %v226_v5 = vpop.f32.mrf.mxu0 }
 0x164   :  { %3006 = vmatmul.mubr.msk.f32.gmra.mxu1 %vm255_vm8, %v3101_v0  ;;  %459 = vmatprep.subr.mxu1 %v3668_v58 }
 0x165   :  { %368 = vmatprep.mubr.f32.mxu1 %v3454_v45  ;;  %460 = vmatpush1.msra.mxu1 %v3672_v59 }
 0x166   :  { %461 = vmatprep.subr.mxu1 %v3674_v60 }
 0x167   :  { %462 = vmatpush1.msra.mxu1 %v3678_v61 }
 0x168   :  { %3007 = vmatmul.mubr.msk.f32.gmra.mxu1 %vm255_vm8, %v216_v3  ;;  %741 = vmatprep.subr.mxu1 %v3631_v46 }
 0x169   :  { %374 = vmatprep.mubr.f32.mxu1 %v3454_v45 }
 0x16c   :  { %3008 = vmatmul.mubr.msk.f32.gmra.mxu1 %vm255_vm8, %v3104_v2 }
 0x16d   :  { %380 = vmatprep.mubr.f32.mxu1 %v3454_v45 }
 0x170   :  { %3009 = vmatmul.mubr.msk.f32.gmra.mxu1 %vm255_vm8, %v226_v5 }
 0x171   :  { %386 = vmatprep.mubr.f32.mxu1 %v3454_v45 }
 0x174   :  { %3010 = vmatmul.mubr.msk.f32.gmra.mxu1 %vm255_vm8, %v3107_v4  ;;  %v425_v4 = vld [vmem:[%s4489_s3] sm:$0xff] }
 0x175   :  { %495 = vmatprep.mubr.f32.mxu1 %v3454_v45 }
 0x178   :  { %3011 = vmatmul.mubr.msk.f32.vlgmr.msra.gmra.mxu1 %vm427_vm9, %v426_v6 }
 0x179   :  { %742 = vmatpush1.msra.mxu1 %v3634_v47  ;;  %789 = vmatprep.mubr.f32.mxu1 %v3454_v45 }
 0x17a   :  { %743 = vmatprep.subr.mxu1 %v3639_v48 }
 0x17b   :  { %744 = vmatpush1.msra.mxu1 %v3641_v49 }
 0x17c   :  { %745 = vmatprep.subr.mxu1 %v3645_v50 }
 0x17d   :  { %746 = vmatpush1.msra.mxu1 %v3647_v51 }
 0x17e   :  { %747 = vmatprep.subr.mxu1 %v3651_v52 }
 0x17f   :  { %748 = vmatpush1.msra.mxu1 %v3653_v53 }
 0x180   :  { %749 = vmatprep.subr.mxu1 %v3656_v54 }
 0x181   :  { %750 = vmatpush1.msra.mxu1 %v3660_v55 }
 0x182   :  { %751 = vmatprep.subr.mxu1 %v3662_v56 }
 0x183   :  { %752 = vmatpush1.msra.mxu1 %v3666_v57 }
 0x184   :  { %753 = vmatprep.subr.mxu1 %v3668_v58 }
 0x185   :  { %754 = vmatpush1.msra.mxu1 %v3672_v59 }
 0x186   :  { %755 = vmatprep.subr.mxu1 %v3674_v60 }
 0x187   :  { %756 = vmatpush1.msra.mxu1 %v3678_v61 }
 0x188   :  { %1031 = vmatprep.subr.mxu1 %v3631_v46 }
 0x218   :  { %v346_v12 = vpop.f32.mrf.mxu1 }
 0x219   :  { %v347_v43 = vadd.f32 %v346_v12, %v248_v14 }
 0x21a   :  { %v348_v13 = vpop.f32.mrf.mxu1 }
 0x21b   :  { %v3747_v15 = vadd.f32 %v348_v13, %v252_v11 }
 0x21c   :  { %v352_v16 = vpop.f32.mrf.mxu1 }
 0x21d   :  { %v3749_v17 = vadd.f32 %v352_v16, %v248_v14 }
 0x21e   :  { %v354_v18 = vpop.f32.mrf.mxu1 }
 0x21f   :  { %v3751_v19 = vadd.f32 %v354_v18, %v252_v11 }
 0x220   :  { %v358_v20 = vpop.f32.mrf.mxu1 }
 0x221   :  { %v3753_v21 = vadd.f32 %v358_v20, %v248_v14 }
 0x222   :  { %v360_v22 = vpop.f32.mrf.mxu1 }
 0x223   :  { %v3755_v23 = vadd.f32 %v360_v22, %v252_v11 }
 0x224   :  { %v364_v24 = vpop.f32.mrf.mxu1 }
 0x225   :  { %v3757_v25 = vadd.f32 %v364_v24, %v248_v14 }
 0x226   :  { %v366_v26 = vpop.f32.mrf.mxu1 }
 0x227   :  { %v3759_v27 = vadd.f32 %v366_v26, %v252_v11 }
 0x228   :  { %v370_v28 = vpop.f32.mrf.mxu1 }
 0x229   :  { %v3761_v29 = vadd.f32 %v370_v28, %v248_v14 }
 0x22a   :  { %v372_v30 = vpop.f32.mrf.mxu1 }
 0x22b   :  { %v3763_v31 = vadd.f32 %v372_v30, %v252_v11 }
 0x22c   :  { %v376_v32 = vpop.f32.mrf.mxu1 }
 0x22d   :  { %v3765_v33 = vadd.f32 %v376_v32, %v248_v14 }
 0x22e   :  { %v378_v34 = vpop.f32.mrf.mxu1 }
 0x22f   :  { %v3767_v35 = vadd.f32 %v378_v34, %v252_v11 }
 0x230   :  { %v382_v36 = vpop.f32.mrf.mxu1 }
 0x231   :  { %v3769_v37 = vadd.f32 %v382_v36, %v248_v14 }
 0x232   :  { %v384_v38 = vpop.f32.mrf.mxu1 }
 0x233   :  { %v3771_v39 = vadd.f32 %v384_v38, %v252_v11 }
 0x234   :  { %v388_v40 = vpop.f32.mrf.mxu1 }
 0x235   :  { %v3773_v41 = vadd.f32 %v388_v40, %v248_v14 }
 0x236   :  { %v390_v42 = vpop.f32.mrf.mxu1 }
 0x237   :  { %v391_v62 = vadd.f32 %v390_v42, %v252_v11 }
 0x238   :  { %v497_v44 = vpop.f32.mrf.mxu1 }
 0x239   :  { %v506_v63 = vadd.f32 %v497_v44, %v347_v43 }
 0x23a   :  { %v499_v0 = vpop.f32.mrf.mxu1 }
 0x23b   :  { %3123 = vtanh.f32 %v506_v63  ;;  %v511_v1 = vadd.f32 %v499_v0, %v391_v62  ;;  %v512_v5 = vsub.f32 0.0, %v506_v63 }
 0x23d   :  { %3125 = vtanh.f32 %v511_v1  ;;  %v519_v6 = vsub.f32 0.0, %v511_v1  ;;  %v513_v9 = vmul.f32 1.442695, %v512_v5 }
 0x23f   :  { %v520_v11 = vmul.f32 1.442695, %v519_v6  ;;  %3127 = vpow2.f32 %v513_v9 }
 0x241   :  { %3129 = vpow2.f32 %v520_v11 }
 0x248   :  { %v3124_v2 = vpop.eup %3123 }
 0x249   :  { %532 = vrot.lane.b32.xlu0 %v3124_v2, %s3455_s15 }
 0x24a   :  { %v3126_v3 = vpop.eup %3125 }
 0x24b   :  { %543 = vrot.lane.b32.xlu1 %v3126_v3, %s3455_s15 }
 0x24c   :  { %v3128_v12 = vpop.eup %3127 }
 0x24d   :  { %527 = vrot.lane.b32.xlu0 %v425_v4, %s3455_s15  ;;  %v515_v14 = vadd.f32 1.0, %v3128_v12 }
 0x24e   :  { %v3130_v13 = vpop.eup %3129 }
 0x24f   :  { %v522_v16 = vadd.f32 1.0, %v3130_v13  ;;  %3131 = vrcp.f32 %v515_v14 }
 0x251   :  { %3133 = vrcp.f32 %v522_v16 }
 0x25c   :  { %v3132_v18 = vpop.eup %3131 }
 0x25e   :  { %v3134_v24 = vpop.eup %3133 }
 0x25f   :  { %v541_v36 = vmul.f32 %v3134_v24, %v425_v4 }
 0x2bb   :  { %v533_v20 = vpop.permute.xlu0 %532 }
 0x2bc   :  { %v535_v22 = vmul.f32 %v3132_v18, %v533_v20 }
 0x2bd   :  { %v544_v26 = vpop.permute.xlu1 %543 }
 0x2be   :  { %v546_v28 = vmul.f32 %v3134_v24, %v544_v26  ;;  %537 = vrot.lane.b32.xlu1 %v535_v22, %s3455_s15 }
 0x2bf   :  { %v528_v30 = vpop.permute.xlu0 %527 }
 0x2c0   :  { %548 = vrot.lane.b32.xlu0 %v546_v28, %s3455_s15  ;;  %v530_v32 = vmul.f32 %v3132_v18, %v528_v30 }
 0x330   :  { %v538_v34 = vpop.permute.xlu1 %537 }
 0x331   :  { %v3783_v38 = vadd.f32 %v538_v34, %v530_v32 }
 0x332   :  { %v549_v40 = vpop.permute.xlu0 %548 }
 0x333   :  { %3135 = vtanh.f32 %v3783_v38  ;;  %v3786_v42 = vadd.f32 %v549_v40, %v541_v36 }
 0x335   :  { %3137 = vtanh.f32 %v3786_v42 }
 0x340   :  { %v3136_v43 = vpop.eup %3135 }
 0x341   :  { %554 = vrot.lane.b32.xlu1 %v3136_v43, %s3455_s15 }
 0x342   :  { %v3138_v44 = vpop.eup %3137 }
 0x343   :  { %560 = vrot.lane.b32.xlu0 %v3138_v44, %s3455_s15 }
 0x3b3   :  { %v555_v62 = vpop.permute.xlu1 %554 }
 0x3b4   :  { %v557_v63 = vmul.f32 %v3132_v18, %v555_v62 }
 0x3b5   :  { %v561_v0 = vpop.permute.xlu0 %560 }
 0x3b6   :  { %v563_v1 = vmul.f32 %v3134_v24, %v561_v0  ;;  %565 = vrot.lane.b32.xlu1 %v557_v63, %s3456_s17 }
 0x3b8   :  { %570 = vrot.lane.b32.xlu0 %v563_v1, %s3457_s18 }
 0x428   :  { %v566_v2 = vpop.permute.xlu1 %565 }
 0x429   :  { %568 = vst.msk [vmem:[#allocation3] sm:$0xff] %vm255_vm8, %v566_v2 }
 0x42a   :  { %v571_v3 = vpop.permute.xlu0 %570 }
 0x42b   :  { %575 = vst.msk [vmem:[#allocation3 + $0x38] sm:$0xff] %vm574_vm10, %v571_v3  ;;  %v576_v4 = vsel %vm255_vm8, %v566_v2, %v571_v3 }
 0x42c   :  { %3012 = vmatmul.mubr.msk.f32.vlgmr.msra.gmra.mxu0 %vm427_vm9, %v576_v4 }
 0x42d   :  { %887 = vmatpush1.msra.mxu0 %v3634_v47  ;;  %934 = vmatprep.mubr.f32.mxu0 %v3454_v45 }
 0x42e   :  { %888 = vmatprep.subr.mxu0 %v3639_v48 }
 0x42f   :  { %889 = vmatpush1.msra.mxu0 %v3641_v49 }
 0x430   :  { %890 = vmatprep.subr.mxu0 %v3645_v50 }
 0x431   :  { %891 = vmatpush1.msra.mxu0 %v3647_v51 }
 0x432   :  { %892 = vmatprep.subr.mxu0 %v3651_v52 }
 0x433   :  { %893 = vmatpush1.msra.mxu0 %v3653_v53 }
 0x434   :  { %894 = vmatprep.subr.mxu0 %v3656_v54 }
 0x435   :  { %895 = vmatpush1.msra.mxu0 %v3660_v55 }
 0x436   :  { %896 = vmatprep.subr.mxu0 %v3662_v56 }
 0x437   :  { %897 = vmatpush1.msra.mxu0 %v3666_v57 }
 0x438   :  { %898 = vmatprep.subr.mxu0 %v3668_v58 }
 0x439   :  { %899 = vmatpush1.msra.mxu0 %v3672_v59 }
 0x43a   :  { %900 = vmatprep.subr.mxu0 %v3674_v60 }
 0x43b   :  { %901 = vmatpush1.msra.mxu0 %v3678_v61 }
 0x43c   :  { %1168 = vmatprep.subr.mxu0 %v3631_v46 }
 0x4ec   :  { %v646_v5 = vpop.f32.mrf.mxu0 }
 0x4ed   :  { %v655_v6 = vadd.f32 %v646_v5, %v3749_v17 }
 0x4ee   :  { %v648_v9 = vpop.f32.mrf.mxu0 }
 0x4ef   :  { %3139 = vtanh.f32 %v655_v6  ;;  %v660_v11 = vadd.f32 %v648_v9, %v3771_v39  ;;  %v661_v14 = vsub.f32 0.0, %v655_v6 }
 0x4f1   :  { %3141 = vtanh.f32 %v660_v11  ;;  %v668_v16 = vsub.f32 0.0, %v660_v11  ;;  %v662_v18 = vmul.f32 1.442695, %v661_v14 }
 0x4f3   :  { %v669_v20 = vmul.f32 1.442695, %v668_v16  ;;  %3143 = vpow2.f32 %v662_v18 }
 0x4f5   :  { %3145 = vpow2.f32 %v669_v20 }
 0x4fc   :  { %v3140_v12 = vpop.eup %3139 }
 0x4fd   :  { %677 = vrot.lane.b32.xlu1 %v3140_v12, %s3455_s15 }
 0x4fe   :  { %v3142_v13 = vpop.eup %3141 }
 0x4ff   :  { %688 = vrot.lane.b32.xlu0 %v3142_v13, %s3455_s15 }
 0x500   :  { %v3144_v22 = vpop.eup %3143 }
 0x501   :  { %v664_v17 = vadd.f32 1.0, %v3144_v22 }
 0x502   :  { %v3146_v24 = vpop.eup %3145 }
 0x503   :  { %v671_v26 = vadd.f32 1.0, %v3146_v24  ;;  %3147 = vrcp.f32 %v664_v17 }
 0x505   :  { %3149 = vrcp.f32 %v671_v26 }
 0x510   :  { %v3148_v39 = vpop.eup %3147 }
 0x511   :  { %v675_v40 = vmul.f32 %v3148_v39, %v3783_v38 }
 0x512   :  { %v3150_v32 = vpop.eup %3149 }
 0x513   :  { %v686_v62 = vmul.f32 %v3150_v32, %v3786_v42 }
 0x56f   :  { %v678_v28 = vpop.permute.xlu1 %677 }
 0x570   :  { %v680_v30 = vmul.f32 %v3148_v39, %v678_v28 }
 0x571   :  { %v689_v34 = vpop.permute.xlu0 %688 }
 0x572   :  { %v691_v36 = vmul.f32 %v3150_v32, %v689_v34  ;;  %682 = vrot.lane.b32.xlu1 %v680_v30, %s3455_s15 }
 0x574   :  { %693 = vrot.lane.b32.xlu0 %v691_v36, %s3455_s15 }
 0x5e4   :  { %v683_v43 = vpop.permute.xlu1 %682 }
 0x5e5   :  { %v3821_v44 = vadd.f32 %v683_v43, %v675_v40 }
 0x5e6   :  { %v694_v63 = vpop.permute.xlu0 %693 }
 0x5e7   :  { %3151 = vtanh.f32 %v3821_v44  ;;  %v3825_v0 = vadd.f32 %v694_v63, %v686_v62 }
 0x5e9   :  { %3153 = vtanh.f32 %v3825_v0 }
 0x5f4   :  { %v3152_v1 = vpop.eup %3151 }
 0x5f5   :  { %699 = vrot.lane.b32.xlu1 %v3152_v1, %s3455_s15 }
 0x5f6   :  { %v3154_v2 = vpop.eup %3153 }
 0x5f7   :  { %705 = vrot.lane.b32.xlu0 %v3154_v2, %s3455_s15 }
 0x667   :  { %v700_v3 = vpop.permute.xlu1 %699 }
 0x668   :  { %v702_v38 = vmul.f32 %v3148_v39, %v700_v3 }
 0x669   :  { %v706_v4 = vpop.permute.xlu0 %705 }
 0x66a   :  { %v708_v5 = vmul.f32 %v3150_v32, %v706_v4  ;;  %710 = vrot.lane.b32.xlu1 %v702_v38, %s3456_s17 }
 0x66c   :  { %716 = vrot.lane.b32.xlu0 %v708_v5, %s3457_s18 }
 0x6dc   :  { %v711_v42 = vpop.permute.xlu1 %710 }
 0x6dd   :  { %714 = vst.msk [vmem:[#allocation3 + $0x8] sm:$0xff] %vm255_vm8, %v711_v42 }
 0x6de   :  { %v717_v6 = vpop.permute.xlu0 %716 }
 0x6df   :  { %720 = vst.msk [vmem:[#allocation3 + $0x30] sm:$0xff] %vm574_vm10, %v717_v6  ;;  %v721_v9 = vsel %vm255_vm8, %v711_v42, %v717_v6 }
 0x6e0   :  { %3013 = vmatmul.mubr.msk.f32.vlgmr.msra.gmra.mxu1 %vm427_vm9, %v721_v9 }
 0x6e1   :  { %1032 = vmatpush1.msra.mxu1 %v3634_v47  ;;  %1079 = vmatprep.mubr.f32.mxu1 %v3454_v45 }
 0x6e2   :  { %1033 = vmatprep.subr.mxu1 %v3639_v48 }
 0x6e3   :  { %1034 = vmatpush1.msra.mxu1 %v3641_v49 }
 0x6e4   :  { %1035 = vmatprep.subr.mxu1 %v3645_v50 }
 0x6e5   :  { %1036 = vmatpush1.msra.mxu1 %v3647_v51 }
 0x6e6   :  { %1037 = vmatprep.subr.mxu1 %v3651_v52 }
 0x6e7   :  { %1038 = vmatpush1.msra.mxu1 %v3653_v53 }
 0x6e8   :  { %1039 = vmatprep.subr.mxu1 %v3656_v54 }
 0x6e9   :  { %1040 = vmatpush1.msra.mxu1 %v3660_v55 }
 0x6ea   :  { %1041 = vmatprep.subr.mxu1 %v3662_v56 }
 0x6eb   :  { %1042 = vmatpush1.msra.mxu1 %v3666_v57 }
 0x6ec   :  { %1043 = vmatprep.subr.mxu1 %v3668_v58 }
 0x6ed   :  { %1044 = vmatpush1.msra.mxu1 %v3672_v59 }
 0x6ee   :  { %1045 = vmatprep.subr.mxu1 %v3674_v60 }
 0x6ef   :  { %1046 = vmatpush1.msra.mxu1 %v3678_v61 }
 0x6f0   :  { %1305 = vmatprep.subr.mxu1 %v3631_v46 }
 0x7a0   :  { %v791_v11 = vpop.f32.mrf.mxu1 }
 0x7a1   :  { %v800_v12 = vadd.f32 %v791_v11, %v3753_v21 }
 0x7a2   :  { %v793_v13 = vpop.f32.mrf.mxu1 }
 0x7a3   :  { %3155 = vtanh.f32 %v800_v12  ;;  %v805_v14 = vadd.f32 %v793_v13, %v3767_v35  ;;  %v806_v20 = vsub.f32 0.0, %v800_v12 }
 0x7a5   :  { %3157 = vtanh.f32 %v805_v14  ;;  %v813_v22 = vsub.f32 0.0, %v805_v14  ;;  %v807_v24 = vmul.f32 1.442695, %v806_v20 }
 0x7a7   :  { %v814_v17 = vmul.f32 1.442695, %v813_v22  ;;  %3159 = vpow2.f32 %v807_v24 }
 0x7a9   :  { %3161 = vpow2.f32 %v814_v17 }
 0x7b0   :  { %v3156_v16 = vpop.eup %3155 }
 0x7b1   :  { %822 = vrot.lane.b32.xlu1 %v3156_v16, %s3455_s15 }
 0x7b2   :  { %v3158_v18 = vpop.eup %3157 }
 0x7b3   :  { %833 = vrot.lane.b32.xlu0 %v3158_v18, %s3455_s15 }
 0x7b4   :  { %v3160_v26 = vpop.eup %3159 }
 0x7b5   :  { %v809_v21 = vadd.f32 1.0, %v3160_v26 }
 0x7b6   :  { %v3162_v39 = vpop.eup %3161 }
 0x7b7   :  { %v816_v28 = vadd.f32 1.0, %v3162_v39  ;;  %3163 = vrcp.f32 %v809_v21 }
 0x7b9   :  { %3165 = vrcp.f32 %v816_v28 }
 0x7c4   :  { %v3164_v35 = vpop.eup %3163 }
 0x7c5   :  { %v820_v43 = vmul.f32 %v3164_v35, %v3821_v44 }
 0x7c6   :  { %v3166_v34 = vpop.eup %3165 }
 0x7c7   :  { %v831_v1 = vmul.f32 %v3166_v34, %v3825_v0 }
 0x823   :  { %v823_v30 = vpop.permute.xlu1 %822 }
 0x824   :  { %v825_v32 = vmul.f32 %v3164_v35, %v823_v30 }
 0x825   :  { %v834_v36 = vpop.permute.xlu0 %833 }
 0x826   :  { %v836_v40 = vmul.f32 %v3166_v34, %v834_v36  ;;  %827 = vrot.lane.b32.xlu1 %v825_v32, %s3455_s15 }
 0x828   :  { %838 = vrot.lane.b32.xlu0 %v836_v40, %s3455_s15 }
 0x898   :  { %v828_v62 = vpop.permute.xlu1 %827 }
 0x899   :  { %v3860_v63 = vadd.f32 %v828_v62, %v820_v43 }
 0x89a   :  { %v839_v2 = vpop.permute.xlu0 %838 }
 0x89b   :  { %3167 = vtanh.f32 %v3860_v63  ;;  %v3864_v3 = vadd.f32 %v839_v2, %v831_v1 }
 0x89d   :  { %3169 = vtanh.f32 %v3864_v3 }
 0x8a8   :  { %v3168_v38 = vpop.eup %3167 }
 0x8a9   :  { %844 = vrot.lane.b32.xlu1 %v3168_v38, %s3455_s15 }
 0x8aa   :  { %v3170_v4 = vpop.eup %3169 }
 0x8ab   :  { %850 = vrot.lane.b32.xlu0 %v3170_v4, %s3455_s15 }
 0x91b   :  { %v845_v5 = vpop.permute.xlu1 %844 }
 0x91c   :  { %v847_v44 = vmul.f32 %v3164_v35, %v845_v5 }
 0x91d   :  { %v851_v42 = vpop.permute.xlu0 %850 }
 0x91e   :  { %v853_v6 = vmul.f32 %v3166_v34, %v851_v42  ;;  %855 = vrot.lane.b32.xlu1 %v847_v44, %s3456_s17 }
 0x920   :  { %861 = vrot.lane.b32.xlu0 %v853_v6, %s3457_s18 }
 0x990   :  { %v856_v0 = vpop.permute.xlu1 %855 }
 0x991   :  { %859 = vst.msk [vmem:[#allocation3 + $0x10] sm:$0xff] %vm255_vm8, %v856_v0 }
 0x992   :  { %v862_v9 = vpop.permute.xlu0 %861 }
 0x993   :  { %865 = vst.msk [vmem:[#allocation3 + $0x28] sm:$0xff] %vm574_vm10, %v862_v9  ;;  %v866_v11 = vsel %vm255_vm8, %v856_v0, %v862_v9 }
 0x994   :  { %3014 = vmatmul.mubr.msk.f32.vlgmr.msra.gmra.mxu0 %vm427_vm9, %v866_v11 }
 0x995   :  { %1169 = vmatpush1.msra.mxu0 %v3634_v47  ;;  %1216 = vmatprep.mubr.f32.mxu0 %v3454_v45 }
 0x996   :  { %1170 = vmatprep.subr.mxu0 %v3639_v48 }
 0x997   :  { %1171 = vmatpush1.msra.mxu0 %v3641_v49 }
 0x998   :  { %1172 = vmatprep.subr.mxu0 %v3645_v50 }
 0x999   :  { %1173 = vmatpush1.msra.mxu0 %v3647_v51 }
 0x99a   :  { %1174 = vmatprep.subr.mxu0 %v3651_v52 }
 0x99b   :  { %1175 = vmatpush1.msra.mxu0 %v3653_v53 }
 0x99c   :  { %1176 = vmatprep.subr.mxu0 %v3656_v54 }
 0x99d   :  { %1177 = vmatpush1.msra.mxu0 %v3660_v55 }
 0x99e   :  { %1178 = vmatprep.subr.mxu0 %v3662_v56 }
 0x99f   :  { %1179 = vmatpush1.msra.mxu0 %v3666_v57 }
 0x9a0   :  { %1180 = vmatprep.subr.mxu0 %v3668_v58 }
 0x9a1   :  { %1181 = vmatpush1.msra.mxu0 %v3672_v59 }
 0x9a2   :  { %1182 = vmatprep.subr.mxu0 %v3674_v60 }
 0x9a3   :  { %1183 = vmatpush1.msra.mxu0 %v3678_v61 }
 0x9a4   :  { %1442 = vmatprep.subr.mxu0 %v3631_v46 }
 0xa54   :  { %v936_v12 = vpop.f32.mrf.mxu0 }
 0xa55   :  { %v945_v13 = vadd.f32 %v936_v12, %v3757_v25 }
 0xa56   :  { %v938_v14 = vpop.f32.mrf.mxu0 }
 0xa57   :  { %3171 = vtanh.f32 %v945_v13  ;;  %v950_v16 = vadd.f32 %v938_v14, %v3763_v31  ;;  %v951_v22 = vsub.f32 0.0, %v945_v13 }
 0xa59   :  { %3173 = vtanh.f32 %v950_v16  ;;  %v958_v24 = vsub.f32 0.0, %v950_v16  ;;  %v952_v17 = vmul.f32 1.442695, %v951_v22 }
 0xa5b   :  { %v959_v26 = vmul.f32 1.442695, %v958_v24  ;;  %3175 = vpow2.f32 %v952_v17 }
 0xa5d   :  { %3177 = vpow2.f32 %v959_v26 }
 0xa64   :  { %v3172_v18 = vpop.eup %3171 }
 0xa65   :  { %967 = vrot.lane.b32.xlu1 %v3172_v18, %s3455_s15 }
 0xa66   :  { %v3174_v20 = vpop.eup %3173 }
 0xa67   :  { %978 = vrot.lane.b32.xlu0 %v3174_v20, %s3455_s15 }
 0xa68   :  { %v3176_v46 = vpop.eup %3175 }
 0xa69   :  { %v954_v25 = vadd.f32 1.0, %v3176_v46 }
 0xa6a   :  { %v3178_v39 = vpop.eup %3177 }
 0xa6b   :  { %v961_v21 = vadd.f32 1.0, %v3178_v39  ;;  %3179 = vrcp.f32 %v954_v25 }
 0xa6d   :  { %3181 = vrcp.f32 %v961_v21 }
 0xa78   :  { %v3180_v31 = vpop.eup %3179 }
 0xa79   :  { %v965_v36 = vmul.f32 %v3180_v31, %v3860_v63 }
 0xa7a   :  { %v3182_v30 = vpop.eup %3181 }
 0xa7b   :  { %v976_v62 = vmul.f32 %v3182_v30, %v3864_v3 }
 0xad7   :  { %v968_v28 = vpop.permute.xlu1 %967 }
 0xad8   :  { %v970_v35 = vmul.f32 %v3180_v31, %v968_v28 }
 0xad9   :  { %v979_v32 = vpop.permute.xlu0 %978 }
 0xada   :  { %v981_v34 = vmul.f32 %v3182_v30, %v979_v32  ;;  %972 = vrot.lane.b32.xlu1 %v970_v35, %s3455_s15 }
 0xadc   :  { %983 = vrot.lane.b32.xlu0 %v981_v34, %s3455_s15 }
 0xb4c   :  { %v973_v40 = vpop.permute.xlu1 %972 }
 0xb4d   :  { %v3899_v43 = vadd.f32 %v973_v40, %v965_v36 }
 0xb4e   :  { %v984_v1 = vpop.permute.xlu0 %983 }
 0xb4f   :  { %3183 = vtanh.f32 %v3899_v43  ;;  %v3903_v2 = vadd.f32 %v984_v1, %v976_v62 }
 0xb51   :  { %3185 = vtanh.f32 %v3903_v2 }
 0xb5c   :  { %v3184_v38 = vpop.eup %3183 }
 0xb5d   :  { %989 = vrot.lane.b32.xlu1 %v3184_v38, %s3455_s15 }
 0xb5e   :  { %v3186_v4 = vpop.eup %3185 }
 0xb5f   :  { %995 = vrot.lane.b32.xlu0 %v3186_v4, %s3455_s15 }
 0xbcf   :  { %v990_v5 = vpop.permute.xlu1 %989 }
 0xbd0   :  { %v992_v63 = vmul.f32 %v3180_v31, %v990_v5 }
 0xbd1   :  { %v996_v44 = vpop.permute.xlu0 %995 }
 0xbd2   :  { %v998_v42 = vmul.f32 %v3182_v30, %v996_v44  ;;  %1000 = vrot.lane.b32.xlu1 %v992_v63, %s3456_s17 }
 0xbd4   :  { %1006 = vrot.lane.b32.xlu0 %v998_v42, %s3457_s18 }
 0xc44   :  { %v1001_v3 = vpop.permute.xlu1 %1000 }
 0xc45   :  { %1004 = vst.msk [vmem:[#allocation3 + $0x18] sm:$0xff] %vm255_vm8, %v1001_v3 }
 0xc46   :  { %v1007_v6 = vpop.permute.xlu0 %1006 }
 0xc47   :  { %1010 = vst.msk [vmem:[#allocation3 + $0x20] sm:$0xff] %vm574_vm10, %v1007_v6  ;;  %v1011_v0 = vsel %vm255_vm8, %v1001_v3, %v1007_v6 }
 0xc48   :  { %3015 = vmatmul.mubr.msk.f32.vlgmr.msra.gmra.mxu1 %vm427_vm9, %v1011_v0 }
 0xc49   :  { %1306 = vmatpush1.msra.mxu1 %v3634_v47  ;;  %1353 = vmatprep.mubr.f32.mxu1 %v3454_v45 }
 0xc4a   :  { %1307 = vmatprep.subr.mxu1 %v3639_v48 }
 0xc4b   :  { %1308 = vmatpush1.msra.mxu1 %v3641_v49 }
 0xc4c   :  { %1309 = vmatprep.subr.mxu1 %v3645_v50 }
 0xc4d   :  { %1310 = vmatpush1.msra.mxu1 %v3647_v51 }
 0xc4e   :  { %1311 = vmatprep.subr.mxu1 %v3651_v52 }
 0xc4f   :  { %1312 = vmatpush1.msra.mxu1 %v3653_v53 }
 0xc50   :  { %1313 = vmatprep.subr.mxu1 %v3656_v54 }
 0xc51   :  { %1314 = vmatpush1.msra.mxu1 %v3660_v55 }
 0xc52   :  { %1315 = vmatprep.subr.mxu1 %v3662_v56 }
 0xc53   :  { %1316 = vmatpush1.msra.mxu1 %v3666_v57 }
 0xc54   :  { %1317 = vmatprep.subr.mxu1 %v3668_v58 }
 0xc55   :  { %1318 = vmatpush1.msra.mxu1 %v3672_v59 }
 0xc56   :  { %1319 = vmatprep.subr.mxu1 %v3674_v60 }
 0xc57   :  { %1320 = vmatpush1.msra.mxu1 %v3678_v61 }
 0xd08   :  { %v1081_v9 = vpop.f32.mrf.mxu1 }
 0xd09   :  { %v1087_v11 = vadd.f32 %v1081_v9, %v3761_v29 }
 0xd0a   :  { %v1083_v12 = vpop.f32.mrf.mxu1 }
 0xd0b   :  { %3187 = vtanh.f32 %v1087_v11  ;;  %v1089_v13 = vadd.f32 %v1083_v12, %v3759_v27  ;;  %v1090_v18 = vsub.f32 0.0, %v1087_v11 }
 0xd0d   :  { %3189 = vtanh.f32 %v1089_v13  ;;  %v1097_v20 = vsub.f32 0.0, %v1089_v13  ;;  %v1091_v22 = vmul.f32 1.442695, %v1090_v18 }
 0xd0f   :  { %v1098_v24 = vmul.f32 1.442695, %v1097_v20  ;;  %3191 = vpow2.f32 %v1091_v22 }
 0xd11   :  { %3193 = vpow2.f32 %v1098_v24 }
 0xd18   :  { %v3188_v14 = vpop.eup %3187 }
 0xd19   :  { %1106 = vrot.lane.b32.xlu1 %v3188_v14, %s3455_s15 }
 0xd1a   :  { %v3190_v16 = vpop.eup %3189 }
 0xd1b   :  { %1117 = vrot.lane.b32.xlu0 %v3190_v16, %s3455_s15 }
 0xd1c   :  { %v3192_v17 = vpop.eup %3191 }
 0xd1d   :  { %v1093_v29 = vadd.f32 1.0, %v3192_v17 }
 0xd1e   :  { %v3194_v26 = vpop.eup %3193 }
 0xd1f   :  { %v1100_v46 = vadd.f32 1.0, %v3194_v26  ;;  %3195 = vrcp.f32 %v1093_v29 }
 0xd21   :  { %3197 = vrcp.f32 %v1100_v46 }
 0xd2c   :  { %v3196_v27 = vpop.eup %3195 }
 0xd2d   :  { %v1104_v35 = vmul.f32 %v3196_v27, %v3899_v43 }
 0xd2e   :  { %v3198_v21 = vpop.eup %3197 }
 0xd2f   :  { %v1115_v34 = vmul.f32 %v3198_v21, %v3903_v2 }
 0xd8b   :  { %v1107_v39 = vpop.permute.xlu1 %1106 }
 0xd8c   :  { %v1109_v25 = vmul.f32 %v3196_v27, %v1107_v39 }
 0xd8d   :  { %v1118_v31 = vpop.permute.xlu0 %1117 }
 0xd8e   :  { %v1120_v28 = vmul.f32 %v3198_v21, %v1118_v31  ;;  %1111 = vrot.lane.b32.xlu1 %v1109_v25, %s3455_s15 }
 0xd90   :  { %1122 = vrot.lane.b32.xlu0 %v1120_v28, %s3455_s15 }
 0xe00   :  { %v1112_v30 = vpop.permute.xlu1 %1111 }
 0xe01   :  { %v3937_v32 = vadd.f32 %v1112_v30, %v1104_v35 }
 0xe02   :  { %v1123_v36 = vpop.permute.xlu0 %1122 }
 0xe03   :  { %3199 = vtanh.f32 %v3937_v32  ;;  %v3941_v40 = vadd.f32 %v1123_v36, %v1115_v34 }
 0xe05   :  { %3201 = vtanh.f32 %v3941_v40 }
 0xe10   :  { %v3200_v62 = vpop.eup %3199 }
 0xe11   :  { %1128 = vrot.lane.b32.xlu1 %v3200_v62, %s3455_s15 }
 0xe12   :  { %v3202_v1 = vpop.eup %3201 }
 0xe13   :  { %1134 = vrot.lane.b32.xlu0 %v3202_v1, %s3455_s15 }
 0xe83   :  { %v1129_v38 = vpop.permute.xlu1 %1128 }
 0xe84   :  { %v1131_v43 = vmul.f32 %v3196_v27, %v1129_v38 }
 0xe85   :  { %v1135_v4 = vpop.permute.xlu0 %1134 }
 0xe86   :  { %v1137_v5 = vmul.f32 %v3198_v21, %v1135_v4  ;;  %1139 = vrot.lane.b32.xlu1 %v1131_v43, %s3456_s17 }
 0xe88   :  { %1144 = vrot.lane.b32.xlu0 %v1137_v5, %s3457_s18 }
 0xef8   :  { %v1140_v2 = vpop.permute.xlu1 %1139 }
 0xef9   :  { %1142 = vst.msk [vmem:[#allocation3 + $0x20] sm:$0xff] %vm255_vm8, %v1140_v2 }
 0xefa   :  { %v1145_v63 = vpop.permute.xlu0 %1144 }
 0xefb   :  { %1147 = vst.msk [vmem:[#allocation3 + $0x18] sm:$0xff] %vm574_vm10, %v1145_v63  ;;  %v1148_v44 = vsel %vm255_vm8, %v1140_v2, %v1145_v63 }
 0xefc   :  { %3016 = vmatmul.mubr.msk.f32.vlgmr.msra.gmra.mxu0 %vm427_vm9, %v1148_v44 }
 0xefd   :  { %1443 = vmatpush1.msra.mxu0 %v3634_v47  ;;  %1490 = vmatprep.mubr.f32.mxu0 %v3454_v45 }
 0xefe   :  { %1444 = vmatprep.subr.mxu0 %v3639_v48 }
 0xeff   :  { %1445 = vmatpush1.msra.mxu0 %v3641_v49 }
 0xf00   :  { %1446 = vmatprep.subr.mxu0 %v3645_v50 }
 0xf01   :  { %1447 = vmatpush1.msra.mxu0 %v3647_v51 }
 0xf02   :  { %1448 = vmatprep.subr.mxu0 %v3651_v52 }
 0xf03   :  { %1449 = vmatpush1.msra.mxu0 %v3653_v53 }
 0xf04   :  { %1450 = vmatprep.subr.mxu0 %v3656_v54 }
 0xf05   :  { %1451 = vmatpush1.msra.mxu0 %v3660_v55 }
 0xf06   :  { %1452 = vmatprep.subr.mxu0 %v3662_v56 }
 0xf07   :  { %1453 = vmatpush1.msra.mxu0 %v3666_v57 }
 0xf08   :  { %1454 = vmatprep.subr.mxu0 %v3668_v58 }
 0xf09   :  { %1455 = vmatpush1.msra.mxu0 %v3672_v59 }
 0xf0a   :  { %1456 = vmatprep.subr.mxu0 %v3674_v60 }
 0xf0b   :  { %1457 = vmatpush1.msra.mxu0 %v3678_v61 }
 0xfbc   :  { %v1218_v47 = vpop.f32.mrf.mxu0 }
 0xfbd   :  { %v1224_v48 = vadd.f32 %v1218_v47, %v3765_v33 }
 0xfbe   :  { %v1220_v49 = vpop.f32.mrf.mxu0 }
 0xfbf   :  { %3203 = vtanh.f32 %v1224_v48  ;;  %v1226_v50 = vadd.f32 %v1220_v49, %v3755_v23  ;;  %v1227_v53 = vsub.f32 0.0, %v1224_v48 }
 0xfc1   :  { %3205 = vtanh.f32 %v1226_v50  ;;  %v1234_v54 = vsub.f32 0.0, %v1226_v50  ;;  %v1228_v55 = vmul.f32 1.442695, %v1227_v53 }
 0xfc3   :  { %v1235_v56 = vmul.f32 1.442695, %v1234_v54  ;;  %3207 = vpow2.f32 %v1228_v55 }
 0xfc5   :  { %3209 = vpow2.f32 %v1235_v56 }
 0xfcc   :  { %v3204_v51 = vpop.eup %3203 }
 0xfcd   :  { %1243 = vrot.lane.b32.xlu1 %v3204_v51, %s3455_s15 }
 0xfce   :  { %v3206_v52 = vpop.eup %3205 }
 0xfcf   :  { %1254 = vrot.lane.b32.xlu0 %v3206_v52, %s3455_s15 }
 0xfd0   :  { %v3208_v57 = vpop.eup %3207 }
 0xfd1   :  { %v1230_v59 = vadd.f32 1.0, %v3208_v57 }
 0xfd2   :  { %v3210_v58 = vpop.eup %3209 }
 0xfd3   :  { %v1237_v60 = vadd.f32 1.0, %v3210_v58  ;;  %3211 = vrcp.f32 %v1230_v59 }
 0xfd5   :  { %3213 = vrcp.f32 %v1237_v60 }
 0xfe0   :  { %v3212_v61 = vpop.eup %3211 }
 0xfe1   :  { %v1241_v0 = vmul.f32 %v3212_v61, %v3937_v32 }
 0xfe2   :  { %v3214_v42 = vpop.eup %3213 }
 0xfe3   :  { %v1252_v12 = vmul.f32 %v3214_v42, %v3941_v40 }
0x103f   :  { %v1244_v23 = vpop.permute.xlu1 %1243 }
0x1040   :  { %v1246_v33 = vmul.f32 %v3212_v61, %v1244_v23 }
0x1041   :  { %v1255_v3 = vpop.permute.xlu0 %1254 }
0x1042   :  { %v1257_v6 = vmul.f32 %v3214_v42, %v1255_v3  ;;  %1248 = vrot.lane.b32.xlu1 %v1246_v33, %s3455_s15 }
0x1044   :  { %1259 = vrot.lane.b32.xlu0 %v1257_v6, %s3455_s15 }
0x10b4   :  { %v1249_v9 = vpop.permute.xlu1 %1248 }
0x10b5   :  { %v1251_v11 = vadd.f32 %v1249_v9, %v1241_v0 }
0x10b6   :  { %v1260_v13 = vpop.permute.xlu0 %1259 }
0x10b7   :  { %3215 = vtanh.f32 %v1251_v11  ;;  %v1262_v14 = vadd.f32 %v1260_v13, %v1252_v12 }
0x10b9   :  { %3217 = vtanh.f32 %v1262_v14 }
0x10c4   :  { %v3216_v16 = vpop.eup %3215 }
0x10c5   :  { %1265 = vrot.lane.b32.xlu1 %v3216_v16, %s3455_s15 }
0x10c6   :  { %v3218_v18 = vpop.eup %3217 }
0x10c7   :  { %1271 = vrot.lane.b32.xlu0 %v3218_v18, %s3455_s15 }
0x1137   :  { %v1266_v20 = vpop.permute.xlu1 %1265 }
0x1138   :  { %v1268_v22 = vmul.f32 %v3212_v61, %v1266_v20 }
0x1139   :  { %v1272_v24 = vpop.permute.xlu0 %1271 }
0x113a   :  { %v1274_v17 = vmul.f32 %v3214_v42, %v1272_v24  ;;  %1276 = vrot.lane.b32.xlu1 %v1268_v22, %s3456_s17 }
0x113c   :  { %1281 = vrot.lane.b32.xlu0 %v1274_v17, %s3457_s18 }
0x11ac   :  { %v1277_v26 = vpop.permute.xlu1 %1276 }
0x11ad   :  { %1279 = vst.msk [vmem:[#allocation3 + $0x28] sm:$0xff] %vm255_vm8, %v1277_v26 }
0x11ae   :  { %v1282_v29 = vpop.permute.xlu0 %1281 }
0x11af   :  { %1284 = vst.msk [vmem:[#allocation3 + $0x10] sm:$0xff] %vm574_vm10, %v1282_v29  ;;  %v1285_v46 = vsel %vm255_vm8, %v1277_v26, %v1282_v29 }
0x11b0   :  { %3017 = vmatmul.mubr.msk.f32.vlgmr.msra.gmra.mxu1 %vm427_vm9, %v1285_v46 }
0x11b1   :  { %1703 = vmatprep.mubr.f32.mxu1 %v3454_v45 }
0x1270   :  { %v1355_v27 = vpop.f32.mrf.mxu1 }
0x1271   :  { %v1361_v39 = vadd.f32 %v1355_v27, %v3769_v37 }
0x1272   :  { %v1357_v25 = vpop.f32.mrf.mxu1 }
0x1273   :  { %3219 = vtanh.f32 %v1361_v39  ;;  %v1363_v21 = vadd.f32 %v1357_v25, %v3751_v19  ;;  %v1364_v35 = vsub.f32 0.0, %v1361_v39  ;;  %v1601_v39 = vld [vmem:[%s4493_s7 + $0x78] sm:$0xff]  ;;  %v1600_v25 = vld [vmem:[%s4493_s7 + $0x70] sm:$0xff] }
0x1274   :  { %1655 = vmatprep.subr.mxu1 %v1601_v39 }
0x1275   :  { %3221 = vtanh.f32 %v1363_v21  ;;  %v1371_v30 = vsub.f32 0.0, %v1363_v21  ;;  %v1365_v32 = vmul.f32 1.442695, %v1364_v35  ;;  %v1599_v21 = vld [vmem:[%s4493_s7 + $0x68] sm:$0xff]  ;;  %v4034_v35 = vld [vmem:[#allocation5 + $0xf0] sm:$0xff]  ;;  %1656 = vmatpush1.msra.mxu1 %v1600_v25 }
0x1276   :  { %1657 = vmatprep.subr.mxu1 %v1599_v21 }
0x1277   :  { %v1372_v34 = vmul.f32 1.442695, %v1371_v30  ;;  %3223 = vpow2.f32 %v1365_v32  ;;  %v1597_v30 = vld [vmem:[%s4493_s7 + $0x58] sm:$0xff]  ;;  %v4040_v32 = vld [vmem:[#allocation5 + $0xe8] sm:$0xff] }
0x1279   :  { %3225 = vpow2.f32 %v1372_v34  ;;  %v1596_v34 = vld [vmem:[%s4493_s7 + $0x50] sm:$0xff] }
0x1280   :  { %v3220_v31 = vpop.eup %3219 }
0x1281   :  { %1380 = vrot.lane.b32.xlu1 %v3220_v31, %s3455_s15  ;;  %v4029_v31 = vld [vmem:[#allocation5 + $0xf8] sm:$0xff] }
0x1282   :  { %v3222_v28 = vpop.eup %3221  ;;  %1808 = vmatprep.subr.mxu0 %v4029_v31 }
0x1283   :  { %1391 = vrot.lane.b32.xlu0 %v3222_v28, %s3455_s15  ;;  %v1598_v28 = vld [vmem:[%s4493_s7 + $0x60] sm:$0xff] }
0x1284   :  { %v3224_v36 = vpop.eup %3223  ;;  %1658 = vmatpush1.msra.mxu1 %v1598_v28 }
0x1285   :  { %v1367_v37 = vadd.f32 1.0, %v3224_v36  ;;  %v4046_v36 = vld [vmem:[#allocation5 + $0xe0] sm:$0xff]  ;;  %1659 = vmatprep.subr.mxu1 %v1597_v30 }
0x1286   :  { %v3226_v40 = vpop.eup %3225  ;;  %1660 = vmatpush1.msra.mxu1 %v1596_v34 }
0x1287   :  { %v1374_v62 = vadd.f32 1.0, %v3226_v40  ;;  %3227 = vrcp.f32 %v1367_v37 }
0x1289   :  { %3229 = vrcp.f32 %v1374_v62  ;;  %v1595_v62 = vld [vmem:[%s4493_s7 + $0x48] sm:$0xff] }
0x128a   :  { %1661 = vmatprep.subr.mxu1 %v1595_v62 }
0x1294   :  { %v3228_v19 = vpop.eup %3227 }
0x1295   :  { %v1378_v2 = vmul.f32 %v3228_v19, %v1251_v11 }
0x1296   :  { %v3230_v43 = vpop.eup %3229 }
0x1297   :  { %v1389_v47 = vmul.f32 %v3230_v43, %v1262_v14 }
0x12f3   :  { %v1381_v1 = vpop.permute.xlu1 %1380 }
0x12f4   :  { %v1383_v38 = vmul.f32 %v3228_v19, %v1381_v1  ;;  %v1594_v1 = vld [vmem:[%s4493_s7 + $0x40] sm:$0xff] }
0x12f5   :  { %v1392_v4 = vpop.permute.xlu0 %1391  ;;  %1662 = vmatpush1.msra.mxu1 %v1594_v1 }
0x12f6   :  { %v1394_v5 = vmul.f32 %v3230_v43, %v1392_v4  ;;  %1385 = vrot.lane.b32.xlu1 %v1383_v38, %s3455_s15  ;;  %v4061_v38 = vld [vmem:[#allocation5 + $0xd0] sm:$0xff]  ;;  %v4067_v4 = vld [vmem:[#allocation5 + $0xc8] sm:$0xff] }
0x12f8   :  { %1396 = vrot.lane.b32.xlu0 %v1394_v5, %s3455_s15  ;;  %v1592_v5 = vld [vmem:[%s4493_s7 + $0x30] sm:$0xff] }
0x1368   :  { %v1386_v63 = vpop.permute.xlu1 %1385 }
0x1369   :  { %v1388_v44 = vadd.f32 %v1386_v63, %v1378_v2  ;;  %v4073_v2 = vld [vmem:[#allocation5 + $0xc0] sm:$0xff] }
0x136a   :  { %v1397_v48 = vpop.permute.xlu0 %1396  ;;  %v1591_v63 = vld [vmem:[%s4493_s7 + $0x28] sm:$0xff] }
0x136b   :  { %3231 = vtanh.f32 %v1388_v44  ;;  %v1399_v49 = vadd.f32 %v1397_v48, %v1389_v47  ;;  %v1590_v47 = vld [vmem:[%s4493_s7 + $0x20] sm:$0xff]  ;;  %v4085_v48 = vld [vmem:[#allocation5 + $0xb0] sm:$0xff] }
0x136d   :  { %3233 = vtanh.f32 %v1399_v49 }
0x1378   :  { %v3232_v50 = vpop.eup %3231 }
0x1379   :  { %1402 = vrot.lane.b32.xlu1 %v3232_v50, %s3455_s15  ;;  %v4090_v50 = vld [vmem:[#allocation5 + $0xa8] sm:$0xff] }
0x137a   :  { %v3234_v51 = vpop.eup %3233 }
0x137b   :  { %1408 = vrot.lane.b32.xlu0 %v3234_v51, %s3455_s15  ;;  %v1588_v51 = vld [vmem:[%s4493_s7 + $0x10] sm:$0xff] }
0x13eb   :  { %v1403_v52 = vpop.permute.xlu1 %1402 }
0x13ec   :  { %v1405_v53 = vmul.f32 %v3228_v19, %v1403_v52  ;;  %v4055_v19 = vld [vmem:[#allocation5 + $0xd8] sm:$0xff]  ;;  %v4096_v52 = vld [vmem:[#allocation5 + $0xa0] sm:$0xff] }
0x13ed   :  { %v1409_v54 = vpop.permute.xlu0 %1408 }
0x13ee   :  { %v1411_v55 = vmul.f32 %v3230_v43, %v1409_v54  ;;  %1413 = vrot.lane.b32.xlu1 %v1405_v53, %s3456_s17  ;;  %v1593_v43 = vld [vmem:[%s4493_s7 + $0x38] sm:$0xff]  ;;  %v1587_v53 = vld [vmem:[%s4493_s7 + $0x8] sm:$0xff] }
0x13ef   :  { %1663 = vmatprep.subr.mxu1 %v1593_v43  ;;  %v4102_v54 = vld [vmem:[#allocation5 + $0x98] sm:$0xff] }
0x13f0   :  { %1418 = vrot.lane.b32.xlu0 %v1411_v55, %s3457_s18  ;;  %1664 = vmatpush1.msra.mxu1 %v1592_v5  ;;  %v1586_v55 = vld [vmem:[%s4493_s7] sm:$0xff] }
0x13f1   :  { %1665 = vmatprep.subr.mxu1 %v1591_v63 }
0x13f2   :  { %1666 = vmatpush1.msra.mxu1 %v1590_v47 }
0x1460   :  { %v1414_v56 = vpop.permute.xlu1 %1413 }
0x1461   :  { %1416 = vst.msk [vmem:[#allocation3 + $0x30] sm:$0xff] %vm255_vm8, %v1414_v56 }
0x1462   :  { %v1419_v57 = vpop.permute.xlu0 %1418 }
0x1463   :  { %1421 = vst.msk [vmem:[#allocation3 + $0x8] sm:$0xff] %vm574_vm10, %v1419_v57  ;;  %v1422_v58 = vsel %vm255_vm8, %v1414_v56, %v1419_v57  ;;  %v4107_v56 = vld [vmem:[#allocation5 + $0x90] sm:$0xff]  ;;  %v4112_v57 = vld [vmem:[#allocation5 + $0x88] sm:$0xff] }
0x1464   :  { %3018 = vmatmul.mubr.msk.f32.vlgmr.msra.gmra.mxu0 %vm427_vm9, %v1422_v58 }
0x1465   :  { %1856 = vmatprep.mubr.f32.mxu0 %v3454_v45  ;;  %1809 = vmatpush1.msra.mxu0 %v4034_v35 }
0x1466   :  { %1810 = vmatprep.subr.mxu0 %v4040_v32 }
0x1467   :  { %1811 = vmatpush1.msra.mxu0 %v4046_v36 }
0x1468   :  { %1812 = vmatprep.subr.mxu0 %v4055_v19 }
0x1469   :  { %1813 = vmatpush1.msra.mxu0 %v4061_v38 }
0x146a   :  { %1814 = vmatprep.subr.mxu0 %v4067_v4 }
0x146b   :  { %1815 = vmatpush1.msra.mxu0 %v4073_v2 }
0x1524   :  { %v1492_v59 = vpop.f32.mrf.mxu0 }
0x1525   :  { %v1498_v60 = vadd.f32 %v1492_v59, %v3773_v41  ;;  %v4115_v59 = vld [vmem:[#allocation5 + $0x80] sm:$0xff] }
0x1526   :  { %v1494_v61 = vpop.f32.mrf.mxu0 }
0x1527   :  { %3235 = vtanh.f32 %v1498_v60  ;;  %v1500_v23 = vadd.f32 %v1494_v61, %v3747_v15  ;;  %v1501_v3 = vsub.f32 0.0, %v1498_v60  ;;  %v3029_v60 = vld [vmem:[%s4488_s2 + $0x8] sm:$0xff] }
0x1529   :  { %3237 = vtanh.f32 %v1500_v23  ;;  %v1508_v6 = vsub.f32 0.0, %v1500_v23  ;;  %v1502_v0 = vmul.f32 1.442695, %v1501_v3 }
0x152b   :  { %v1509_v9 = vmul.f32 1.442695, %v1508_v6  ;;  %3239 = vpow2.f32 %v1502_v0 }
0x152d   :  { %3241 = vpow2.f32 %v1509_v9  ;;  %v1579_v9 = vld [vmem:[#allocation3 + $0x8] sm:$0xff] }
0x1534   :  { %v3236_v33 = vpop.eup %3235 }
0x1535   :  { %1517 = vrot.lane.b32.xlu0 %v3236_v33, %s3455_s15 }
0x1536   :  { %v3238_v42 = vpop.eup %3237 }
0x1537   :  { %1528 = vrot.lane.b32.xlu1 %v3238_v42, %s3455_s15 }
0x1538   :  { %v3240_v11 = vpop.eup %3239 }
0x1539   :  { %v1504_v41 = vadd.f32 1.0, %v3240_v11  ;;  %v1580_v11 = vld [vmem:[#allocation3 + $0x10] sm:$0xff] }
0x153a   :  { %v3242_v12 = vpop.eup %3241 }
0x153b   :  { %v1511_v13 = vadd.f32 1.0, %v3242_v12  ;;  %3243 = vrcp.f32 %v1504_v41  ;;  %v1581_v12 = vld [vmem:[#allocation3 + $0x18] sm:$0xff]  ;;  %v1582_v41 = vld [vmem:[#allocation3 + $0x20] sm:$0xff] }
0x153d   :  { %3245 = vrcp.f32 %v1511_v13  ;;  %v1583_v13 = vld [vmem:[#allocation3 + $0x28] sm:$0xff] }
0x1548   :  { %v4004_v15 = vpop.eup %3243 }
0x1549   :  { %v1515_v24 = vmul.f32 %v4004_v15, %v1388_v44  ;;  %v4079_v44 = vld [vmem:[#allocation5 + $0xb8] sm:$0xff] }
0x154a   :  { %v4007_v18 = vpop.eup %3245  ;;  %1816 = vmatprep.subr.mxu0 %v4079_v44 }
0x154b   :  { %v1526_v29 = vmul.f32 %v4007_v18, %v1399_v49  ;;  %v1589_v49 = vld [vmem:[%s4493_s7 + $0x18] sm:$0xff]  ;;  %1817 = vmatpush1.msra.mxu0 %v4085_v48 }
0x154c   :  { %1667 = vmatprep.subr.mxu1 %v1589_v49  ;;  %1818 = vmatprep.subr.mxu0 %v4090_v50 }
0x154d   :  { %1668 = vmatpush1.msra.mxu1 %v1588_v51  ;;  %1819 = vmatpush1.msra.mxu0 %v4096_v52 }
0x154e   :  { %1669 = vmatprep.subr.mxu1 %v1587_v53  ;;  %1820 = vmatprep.subr.mxu0 %v4102_v54  ;;  %v3028_v53 = vld [vmem:[%s4489_s3 + $0x8] sm:$0xff] }
0x154f   :  { %1670 = vmatpush1.msra.mxu1 %v1586_v55  ;;  %1821 = vmatpush1.msra.mxu0 %v4107_v56 }
0x1550   :  { %1822 = vmatprep.subr.mxu0 %v4112_v57  ;;  %2086 = vmatprep.subr.mxu1 %v4029_v31 }
0x1551   :  { %1823 = vmatpush1.msra.mxu0 %v4115_v59 }
0x1552   :  { %3030 = vmatmul.mubr.msk.f32.vlgmr.msra.gmra.mxu0 %vm427_vm9, %v3029_v60  ;;  %1949 = vmatprep.subr.mxu0 %v4029_v31 }
0x1553   :  { %1950 = vmatpush1.msra.mxu0 %v4034_v35  ;;  %1997 = vmatprep.mubr.f32.mxu0 %v3454_v45 }
0x1554   :  { %1951 = vmatprep.subr.mxu0 %v4040_v32 }
0x1555   :  { %1952 = vmatpush1.msra.mxu0 %v4046_v36 }
0x1556   :  { %1953 = vmatprep.subr.mxu0 %v4055_v19 }
0x1557   :  { %1954 = vmatpush1.msra.mxu0 %v4061_v38 }
0x1558   :  { %1955 = vmatprep.subr.mxu0 %v4067_v4 }
0x1559   :  { %1956 = vmatpush1.msra.mxu0 %v4073_v2 }
0x155a   :  { %1957 = vmatprep.subr.mxu0 %v4079_v44 }
0x155b   :  { %1958 = vmatpush1.msra.mxu0 %v4085_v48 }
0x155c   :  { %1959 = vmatprep.subr.mxu0 %v4090_v50 }
0x155d   :  { %1960 = vmatpush1.msra.mxu0 %v4096_v52 }
0x155e   :  { %1961 = vmatprep.subr.mxu0 %v4102_v54 }
0x155f   :  { %1962 = vmatpush1.msra.mxu0 %v4107_v56 }
0x1560   :  { %1963 = vmatprep.subr.mxu0 %v4112_v57 }
0x1561   :  { %1964 = vmatpush1.msra.mxu0 %v4115_v59 }
0x1562   :  { %2223 = vmatprep.subr.mxu0 %v4029_v31 }
0x15a7   :  { %v1518_v14 = vpop.permute.xlu0 %1517 }
0x15a8   :  { %v1520_v16 = vmul.f32 %v4004_v15, %v1518_v14 }
0x15a9   :  { %v1529_v20 = vpop.permute.xlu1 %1528 }
0x15aa   :  { %v1531_v22 = vmul.f32 %v4007_v18, %v1529_v20  ;;  %1522 = vrot.lane.b32.xlu0 %v1520_v16, %s3455_s15  ;;  %v3019_v16 = vld [vmem:[%s4495_s9 + $0x2] sm:$0x3] }
0x15ab   :  { %v1612_v20 = vrot.slane %v3019_v16, %v251_v8 }
0x15ac   :  { %1533 = vrot.lane.b32.xlu1 %v1531_v22, %s3455_s15 }
0x161c   :  { %v1523_v17 = vpop.permute.xlu0 %1522 }
0x161d   :  { %v4013_v26 = vadd.f32 %v1523_v17, %v1515_v24  ;;  %v1858_v24 = vpop.f32.mrf.mxu0 }
0x161e   :  { %v1534_v46 = vpop.permute.xlu1 %1533 }
0x161f   :  { %3247 = vtanh.f32 %v4013_v26  ;;  %v4017_v27 = vadd.f32 %v1534_v46, %v1526_v29 }
0x1621   :  { %3249 = vtanh.f32 %v4017_v27 }
0x162c   :  { %v3248_v40 = vpop.eup %3247 }
0x162d   :  { %1539 = vrot.lane.b32.xlu0 %v3248_v40, %s3455_s15 }
0x162e   :  { %v3250_v37 = vpop.eup %3249 }
0x162f   :  { %1545 = vrot.lane.b32.xlu1 %v3250_v37, %s3455_s15 }
0x169f   :  { %v1540_v58 = vpop.permute.xlu0 %1539 }
0x16a0   :  { %v1542_v61 = vmul.f32 %v4004_v15, %v1540_v58  ;;  %v1584_v15 = vld [vmem:[#allocation3 + $0x30] sm:$0xff] }
0x16a1   :  { %v1546_v23 = vpop.permute.xlu1 %1545 }
0x16a2   :  { %v1548_v33 = vmul.f32 %v4007_v18, %v1546_v23  ;;  %1550 = vrot.lane.b32.xlu0 %v1542_v61, %s3456_s17  ;;  %v1608_v18 = vrot.slane %v3019_v16, %v247_v10 }
0x16a4   :  { %1555 = vrot.lane.b32.xlu1 %v1548_v33, %s3457_s18 }
0x1714   :  { %v1551_v42 = vpop.permute.xlu0 %1550 }
0x1715   :  { %1553 = vst.msk [vmem:[#allocation3 + $0x38] sm:$0xff] %vm255_vm8, %v1551_v42 }
0x1716   :  { %v1556_v3 = vpop.permute.xlu1 %1555 }
0x1717   :  { %1558 = vst.msk [vmem:[#allocation3] sm:$0xff] %vm574_vm10, %v1556_v3  ;;  %v4148_v6 = vsel %vm255_vm8, %v1551_v42, %v1556_v3 }
0x1718   :  { %1560 = vst.msk [vmem:[#allocation8] sm:$0xff] %vm255_vm8, %v4148_v6 }
0x171c   :  { %v1585_v14 = vld [vmem:[#allocation3 + $0x38] sm:$0xff] }
0x171e   :  { %v1578_v0 = vld [vmem:[#allocation3] sm:$0xff] }
0x171f   :  { %3020 = vmatmul.mubr.msk.f32.vlgmr.msra.gmra.mxu1 %vm427_vm9, %v1578_v0 }
0x1720   :  { %1709 = vmatprep.mubr.f32.mxu1 %v3454_v45  ;;  %2087 = vmatpush1.msra.mxu1 %v4034_v35 }
0x1721   :  { %2088 = vmatprep.subr.mxu1 %v4040_v32 }
0x1722   :  { %2089 = vmatpush1.msra.mxu1 %v4046_v36 }
0x1723   :  { %3021 = vmatmul.mubr.msk.f32.gmra.mxu1 %vm427_vm9, %v1579_v9  ;;  %2090 = vmatprep.subr.mxu1 %v4055_v19 }
0x1724   :  { %1715 = vmatprep.mubr.f32.mxu1 %v3454_v45  ;;  %2091 = vmatpush1.msra.mxu1 %v4061_v38 }
0x1725   :  { %2092 = vmatprep.subr.mxu1 %v4067_v4 }
0x1726   :  { %2093 = vmatpush1.msra.mxu1 %v4073_v2 }
0x1727   :  { %3022 = vmatmul.mubr.msk.f32.gmra.mxu1 %vm427_vm9, %v1580_v11  ;;  %2094 = vmatprep.subr.mxu1 %v4079_v44 }
0x1728   :  { %1721 = vmatprep.mubr.f32.mxu1 %v3454_v45  ;;  %2095 = vmatpush1.msra.mxu1 %v4085_v48 }
0x1729   :  { %2096 = vmatprep.subr.mxu1 %v4090_v50 }
0x172a   :  { %2097 = vmatpush1.msra.mxu1 %v4096_v52 }
0x172b   :  { %3023 = vmatmul.mubr.msk.f32.gmra.mxu1 %vm427_vm9, %v1581_v12  ;;  %2098 = vmatprep.subr.mxu1 %v4102_v54  ;;  %v1860_v12 = vpop.f32.mrf.mxu0 }
0x172c   :  { %1727 = vmatprep.mubr.f32.mxu1 %v3454_v45  ;;  %2099 = vmatpush1.msra.mxu1 %v4107_v56 }
0x172d   :  { %2100 = vmatprep.subr.mxu1 %v4112_v57 }
0x172e   :  { %2101 = vmatpush1.msra.mxu1 %v4115_v59 }
0x172f   :  { %3024 = vmatmul.mubr.msk.f32.gmra.mxu1 %vm427_vm9, %v1582_v41  ;;  %2360 = vmatprep.subr.mxu1 %v4029_v31 }
0x1730   :  { %1733 = vmatprep.mubr.f32.mxu1 %v3454_v45 }
0x1733   :  { %3025 = vmatmul.mubr.msk.f32.gmra.mxu1 %vm427_vm9, %v1583_v13 }
0x1734   :  { %1739 = vmatprep.mubr.f32.mxu1 %v3454_v45 }
0x1737   :  { %3026 = vmatmul.mubr.msk.f32.gmra.mxu1 %vm427_vm9, %v1584_v15 }
0x1738   :  { %1745 = vmatprep.mubr.f32.mxu1 %v3454_v45 }
0x173b   :  { %3027 = vmatmul.mubr.msk.f32.gmra.mxu1 %vm427_vm9, %v1585_v14 }
0x173c   :  { %2134 = vmatprep.mubr.f32.mxu1 %v3454_v45 }
0x17df   :  { %v1705_v22 = vpop.f32.mrf.mxu1 }
0x17e0   :  { %v1706_v17 = vadd.f32 %v1705_v22, %v1608_v18 }
0x17e1   :  { %v1707_v29 = vpop.f32.mrf.mxu1 }
0x17e2   :  { %v4191_v46 = vadd.f32 %v1707_v29, %v1612_v20  ;;  %v1864_v39 = vadd.f32 %v1858_v24, %v1706_v17 }
0x17e3   :  { %v1711_v25 = vpop.f32.mrf.mxu1 }
0x17e4   :  { %3251 = vtanh.f32 %v1864_v39  ;;  %v4193_v21 = vadd.f32 %v1711_v25, %v1608_v18  ;;  %v1867_v15 = vsub.f32 0.0, %v1864_v39 }
0x17e5   :  { %v1713_v28 = vpop.f32.mrf.mxu1 }
0x17e6   :  { %v4195_v30 = vadd.f32 %v1713_v28, %v1612_v20  ;;  %v1868_v14 = vmul.f32 1.442695, %v1867_v15 }
0x17e7   :  { %v1717_v34 = vpop.f32.mrf.mxu1 }
0x17e8   :  { %v4197_v40 = vadd.f32 %v1717_v34, %v1608_v18 }
0x17e9   :  { %v1719_v10 = vpop.f32.mrf.mxu1 }
0x17ea   :  { %v4199_v7 = vadd.f32 %v1719_v10, %v1612_v20 }
0x17eb   :  { %v1723_v8 = vpop.f32.mrf.mxu1 }
0x17ec   :  { %v4201_v37 = vadd.f32 %v1723_v8, %v1608_v18 }
0x17ed   :  { %v1725_v62 = vpop.f32.mrf.mxu1 }
0x17ee   :  { %v4203_v1 = vadd.f32 %v1725_v62, %v1612_v20 }
0x17ef   :  { %v1729_v43 = vpop.f32.mrf.mxu1 }
0x17f0   :  { %v4205_v5 = vadd.f32 %v1729_v43, %v1608_v18 }
0x17f1   :  { %v3252_v63 = vpop.eup %3251  ;;  %v1731_v47 = vpop.f32.mrf.mxu1 }
0x17f2   :  { %v4207_v49 = vadd.f32 %v1731_v47, %v1612_v20  ;;  %1887 = vrot.lane.b32.xlu1 %v3252_v63, %s3455_s15 }
0x17f3   :  { %v1735_v51 = vpop.f32.mrf.mxu1 }
0x17f4   :  { %v4213_v55 = vadd.f32 %v1735_v51, %v1608_v18 }
0x17f5   :  { %v1737_v58 = vpop.f32.mrf.mxu1 }
0x17f6   :  { %v4215_v60 = vadd.f32 %v1737_v58, %v1612_v20  ;;  %1882 = vrot.lane.b32.xlu1 %v3028_v53, %s3455_s15 }
0x17f7   :  { %v1741_v61 = vpop.f32.mrf.mxu1 }
0x17f8   :  { %v4218_v23 = vadd.f32 %v1741_v61, %v1608_v18 }
0x17f9   :  { %v1743_v33 = vpop.f32.mrf.mxu1 }
0x17fa   :  { %v4220_v42 = vadd.f32 %v1743_v33, %v1612_v20 }
0x17fb   :  { %v1747_v3 = vpop.f32.mrf.mxu1 }
0x17fc   :  { %v4222_v0 = vadd.f32 %v1747_v3, %v1608_v18 }
0x17fd   :  { %v1749_v9 = vpop.f32.mrf.mxu1 }
0x17fe   :  { %v1750_v11 = vadd.f32 %v1749_v9, %v1612_v20 }
0x1800   :  { %v1866_v41 = vadd.f32 %v1860_v12, %v1750_v11 }
0x1802   :  { %3253 = vtanh.f32 %v1866_v41  ;;  %v1874_v24 = vsub.f32 0.0, %v1866_v41 }
0x1803   :  { %3255 = vpow2.f32 %v1868_v14 }
0x1804   :  { %v1875_v17 = vmul.f32 1.442695, %v1874_v24 }
0x180f   :  { %v3254_v13 = vpop.eup %3253 }
0x1810   :  { %1898 = vrot.lane.b32.xlu0 %v3254_v13, %s3455_s15  ;;  %v3256_v16 = vpop.eup %3255 }
0x1811   :  { %v1870_v22 = vadd.f32 1.0, %v3256_v16 }
0x1813   :  { %3257 = vrcp.f32 %v1870_v22 }
0x1814   :  { %3259 = vpow2.f32 %v1875_v17 }
0x1820   :  { %v3258_v29 = vpop.eup %3257 }
0x1821   :  { %v3260_v20 = vpop.eup %3259 }
0x1822   :  { %v1877_v28 = vadd.f32 1.0, %v3260_v20 }
0x1824   :  { %3261 = vrcp.f32 %v1877_v28 }
0x1831   :  { %v3262_v34 = vpop.eup %3261 }
0x1832   :  { %v1896_v51 = vmul.f32 %v3262_v34, %v3028_v53 }
0x1864   :  { %v1888_v18 = vpop.permute.xlu1 %1887 }
0x1865   :  { %v1890_v25 = vmul.f32 %v3258_v29, %v1888_v18 }
0x1867   :  { %1892 = vrot.lane.b32.xlu0 %v1890_v25, %s3455_s15 }
0x1868   :  { %v1883_v39 = vpop.permute.xlu1 %1882 }
0x1869   :  { %v1885_v62 = vmul.f32 %v3258_v29, %v1883_v39 }
0x1882   :  { %v1899_v10 = vpop.permute.xlu0 %1898 }
0x1883   :  { %v1901_v8 = vmul.f32 %v3262_v34, %v1899_v10 }
0x1885   :  { %1903 = vrot.lane.b32.xlu1 %v1901_v8, %s3455_s15 }
0x18d9   :  { %v1893_v43 = vpop.permute.xlu0 %1892 }
0x18da   :  { %v4227_v63 = vadd.f32 %v1893_v43, %v1885_v62 }
0x18dc   :  { %3263 = vtanh.f32 %v4227_v63 }
0x18e9   :  { %v3264_v47 = vpop.eup %3263 }
0x18ea   :  { %1909 = vrot.lane.b32.xlu0 %v3264_v47, %s3455_s15 }
0x18f7   :  { %v1904_v58 = vpop.permute.xlu1 %1903 }
0x18f8   :  { %v4231_v61 = vadd.f32 %v1904_v58, %v1896_v51 }
0x18fa   :  { %3265 = vtanh.f32 %v4231_v61 }
0x1907   :  { %v3266_v33 = vpop.eup %3265 }
0x1908   :  { %1915 = vrot.lane.b32.xlu1 %v3266_v33, %s3455_s15 }
0x195c   :  { %v1910_v3 = vpop.permute.xlu0 %1909 }
0x195d   :  { %v1912_v9 = vmul.f32 %v3258_v29, %v1910_v3 }
0x195f   :  { %1920 = vrot.lane.b32.xlu0 %v1912_v9, %s3456_s17 }
0x197a   :  { %v1916_v11 = vpop.permute.xlu1 %1915 }
0x197b   :  { %v1918_v12 = vmul.f32 %v3262_v34, %v1916_v11 }
0x197d   :  { %1925 = vrot.lane.b32.xlu1 %v1918_v12, %s3457_s18 }
0x19d1   :  { %v1921_v41 = vpop.permute.xlu0 %1920 }
0x19d2   :  { %1923 = vst.msk [vmem:[#allocation3] sm:$0xff] %vm255_vm8, %v1921_v41 }
0x19ef   :  { %v1926_v53 = vpop.permute.xlu1 %1925 }
0x19f0   :  { %1928 = vst.msk [vmem:[#allocation3 + $0x38] sm:$0xff] %vm574_vm10, %v1926_v53  ;;  %v1929_v13 = vsel %vm255_vm8, %v1921_v41, %v1926_v53 }
0x19f1   :  { %3031 = vmatmul.mubr.msk.f32.vlgmr.msra.gmra.mxu0 %vm427_vm9, %v1929_v13 }
0x19f2   :  { %2224 = vmatpush1.msra.mxu0 %v4034_v35  ;;  %2271 = vmatprep.mubr.f32.mxu0 %v3454_v45 }
0x19f3   :  { %2225 = vmatprep.subr.mxu0 %v4040_v32 }
0x19f4   :  { %2226 = vmatpush1.msra.mxu0 %v4046_v36 }
0x19f5   :  { %2227 = vmatprep.subr.mxu0 %v4055_v19 }
0x19f6   :  { %2228 = vmatpush1.msra.mxu0 %v4061_v38 }
0x19f7   :  { %2229 = vmatprep.subr.mxu0 %v4067_v4 }
0x19f8   :  { %2230 = vmatpush1.msra.mxu0 %v4073_v2 }
0x19f9   :  { %2231 = vmatprep.subr.mxu0 %v4079_v44 }
0x19fa   :  { %2232 = vmatpush1.msra.mxu0 %v4085_v48 }
0x19fb   :  { %2233 = vmatprep.subr.mxu0 %v4090_v50 }
0x19fc   :  { %2234 = vmatpush1.msra.mxu0 %v4096_v52 }
0x19fd   :  { %2235 = vmatprep.subr.mxu0 %v4102_v54 }
0x19fe   :  { %2236 = vmatpush1.msra.mxu0 %v4107_v56 }
0x19ff   :  { %2237 = vmatprep.subr.mxu0 %v4112_v57 }
0x1a00   :  { %2238 = vmatpush1.msra.mxu0 %v4115_v59 }
0x1a01   :  { %2497 = vmatprep.subr.mxu0 %v4029_v31 }
0x1ab1   :  { %v1999_v15 = vpop.f32.mrf.mxu0 }
0x1ab2   :  { %v2005_v14 = vadd.f32 %v1999_v15, %v4193_v21 }
0x1ab3   :  { %v2001_v16 = vpop.f32.mrf.mxu0 }
0x1ab4   :  { %3267 = vtanh.f32 %v2005_v14  ;;  %v2007_v22 = vadd.f32 %v2001_v16, %v4220_v42  ;;  %v2008_v29 = vsub.f32 0.0, %v2005_v14 }
0x1ab6   :  { %3269 = vtanh.f32 %v2007_v22  ;;  %v2015_v18 = vsub.f32 0.0, %v2007_v22  ;;  %v2009_v25 = vmul.f32 1.442695, %v2008_v29 }
0x1ab8   :  { %v2016_v20 = vmul.f32 1.442695, %v2015_v18  ;;  %3271 = vpow2.f32 %v2009_v25 }
0x1aba   :  { %3273 = vpow2.f32 %v2016_v20 }
0x1ac1   :  { %v3268_v24 = vpop.eup %3267 }
0x1ac2   :  { %2024 = vrot.lane.b32.xlu0 %v3268_v24, %s3455_s15 }
0x1ac3   :  { %v3270_v17 = vpop.eup %3269 }
0x1ac4   :  { %2035 = vrot.lane.b32.xlu1 %v3270_v17, %s3455_s15 }
0x1ac5   :  { %v3272_v28 = vpop.eup %3271 }
0x1ac6   :  { %v2011_v21 = vadd.f32 1.0, %v3272_v28 }
0x1ac7   :  { %v3274_v34 = vpop.eup %3273 }
0x1ac8   :  { %v2018_v10 = vadd.f32 1.0, %v3274_v34  ;;  %3275 = vrcp.f32 %v2011_v21 }
0x1aca   :  { %3277 = vrcp.f32 %v2018_v10 }
0x1ad5   :  { %v3276_v42 = vpop.eup %3275 }
0x1ad6   :  { %v2022_v51 = vmul.f32 %v3276_v42, %v4227_v63 }
0x1ad7   :  { %v3278_v62 = vpop.eup %3277 }
0x1ad8   :  { %v2033_v3 = vmul.f32 %v3278_v62, %v4231_v61 }
0x1b34   :  { %v2025_v8 = vpop.permute.xlu0 %2024 }
0x1b35   :  { %v2027_v39 = vmul.f32 %v3276_v42, %v2025_v8 }
0x1b36   :  { %v2036_v43 = vpop.permute.xlu1 %2035 }
0x1b37   :  { %v2038_v47 = vmul.f32 %v3278_v62, %v2036_v43  ;;  %2029 = vrot.lane.b32.xlu0 %v2027_v39, %s3455_s15 }
0x1b39   :  { %2040 = vrot.lane.b32.xlu1 %v2038_v47, %s3455_s15 }
0x1ba9   :  { %v2030_v58 = vpop.permute.xlu0 %2029 }
0x1baa   :  { %v4265_v33 = vadd.f32 %v2030_v58, %v2022_v51 }
0x1bab   :  { %v2041_v9 = vpop.permute.xlu1 %2040 }
0x1bac   :  { %3279 = vtanh.f32 %v4265_v33  ;;  %v4269_v11 = vadd.f32 %v2041_v9, %v2033_v3 }
0x1bae   :  { %3281 = vtanh.f32 %v4269_v11 }
0x1bb9   :  { %v3280_v12 = vpop.eup %3279 }
0x1bba   :  { %2046 = vrot.lane.b32.xlu0 %v3280_v12, %s3455_s15 }
0x1bbb   :  { %v3282_v41 = vpop.eup %3281 }
0x1bbc   :  { %2052 = vrot.lane.b32.xlu1 %v3282_v41, %s3455_s15 }
0x1c2c   :  { %v2047_v53 = vpop.permute.xlu0 %2046 }
0x1c2d   :  { %v2049_v63 = vmul.f32 %v3276_v42, %v2047_v53 }
0x1c2e   :  { %v2053_v13 = vpop.permute.xlu1 %2052 }
0x1c2f   :  { %v2055_v15 = vmul.f32 %v3278_v62, %v2053_v13  ;;  %2057 = vrot.lane.b32.xlu0 %v2049_v63, %s3456_s17 }
0x1c31   :  { %2062 = vrot.lane.b32.xlu1 %v2055_v15, %s3457_s18 }
0x1ca1   :  { %v2058_v61 = vpop.permute.xlu0 %2057 }
0x1ca2   :  { %2060 = vst.msk [vmem:[#allocation3 + $0x8] sm:$0xff] %vm255_vm8, %v2058_v61 }
0x1ca3   :  { %v2063_v14 = vpop.permute.xlu1 %2062 }
0x1ca4   :  { %2065 = vst.msk [vmem:[#allocation3 + $0x30] sm:$0xff] %vm574_vm10, %v2063_v14  ;;  %v2066_v16 = vsel %vm255_vm8, %v2058_v61, %v2063_v14 }
0x1ca5   :  { %3032 = vmatmul.mubr.msk.f32.vlgmr.msra.gmra.mxu1 %vm427_vm9, %v2066_v16 }
0x1ca6   :  { %2361 = vmatpush1.msra.mxu1 %v4034_v35  ;;  %2408 = vmatprep.mubr.f32.mxu1 %v3454_v45 }
0x1ca7   :  { %2362 = vmatprep.subr.mxu1 %v4040_v32 }
0x1ca8   :  { %2363 = vmatpush1.msra.mxu1 %v4046_v36 }
0x1ca9   :  { %2364 = vmatprep.subr.mxu1 %v4055_v19 }
0x1caa   :  { %2365 = vmatpush1.msra.mxu1 %v4061_v38 }
0x1cab   :  { %2366 = vmatprep.subr.mxu1 %v4067_v4 }
0x1cac   :  { %2367 = vmatpush1.msra.mxu1 %v4073_v2 }
0x1cad   :  { %2368 = vmatprep.subr.mxu1 %v4079_v44 }
0x1cae   :  { %2369 = vmatpush1.msra.mxu1 %v4085_v48 }
0x1caf   :  { %2370 = vmatprep.subr.mxu1 %v4090_v50 }
0x1cb0   :  { %2371 = vmatpush1.msra.mxu1 %v4096_v52 }
0x1cb1   :  { %2372 = vmatprep.subr.mxu1 %v4102_v54 }
0x1cb2   :  { %2373 = vmatpush1.msra.mxu1 %v4107_v56 }
0x1cb3   :  { %2374 = vmatprep.subr.mxu1 %v4112_v57 }
0x1cb4   :  { %2375 = vmatpush1.msra.mxu1 %v4115_v59 }
0x1cb5   :  { %2634 = vmatprep.subr.mxu1 %v4029_v31 }
0x1d65   :  { %v2136_v22 = vpop.f32.mrf.mxu1 }
0x1d66   :  { %v2142_v24 = vadd.f32 %v2136_v22, %v4197_v40 }
0x1d67   :  { %v2138_v17 = vpop.f32.mrf.mxu1 }
0x1d68   :  { %3283 = vtanh.f32 %v2142_v24  ;;  %v2144_v29 = vadd.f32 %v2138_v17, %v4215_v60  ;;  %v2145_v20 = vsub.f32 0.0, %v2142_v24 }
0x1d6a   :  { %3285 = vtanh.f32 %v2144_v29  ;;  %v2152_v28 = vsub.f32 0.0, %v2144_v29  ;;  %v2146_v34 = vmul.f32 1.442695, %v2145_v20 }
0x1d6c   :  { %v2153_v21 = vmul.f32 1.442695, %v2152_v28  ;;  %3287 = vpow2.f32 %v2146_v34 }
0x1d6e   :  { %3289 = vpow2.f32 %v2153_v21 }
0x1d75   :  { %v3284_v18 = vpop.eup %3283 }
0x1d76   :  { %2161 = vrot.lane.b32.xlu0 %v3284_v18, %s3455_s15 }
0x1d77   :  { %v3286_v25 = vpop.eup %3285 }
0x1d78   :  { %2172 = vrot.lane.b32.xlu1 %v3286_v25, %s3455_s15 }
0x1d79   :  { %v3288_v10 = vpop.eup %3287 }
0x1d7a   :  { %v2148_v40 = vadd.f32 1.0, %v3288_v10 }
0x1d7b   :  { %v3290_v42 = vpop.eup %3289 }
0x1d7c   :  { %v2155_v8 = vadd.f32 1.0, %v3290_v42  ;;  %3291 = vrcp.f32 %v2148_v40 }
0x1d7e   :  { %3293 = vrcp.f32 %v2155_v8 }
0x1d89   :  { %v3292_v60 = vpop.eup %3291 }
0x1d8a   :  { %v2159_v58 = vmul.f32 %v3292_v60, %v4265_v33 }
0x1d8b   :  { %v3294_v43 = vpop.eup %3293 }
0x1d8c   :  { %v2170_v12 = vmul.f32 %v3294_v43, %v4269_v11 }
0x1de8   :  { %v2162_v39 = vpop.permute.xlu0 %2161 }
0x1de9   :  { %v2164_v62 = vmul.f32 %v3292_v60, %v2162_v39 }
0x1dea   :  { %v2173_v47 = vpop.permute.xlu1 %2172 }
0x1deb   :  { %v2175_v51 = vmul.f32 %v3294_v43, %v2173_v47  ;;  %2166 = vrot.lane.b32.xlu0 %v2164_v62, %s3455_s15 }
0x1ded   :  { %2177 = vrot.lane.b32.xlu1 %v2175_v51, %s3455_s15 }
0x1e5d   :  { %v2167_v3 = vpop.permute.xlu0 %2166 }
0x1e5e   :  { %v4304_v9 = vadd.f32 %v2167_v3, %v2159_v58 }
0x1e5f   :  { %v2178_v41 = vpop.permute.xlu1 %2177 }
0x1e60   :  { %3295 = vtanh.f32 %v4304_v9  ;;  %v4308_v53 = vadd.f32 %v2178_v41, %v2170_v12 }
0x1e62   :  { %3297 = vtanh.f32 %v4308_v53 }
0x1e6d   :  { %v3296_v63 = vpop.eup %3295 }
0x1e6e   :  { %2183 = vrot.lane.b32.xlu0 %v3296_v63, %s3455_s15 }
0x1e6f   :  { %v3298_v13 = vpop.eup %3297 }
0x1e70   :  { %2189 = vrot.lane.b32.xlu1 %v3298_v13, %s3455_s15 }
0x1ee0   :  { %v2184_v15 = vpop.permute.xlu0 %2183 }
0x1ee1   :  { %v2186_v33 = vmul.f32 %v3292_v60, %v2184_v15 }
0x1ee2   :  { %v2190_v61 = vpop.permute.xlu1 %2189 }
0x1ee3   :  { %v2192_v14 = vmul.f32 %v3294_v43, %v2190_v61  ;;  %2194 = vrot.lane.b32.xlu0 %v2186_v33, %s3456_s17 }
0x1ee5   :  { %2199 = vrot.lane.b32.xlu1 %v2192_v14, %s3457_s18 }
0x1f55   :  { %v2195_v11 = vpop.permute.xlu0 %2194 }
0x1f56   :  { %2197 = vst.msk [vmem:[#allocation3 + $0x10] sm:$0xff] %vm255_vm8, %v2195_v11 }
0x1f57   :  { %v2200_v16 = vpop.permute.xlu1 %2199 }
0x1f58   :  { %2202 = vst.msk [vmem:[#allocation3 + $0x28] sm:$0xff] %vm574_vm10, %v2200_v16  ;;  %v2203_v22 = vsel %vm255_vm8, %v2195_v11, %v2200_v16 }
0x1f59   :  { %3033 = vmatmul.mubr.msk.f32.vlgmr.msra.gmra.mxu0 %vm427_vm9, %v2203_v22 }
0x1f5a   :  { %2498 = vmatpush1.msra.mxu0 %v4034_v35  ;;  %2545 = vmatprep.mubr.f32.mxu0 %v3454_v45 }
0x1f5b   :  { %2499 = vmatprep.subr.mxu0 %v4040_v32 }
0x1f5c   :  { %2500 = vmatpush1.msra.mxu0 %v4046_v36 }
0x1f5d   :  { %2501 = vmatprep.subr.mxu0 %v4055_v19 }
0x1f5e   :  { %2502 = vmatpush1.msra.mxu0 %v4061_v38 }
0x1f5f   :  { %2503 = vmatprep.subr.mxu0 %v4067_v4 }
0x1f60   :  { %2504 = vmatpush1.msra.mxu0 %v4073_v2 }
0x1f61   :  { %2505 = vmatprep.subr.mxu0 %v4079_v44 }
0x1f62   :  { %2506 = vmatpush1.msra.mxu0 %v4085_v48 }
0x1f63   :  { %2507 = vmatprep.subr.mxu0 %v4090_v50 }
0x1f64   :  { %2508 = vmatpush1.msra.mxu0 %v4096_v52 }
0x1f65   :  { %2509 = vmatprep.subr.mxu0 %v4102_v54 }
0x1f66   :  { %2510 = vmatpush1.msra.mxu0 %v4107_v56 }
0x1f67   :  { %2511 = vmatprep.subr.mxu0 %v4112_v57 }
0x1f68   :  { %2512 = vmatpush1.msra.mxu0 %v4115_v59 }
0x1f69   :  { %2771 = vmatprep.subr.mxu0 %v4029_v31 }
0x2019   :  { %v2273_v24 = vpop.f32.mrf.mxu0 }
0x201a   :  { %v2279_v17 = vadd.f32 %v2273_v24, %v4201_v37 }
0x201b   :  { %v2275_v29 = vpop.f32.mrf.mxu0 }
0x201c   :  { %3299 = vtanh.f32 %v2279_v17  ;;  %v2281_v18 = vadd.f32 %v2275_v29, %v4207_v49  ;;  %v2282_v28 = vsub.f32 0.0, %v2279_v17 }
0x201e   :  { %3301 = vtanh.f32 %v2281_v18  ;;  %v2289_v34 = vsub.f32 0.0, %v2281_v18  ;;  %v2283_v21 = vmul.f32 1.442695, %v2282_v28 }
0x2020   :  { %v2290_v10 = vmul.f32 1.442695, %v2289_v34  ;;  %3303 = vpow2.f32 %v2283_v21 }
0x2022   :  { %3305 = vpow2.f32 %v2290_v10 }
0x2029   :  { %v3300_v25 = vpop.eup %3299 }
0x202a   :  { %2298 = vrot.lane.b32.xlu0 %v3300_v25, %s3455_s15 }
0x202b   :  { %v3302_v20 = vpop.eup %3301 }
0x202c   :  { %2309 = vrot.lane.b32.xlu1 %v3302_v20, %s3455_s15 }
0x202d   :  { %v3304_v31 = vpop.eup %3303 }
0x202e   :  { %v2285_v37 = vadd.f32 1.0, %v3304_v31 }
0x202f   :  { %v3306_v42 = vpop.eup %3305 }
0x2030   :  { %v2292_v40 = vadd.f32 1.0, %v3306_v42  ;;  %3307 = vrcp.f32 %v2285_v37 }
0x2032   :  { %3309 = vrcp.f32 %v2292_v40 }
0x203d   :  { %v3308_v49 = vpop.eup %3307 }
0x203e   :  { %v2296_v47 = vmul.f32 %v3308_v49, %v4304_v9 }
0x203f   :  { %v3310_v39 = vpop.eup %3309 }
0x2040   :  { %v2307_v3 = vmul.f32 %v3310_v39, %v4308_v53 }
0x209c   :  { %v2299_v8 = vpop.permute.xlu0 %2298 }
0x209d   :  { %v2301_v60 = vmul.f32 %v3308_v49, %v2299_v8 }
0x209e   :  { %v2310_v62 = vpop.permute.xlu1 %2309 }
0x209f   :  { %v2312_v43 = vmul.f32 %v3310_v39, %v2310_v62  ;;  %2303 = vrot.lane.b32.xlu0 %v2301_v60, %s3455_s15 }
0x20a1   :  { %2314 = vrot.lane.b32.xlu1 %v2312_v43, %s3455_s15 }
0x2111   :  { %v2304_v51 = vpop.permute.xlu0 %2303 }
0x2112   :  { %v4343_v58 = vadd.f32 %v2304_v51, %v2296_v47 }
0x2113   :  { %v2315_v12 = vpop.permute.xlu1 %2314 }
0x2114   :  { %3311 = vtanh.f32 %v4343_v58  ;;  %v4347_v41 = vadd.f32 %v2315_v12, %v2307_v3 }
0x2116   :  { %3313 = vtanh.f32 %v4347_v41 }
0x2121   :  { %v3312_v63 = vpop.eup %3311 }
0x2122   :  { %2320 = vrot.lane.b32.xlu0 %v3312_v63, %s3455_s15 }
0x2123   :  { %v3314_v13 = vpop.eup %3313 }
0x2124   :  { %2326 = vrot.lane.b32.xlu1 %v3314_v13, %s3455_s15 }
0x2194   :  { %v2321_v15 = vpop.permute.xlu0 %2320 }
0x2195   :  { %v2323_v9 = vmul.f32 %v3308_v49, %v2321_v15 }
0x2196   :  { %v2327_v33 = vpop.permute.xlu1 %2326 }
0x2197   :  { %v2329_v61 = vmul.f32 %v3310_v39, %v2327_v33  ;;  %2331 = vrot.lane.b32.xlu0 %v2323_v9, %s3456_s17 }
0x2199   :  { %2336 = vrot.lane.b32.xlu1 %v2329_v61, %s3457_s18 }
0x2209   :  { %v2332_v53 = vpop.permute.xlu0 %2331 }
0x220a   :  { %2334 = vst.msk [vmem:[#allocation3 + $0x18] sm:$0xff] %vm255_vm8, %v2332_v53 }
0x220b   :  { %v2337_v14 = vpop.permute.xlu1 %2336 }
0x220c   :  { %2339 = vst.msk [vmem:[#allocation3 + $0x20] sm:$0xff] %vm574_vm10, %v2337_v14  ;;  %v2340_v11 = vsel %vm255_vm8, %v2332_v53, %v2337_v14 }
0x220d   :  { %3034 = vmatmul.mubr.msk.f32.vlgmr.msra.gmra.mxu1 %vm427_vm9, %v2340_v11 }
0x220e   :  { %2635 = vmatpush1.msra.mxu1 %v4034_v35  ;;  %2682 = vmatprep.mubr.f32.mxu1 %v3454_v45 }
0x220f   :  { %2636 = vmatprep.subr.mxu1 %v4040_v32 }
0x2210   :  { %2637 = vmatpush1.msra.mxu1 %v4046_v36 }
0x2211   :  { %2638 = vmatprep.subr.mxu1 %v4055_v19 }
0x2212   :  { %2639 = vmatpush1.msra.mxu1 %v4061_v38 }
0x2213   :  { %2640 = vmatprep.subr.mxu1 %v4067_v4 }
0x2214   :  { %2641 = vmatpush1.msra.mxu1 %v4073_v2 }
0x2215   :  { %2642 = vmatprep.subr.mxu1 %v4079_v44 }
0x2216   :  { %2643 = vmatpush1.msra.mxu1 %v4085_v48 }
0x2217   :  { %2644 = vmatprep.subr.mxu1 %v4090_v50 }
0x2218   :  { %2645 = vmatpush1.msra.mxu1 %v4096_v52 }
0x2219   :  { %2646 = vmatprep.subr.mxu1 %v4102_v54 }
0x221a   :  { %2647 = vmatpush1.msra.mxu1 %v4107_v56 }
0x221b   :  { %2648 = vmatprep.subr.mxu1 %v4112_v57 }
0x221c   :  { %2649 = vmatpush1.msra.mxu1 %v4115_v59 }
0x22cd   :  { %v2410_v16 = vpop.f32.mrf.mxu1 }
0x22ce   :  { %v2416_v22 = vadd.f32 %v2410_v16, %v4205_v5 }
0x22cf   :  { %v2412_v24 = vpop.f32.mrf.mxu1 }
0x22d0   :  { %3315 = vtanh.f32 %v2416_v22  ;;  %v2418_v17 = vadd.f32 %v2412_v24, %v4203_v1  ;;  %v2419_v25 = vsub.f32 0.0, %v2416_v22 }
0x22d2   :  { %3317 = vtanh.f32 %v2418_v17  ;;  %v2426_v20 = vsub.f32 0.0, %v2418_v17  ;;  %v2420_v28 = vmul.f32 1.442695, %v2419_v25 }
0x22d4   :  { %v2427_v34 = vmul.f32 1.442695, %v2426_v20  ;;  %3319 = vpow2.f32 %v2420_v28 }
0x22d6   :  { %3321 = vpow2.f32 %v2427_v34 }
0x22dd   :  { %v3316_v29 = vpop.eup %3315 }
0x22de   :  { %2435 = vrot.lane.b32.xlu0 %v3316_v29, %s3455_s15 }
0x22df   :  { %v3318_v18 = vpop.eup %3317 }
0x22e0   :  { %2446 = vrot.lane.b32.xlu1 %v3318_v18, %s3455_s15 }
0x22e1   :  { %v3320_v21 = vpop.eup %3319 }
0x22e2   :  { %v2422_v5 = vadd.f32 1.0, %v3320_v21 }
0x22e3   :  { %v3322_v10 = vpop.eup %3321 }
0x22e4   :  { %v2429_v31 = vadd.f32 1.0, %v3322_v10  ;;  %3323 = vrcp.f32 %v2422_v5 }
0x22e6   :  { %3325 = vrcp.f32 %v2429_v31 }
0x22f1   :  { %v3324_v1 = vpop.eup %3323 }
0x22f2   :  { %v2433_v60 = vmul.f32 %v3324_v1, %v4343_v58 }
0x22f3   :  { %v3326_v40 = vpop.eup %3325 }
0x22f4   :  { %v2444_v43 = vmul.f32 %v3326_v40, %v4347_v41 }
0x2350   :  { %v2436_v42 = vpop.permute.xlu0 %2435 }
0x2351   :  { %v2438_v37 = vmul.f32 %v3324_v1, %v2436_v42 }
0x2352   :  { %v2447_v49 = vpop.permute.xlu1 %2446 }
0x2353   :  { %v2449_v8 = vmul.f32 %v3326_v40, %v2447_v49  ;;  %2440 = vrot.lane.b32.xlu0 %v2438_v37, %s3455_s15 }
0x2355   :  { %2451 = vrot.lane.b32.xlu1 %v2449_v8, %s3455_s15 }
0x23c5   :  { %v2441_v39 = vpop.permute.xlu0 %2440 }
0x23c6   :  { %v4381_v62 = vadd.f32 %v2441_v39, %v2433_v60 }
0x23c7   :  { %v2452_v47 = vpop.permute.xlu1 %2451 }
0x23c8   :  { %3327 = vtanh.f32 %v4381_v62  ;;  %v4385_v51 = vadd.f32 %v2452_v47, %v2444_v43 }
0x23ca   :  { %3329 = vtanh.f32 %v4385_v51 }
0x23d5   :  { %v3328_v3 = vpop.eup %3327 }
0x23d6   :  { %2457 = vrot.lane.b32.xlu0 %v3328_v3, %s3455_s15 }
0x23d7   :  { %v3330_v12 = vpop.eup %3329 }
0x23d8   :  { %2463 = vrot.lane.b32.xlu1 %v3330_v12, %s3455_s15 }
0x2448   :  { %v2458_v63 = vpop.permute.xlu0 %2457 }
0x2449   :  { %v2460_v58 = vmul.f32 %v3324_v1, %v2458_v63 }
0x244a   :  { %v2464_v13 = vpop.permute.xlu1 %2463 }
0x244b   :  { %v2466_v15 = vmul.f32 %v3326_v40, %v2464_v13  ;;  %2468 = vrot.lane.b32.xlu0 %v2460_v58, %s3456_s17 }
0x244d   :  { %2473 = vrot.lane.b32.xlu1 %v2466_v15, %s3457_s18 }
0x24bd   :  { %v2469_v41 = vpop.permute.xlu0 %2468 }
0x24be   :  { %2471 = vst.msk [vmem:[#allocation3 + $0x20] sm:$0xff] %vm255_vm8, %v2469_v41 }
0x24bf   :  { %v2474_v9 = vpop.permute.xlu1 %2473 }
0x24c0   :  { %2476 = vst.msk [vmem:[#allocation3 + $0x18] sm:$0xff] %vm574_vm10, %v2474_v9  ;;  %v2477_v33 = vsel %vm255_vm8, %v2469_v41, %v2474_v9 }
0x24c1   :  { %3035 = vmatmul.mubr.msk.f32.vlgmr.msra.gmra.mxu0 %vm427_vm9, %v2477_v33 }
0x24c2   :  { %2772 = vmatpush1.msra.mxu0 %v4034_v35  ;;  %2819 = vmatprep.mubr.f32.mxu0 %v3454_v45 }
0x24c3   :  { %2773 = vmatprep.subr.mxu0 %v4040_v32 }
0x24c4   :  { %2774 = vmatpush1.msra.mxu0 %v4046_v36 }
0x24c5   :  { %2775 = vmatprep.subr.mxu0 %v4055_v19 }
0x24c6   :  { %2776 = vmatpush1.msra.mxu0 %v4061_v38 }
0x24c7   :  { %2777 = vmatprep.subr.mxu0 %v4067_v4 }
0x24c8   :  { %2778 = vmatpush1.msra.mxu0 %v4073_v2 }
0x24c9   :  { %2779 = vmatprep.subr.mxu0 %v4079_v44 }
0x24ca   :  { %2780 = vmatpush1.msra.mxu0 %v4085_v48 }
0x24cb   :  { %2781 = vmatprep.subr.mxu0 %v4090_v50 }
0x24cc   :  { %2782 = vmatpush1.msra.mxu0 %v4096_v52 }
0x24cd   :  { %2783 = vmatprep.subr.mxu0 %v4102_v54 }
0x24ce   :  { %2784 = vmatpush1.msra.mxu0 %v4107_v56 }
0x24cf   :  { %2785 = vmatprep.subr.mxu0 %v4112_v57 }
0x24d0   :  { %2786 = vmatpush1.msra.mxu0 %v4115_v59 }
0x2581   :  { %v2547_v45 = vpop.f32.mrf.mxu0 }
0x2582   :  { %v2553_v35 = vadd.f32 %v2547_v45, %v4213_v55 }
0x2583   :  { %v2549_v32 = vpop.f32.mrf.mxu0 }
0x2584   :  { %3331 = vtanh.f32 %v2553_v35  ;;  %v2555_v36 = vadd.f32 %v2549_v32, %v4199_v7  ;;  %v2556_v4 = vsub.f32 0.0, %v2553_v35 }
0x2586   :  { %3333 = vtanh.f32 %v2555_v36  ;;  %v2563_v2 = vsub.f32 0.0, %v2555_v36  ;;  %v2557_v44 = vmul.f32 1.442695, %v2556_v4 }
0x2588   :  { %v2564_v48 = vmul.f32 1.442695, %v2563_v2  ;;  %3335 = vpow2.f32 %v2557_v44 }
0x258a   :  { %3337 = vpow2.f32 %v2564_v48 }
0x2591   :  { %v3332_v19 = vpop.eup %3331 }
0x2592   :  { %2572 = vrot.lane.b32.xlu0 %v3332_v19, %s3455_s15 }
0x2593   :  { %v3334_v38 = vpop.eup %3333 }
0x2594   :  { %2583 = vrot.lane.b32.xlu1 %v3334_v38, %s3455_s15 }
0x2595   :  { %v3336_v50 = vpop.eup %3335 }
0x2596   :  { %v2559_v54 = vadd.f32 1.0, %v3336_v50 }
0x2597   :  { %v3338_v52 = vpop.eup %3337 }
0x2598   :  { %v2566_v56 = vadd.f32 1.0, %v3338_v52  ;;  %3339 = vrcp.f32 %v2559_v54 }
0x259a   :  { %3341 = vrcp.f32 %v2566_v56 }
0x25a5   :  { %v3340_v57 = vpop.eup %3339 }
0x25a6   :  { %v2570_v14 = vmul.f32 %v3340_v57, %v4381_v62 }
0x25a7   :  { %v3342_v55 = vpop.eup %3341 }
0x25a8   :  { %v2581_v22 = vmul.f32 %v3342_v55, %v4385_v51 }
0x2604   :  { %v2573_v59 = vpop.permute.xlu0 %2572 }
0x2605   :  { %v2575_v7 = vmul.f32 %v3340_v57, %v2573_v59 }
0x2606   :  { %v2584_v61 = vpop.permute.xlu1 %2583 }
0x2607   :  { %v2586_v53 = vmul.f32 %v3342_v55, %v2584_v61  ;;  %2577 = vrot.lane.b32.xlu0 %v2575_v7, %s3455_s15 }
0x2609   :  { %2588 = vrot.lane.b32.xlu1 %v2586_v53, %s3455_s15 }
0x2679   :  { %v2578_v11 = vpop.permute.xlu0 %2577 }
0x267a   :  { %v2580_v16 = vadd.f32 %v2578_v11, %v2570_v14 }
0x267b   :  { %v2589_v24 = vpop.permute.xlu1 %2588 }
0x267c   :  { %3343 = vtanh.f32 %v2580_v16  ;;  %v2591_v17 = vadd.f32 %v2589_v24, %v2581_v22 }
0x267e   :  { %3345 = vtanh.f32 %v2591_v17 }
0x2689   :  { %v3344_v29 = vpop.eup %3343 }
0x268a   :  { %2594 = vrot.lane.b32.xlu0 %v3344_v29, %s3455_s15 }
0x268b   :  { %v3346_v18 = vpop.eup %3345 }
0x268c   :  { %2600 = vrot.lane.b32.xlu1 %v3346_v18, %s3455_s15 }
0x26fc   :  { %v2595_v25 = vpop.permute.xlu0 %2594 }
0x26fd   :  { %v2597_v20 = vmul.f32 %v3340_v57, %v2595_v25 }
0x26fe   :  { %v2601_v28 = vpop.permute.xlu1 %2600 }
0x26ff   :  { %v2603_v34 = vmul.f32 %v3342_v55, %v2601_v28  ;;  %2605 = vrot.lane.b32.xlu0 %v2597_v20, %s3456_s17 }
0x2701   :  { %2610 = vrot.lane.b32.xlu1 %v2603_v34, %s3457_s18 }
0x2771   :  { %v2606_v21 = vpop.permute.xlu0 %2605 }
0x2772   :  { %2608 = vst.msk [vmem:[#allocation3 + $0x28] sm:$0xff] %vm255_vm8, %v2606_v21 }
0x2773   :  { %v2611_v10 = vpop.permute.xlu1 %2610 }
0x2774   :  { %2613 = vst.msk [vmem:[#allocation3 + $0x10] sm:$0xff] %vm574_vm10, %v2611_v10  ;;  %v2614_v5 = vsel %vm255_vm8, %v2606_v21, %v2611_v10  ;;  %v3038_v21 = vld [vmem:[%s4490_s4] ss:$0 sm:$0xff]  ;;  %s3458_s4 = smov [#allocation8]  }
0x2775   :  { %3036 = vmatmul.mubr.msk.f32.vlgmr.msra.gmra.mxu1 %vm427_vm9, %v2614_v5 }
0x2835   :  { %v2684_v31 = vpop.f32.mrf.mxu1 }
0x2836   :  { %v2690_v1 = vadd.f32 %v2684_v31, %v4218_v23 }
0x2837   :  { %v2686_v42 = vpop.f32.mrf.mxu1 }
0x2838   :  { %3347 = vtanh.f32 %v2690_v1  ;;  %v2692_v37 = vadd.f32 %v2686_v42, %v4195_v30  ;;  %v2693_v8 = vsub.f32 0.0, %v2690_v1 }
0x283a   :  { %3349 = vtanh.f32 %v2692_v37  ;;  %v2700_v60 = vsub.f32 0.0, %v2692_v37  ;;  %v2694_v39 = vmul.f32 1.442695, %v2693_v8 }
0x283c   :  { %v2701_v62 = vmul.f32 1.442695, %v2700_v60  ;;  %3351 = vpow2.f32 %v2694_v39 }
0x283e   :  { %3353 = vpow2.f32 %v2701_v62 }
0x2845   :  { %v3348_v40 = vpop.eup %3347 }
0x2846   :  { %2709 = vrot.lane.b32.xlu0 %v3348_v40, %s3455_s15 }
0x2847   :  { %v3350_v49 = vpop.eup %3349 }
0x2848   :  { %2720 = vrot.lane.b32.xlu1 %v3350_v49, %s3455_s15 }
0x2849   :  { %v3352_v43 = vpop.eup %3351 }
0x284a   :  { %v2696_v23 = vadd.f32 1.0, %v3352_v43 }
0x284b   :  { %v3354_v47 = vpop.eup %3353 }
0x284c   :  { %v2703_v51 = vadd.f32 1.0, %v3354_v47  ;;  %3355 = vrcp.f32 %v2696_v23 }
0x284e   :  { %3357 = vrcp.f32 %v2703_v51 }
0x2859   :  { %v3356_v30 = vpop.eup %3355 }
0x285a   :  { %v2707_v15 = vmul.f32 %v3356_v30, %v2580_v16 }
0x285b   :  { %v3358_v63 = vpop.eup %3357 }
0x285c   :  { %v2718_v33 = vmul.f32 %v3358_v63, %v2591_v17 }
0x28b8   :  { %v2710_v3 = vpop.permute.xlu0 %2709 }
0x28b9   :  { %v2712_v12 = vmul.f32 %v3356_v30, %v2710_v3 }
0x28ba   :  { %v2721_v58 = vpop.permute.xlu1 %2720 }
0x28bb   :  { %v2723_v13 = vmul.f32 %v3358_v63, %v2721_v58  ;;  %2714 = vrot.lane.b32.xlu0 %v2712_v12, %s3455_s15 }
0x28bd   :  { %2725 = vrot.lane.b32.xlu1 %v2723_v13, %s3455_s15 }
0x292d   :  { %v2715_v41 = vpop.permute.xlu0 %2714 }
0x292e   :  { %v2717_v9 = vadd.f32 %v2715_v41, %v2707_v15 }
0x292f   :  { %v2726_v45 = vpop.permute.xlu1 %2725 }
0x2930   :  { %3359 = vtanh.f32 %v2717_v9  ;;  %v2728_v35 = vadd.f32 %v2726_v45, %v2718_v33 }
0x2932   :  { %3361 = vtanh.f32 %v2728_v35 }
0x293d   :  { %v3360_v32 = vpop.eup %3359 }
0x293e   :  { %2731 = vrot.lane.b32.xlu0 %v3360_v32, %s3455_s15 }
0x293f   :  { %v3362_v36 = vpop.eup %3361 }
0x2940   :  { %2737 = vrot.lane.b32.xlu1 %v3362_v36, %s3455_s15 }
0x29b0   :  { %v2732_v19 = vpop.permute.xlu0 %2731 }
0x29b1   :  { %v2734_v38 = vmul.f32 %v3356_v30, %v2732_v19 }
0x29b2   :  { %v2738_v4 = vpop.permute.xlu1 %2737 }
0x29b3   :  { %v2740_v2 = vmul.f32 %v3358_v63, %v2738_v4  ;;  %2742 = vrot.lane.b32.xlu0 %v2734_v38, %s3456_s17 }
0x29b5   :  { %2747 = vrot.lane.b32.xlu1 %v2740_v2, %s3457_s18 }
0x2a25   :  { %v2743_v44 = vpop.permute.xlu0 %2742 }
0x2a26   :  { %2745 = vst.msk [vmem:[#allocation3 + $0x30] sm:$0xff] %vm255_vm8, %v2743_v44 }
0x2a27   :  { %v2748_v48 = vpop.permute.xlu1 %2747 }
0x2a28   :  { %2750 = vst.msk [vmem:[#allocation3 + $0x8] sm:$0xff] %vm574_vm10, %v2748_v48  ;;  %v2751_v50 = vsel %vm255_vm8, %v2743_v44, %v2748_v48 }
0x2a29   :  { %3037 = vmatmul.mubr.msk.f32.vlgmr.msra.gmra.mxu0 %vm427_vm9, %v2751_v50 }
0x2ae9   :  { %v2821_v52 = vpop.f32.mrf.mxu0 }
0x2aea   :  { %v2827_v54 = vadd.f32 %v2821_v52, %v4222_v0 }
0x2aeb   :  { %v2823_v56 = vpop.f32.mrf.mxu0 }
0x2aec   :  { %3363 = vtanh.f32 %v2827_v54  ;;  %v2829_v57 = vadd.f32 %v2823_v56, %v4191_v46  ;;  %v2830_v55 = vsub.f32 0.0, %v2827_v54 }
0x2aee   :  { %3365 = vtanh.f32 %v2829_v57  ;;  %v2831_v61 = vmul.f32 1.442695, %v2830_v55  ;;  %v2837_v53 = vsub.f32 0.0, %v2829_v57 }
0x2af0   :  { %3367 = vpow2.f32 %v2831_v61  ;;  %v2838_v14 = vmul.f32 1.442695, %v2837_v53 }
0x2af2   :  { %3369 = vpow2.f32 %v2838_v14 }
0x2af9   :  { %v3364_v59 = vpop.eup %3363 }
0x2afa   :  { %2846 = vrot.lane.b32.xlu0 %v3364_v59, %s3455_s15 }
0x2afb   :  { %v3366_v7 = vpop.eup %3365 }
0x2afd   :  { %v3368_v11 = vpop.eup %3367 }
0x2afe   :  { %2857 = vrot.lane.b32.xlu0 %v3366_v7, %s3455_s15  ;;  %v2833_v16 = vadd.f32 1.0, %v3368_v11 }
0x2aff   :  { %v3370_v0 = vpop.eup %3369 }
0x2b00   :  { %3371 = vrcp.f32 %v2833_v16  ;;  %v2840_v22 = vadd.f32 1.0, %v3370_v0 }
0x2b02   :  { %3373 = vrcp.f32 %v2840_v22 }
0x2b0d   :  { %v3372_v46 = vpop.eup %3371 }
0x2b0e   :  { %v2844_v20 = vmul.f32 %v3372_v46, %v2717_v9 }
0x2b0f   :  { %v3374_v29 = vpop.eup %3373 }
0x2b10   :  { %v2855_v31 = vmul.f32 %v3374_v29, %v2728_v35 }
0x2b6c   :  { %v2847_v24 = vpop.permute.xlu0 %2846 }
0x2b6d   :  { %v2849_v17 = vmul.f32 %v3372_v46, %v2847_v24 }
0x2b6f   :  { %2851 = vrot.lane.b32.xlu1 %v2849_v17, %s3455_s15 }
0x2b70   :  { %v2858_v18 = vpop.permute.xlu0 %2857 }
0x2b71   :  { %v2860_v25 = vmul.f32 %v3374_v29, %v2858_v18 }
0x2b73   :  { %2862 = vrot.lane.b32.xlu0 %v2860_v25, %s3455_s15 }
0x2b77   :  { %2916 = vrot.lane.b32.xlu0 %v3038_v21, %s3455_s15 }
0x2be1   :  { %v2852_v28 = vpop.permute.xlu1 %2851 }
0x2be2   :  { %v2854_v34 = vadd.f32 %v2852_v28, %v2844_v20 }
0x2be4   :  { %3375 = vtanh.f32 %v2854_v34 }
0x2be5   :  { %v2863_v5 = vpop.permute.xlu0 %2862 }
0x2be6   :  { %v2865_v1 = vadd.f32 %v2863_v5, %v2855_v31 }
0x2be8   :  { %3377 = vtanh.f32 %v2865_v1 }
0x2be9   :  { %v2917_v39 = vpop.permute.xlu0 %2916 }
0x2bf1   :  { %v3376_v10 = vpop.eup %3375 }
0x2bf2   :  { %2868 = vrot.lane.b32.xlu1 %v3376_v10, %s3455_s15 }
0x2bf5   :  { %v3378_v40 = vpop.eup %3377 }
0x2c64   :  { %v2869_v42 = vpop.permute.xlu1 %2868 }
0x2c65   :  { %v2871_v37 = vmul.f32 %v3372_v46, %v2869_v42 }
0x2c67   :  { %2879 = vrot.lane.b32.xlu1 %v2871_v37, %s3456_s17 }
0x2c6b   :  { %2874 = vrot.lane.b32.xlu1 %v3378_v40, %s3455_s15  ;;  %s2950_s15 = sshll.u32 %s3458_s4, 4  ;;  %s2951_s15 = int_to_ptr.vmem [resolvable:$true] %s2950_s15 }
0x2c6c   :  { %s3403_s17 = scalar_lea.vmem %s2951_s15, 512  ;;  %p3408_p6 = scmp.lt.s32.totalorder %s2951_s15, %s2951_s15 }
0x2c6d   :  { %p3404_p5 = scmp.ne.s32.totalorder %s2951_s15, %s3403_s17  ;;  %p3409_p7 = scmp.lt.s32.totalorder %s3403_s17, %s3403_s17 }
0x2c6f   :  { %p3410_p8 = por %p3409_p7, %p3408_p6 }
0x2c71   :  { %p3411_p9 = pnand %p3410_p8, %p3404_p5 }
0x2cd9   :  { %v2880_v49 = vpop.permute.xlu1 %2879 }
0x2cda   :  { %2882 = vst.msk [vmem:[#allocation3 + $0x38] sm:$0xff] %vm255_vm8, %v2880_v49 }
0x2cdd   :  { %v2875_v8 = vpop.permute.xlu1 %2874 }
0x2cde   :  { %v2877_v60 = vmul.f32 %v3374_v29, %v2875_v8 }
0x2ce0   :  { %2884 = vrot.lane.b32.xlu1 %v2877_v60, %s3457_s18 }
0x2ce1   :  { %v2909_v62 = vld [vmem:[#allocation3 + $0x38] sm:$0xff] }
0x2ce2   :  { %v2919_v43 = vmul.f32 %v2917_v39, %v2909_v62 }
0x2ce4   :  { %2921 = vrot.lane.b32.xlu0 %v2919_v43, %s3457_s18  ;;  %1562 = vrot.lane.b32.xlu1 %v4148_v6, %s3457_s18 }
0x2ce8   :  { %1568 = vrot.lane.b32.xlu1 %v4013_v26, %s3457_s18 }
0x2cec   :  { %1573 = vrot.lane.b32.xlu1 %v4017_v27, %s3457_s18 }
0x2d52   :  { %v2885_v47 = vpop.permute.xlu1 %2884 }
0x2d53   :  { %2887 = vst.msk [vmem:[#allocation3] sm:$0xff] %vm574_vm10, %v2885_v47  ;;  %v2888_v23 = vsel %vm255_vm8, %v2880_v49, %v2885_v47 }
0x2d54   :  { %2890 = vst.msk [vmem:[#allocation8 + $0x10] sm:$0xff] %vm255_vm8, %v2888_v23  ;;  %2892 = vrot.lane.b32.xlu1 %v2888_v23, %s3457_s18 }
0x2d56   :  { %v2922_v51 = vpop.permute.xlu0 %2921  ;;  %v1563_v30 = vpop.permute.xlu1 %1562 }
0x2d57   :  { %v2924_v3 = vsel %vm255_vm8, %v2922_v51, 0.0  ;;  %1566 = vst.msk [vmem:[#allocation8 + $0x8] sm:$0xff] %vm255_vm8, %v1563_v30 }
0x2d58   :  { %2925 = vadd.xlane.f32.xlu0 %v2924_v3  ;;  %2898 = vrot.lane.b32.xlu1 %v2854_v34, %s3457_s18 }
0x2d5a   :  { %v1569_v26 = vpop.permute.xlu1 %1568 }
0x2d5b   :  { %1571 = vst.msk [vmem:[#allocation9] sm:$0xff] %vm255_vm8, %v1569_v26 }
0x2d5c   :  { %2904 = vrot.lane.b32.xlu1 %v2865_v1, %s3457_s18 }
0x2d5e   :  { %v1574_v27 = vpop.permute.xlu1 %1573 }
0x2d5f   :  { %1577 = vst.msk [vmem:[#allocation9 + $0x8] sm:$0xff] %vm255_vm8, %v1574_v27 }
0x2dc6   :  { %v2893_v6 = vpop.permute.xlu1 %2892 }
0x2dc7   :  { %2896 = vst.msk [vmem:[#allocation8 + $0x18] sm:$0xff] %vm255_vm8, %v2893_v6 }
0x2dc8   :  { %3414 = shalt.err (!%p3411_p9)
}
0x2dc9   :  { %s3459_s13 = smov 128   ;;  %s3460_s14 = smov 8  }
0x2dca   :  { %2956 = dma.vmem_to_hbm [thread:$0]  %s2951_s15, 512, %s4497_s11, [#allocation7], %s3459_s13, %s3459_s13, %s3460_s14   ;;  %v2899_v12 = vpop.permute.xlu1 %2898 }
0x2dcb   :  { %s3461_s8 = smov [#allocation9]   ;;  %2902 = vst.msk [vmem:[#allocation9 + $0x10] sm:$0xff] %vm255_vm8, %v2899_v12 }
0x2dcc   :  { %s2962_s19 = sshll.u32 %s3461_s8, 4  ;;  %s2963_s19 = int_to_ptr.vmem [resolvable:$true] %s2962_s19 }
0x2dcd   :  { %s3423_s20 = scalar_lea.vmem %s2963_s19, 512  ;;  %p3428_p11 = scmp.lt.s32.totalorder %s2963_s19, %s2963_s19 }
0x2dce   :  { %v2905_v63 = vpop.permute.xlu1 %2904  ;;  %p3424_p10 = scmp.ne.s32.totalorder %s2963_s19, %s3423_s20  ;;  %p3429_p12 = scmp.lt.s32.totalorder %s3423_s20, %s3423_s20 }
0x2dcf   :  { %2908 = vst.msk [vmem:[#allocation9 + $0x18] sm:$0xff] %vm255_vm8, %v2905_v63 }
0x2dd0   :  { %p3430_p13 = por %p3429_p12, %p3428_p11 }
0x2dd2   :  { %p3431_p0 = pnand %p3430_p13, %p3424_p10 }
0x2dd4   :  { %3434 = shalt.err (!%p3431_p0)
}
0x2dd5   :  { %2968 = dma.vmem_to_hbm [thread:$0]  %s2963_s19, 512, %s4498_s12, [#allocation10], %s3459_s13, %s3459_s13, %s3460_s14   ;;  %v3039_v58 = vld [vmem:[#allocation4] ss:$0 sm:$0xff]  ;;  %vm2941_vm11 = vcmask 7168  }
0x2de1   :  { %v2926_v13 = vpop.xlane.xlu0 %2925 }
0x2de2   :  { %v2934_v15 = vadd.f32 %v3039_v58, %v2926_v13 }
0x2de4   :  { %v2935_v41 = vsub.f32 0.0, %v2934_v15 }
0x2de6   :  { %v2936_v9 = vmul.f32 1.442695, %v2935_v41 }
0x2de8   :  { %3379 = vpow2.f32 %v2936_v9 }
0x2df5   :  { %v3380_v33 = vpop.eup %3379 }
0x2df6   :  { %v2938_v45 = vadd.f32 1.0, %v3380_v33 }
0x2df8   :  { %3381 = vrcp.f32 %v2938_v45 }
0x2e05   :  { %v3382_v35 = vpop.eup %3381 }
0x2e06   :  { %2942 = vst.msk [vmem:[%s4496_s10] sm:$0xff] %vm2941_vm11, %v3382_v35 }
0x2e07   :  { %3445 = dma.done.wait [#allocation7], 512  }
0x2e08   :  { %3446 = vsyncadd [#allocation7], 4294966784 }
0x2e09   :  { %3447 = dma.done.wait [#allocation10], 512  }
0x2e0a   :  { %3448 = vsyncadd [#allocation10], 4294966784 }
0x2e0b   :  { %2977 = vsyncpa [#allocation6], 1 }
0x2e0c   :  { %2978 = vsyncpa [#allocation7], 1 }
0x2e0d   :  { %2979 = vsyncpa [#allocation10], 1 }

</bundles_post_ra>
